<compile_context>
chip_gen: v7x
topology: tpu7x:2x2x1
jax: 0.10.0
libtpu: 0.0.40
codegen_flags: <defaults>
</compile_context>

<pallas_src>
import math

import jax
import jax.numpy as jnp
from jax.experimental import pallas as pl
from jax.experimental.pallas import tpu as pltpu  # noqa: F401  (TPU backend)

jax.config.update("jax_default_matmul_precision", "highest")

# ---------------- small, deterministic config ----------------
S = 8                 # seq_len
B = 2                 # batch
W_NTOKENS = 50
W_EMSIZE = 32         # mix_type='sum' -> d_model = w_emsize
G_NTOKENS = 12
G_EMSIZE = 16
NHEAD = 4
D_HID = 64
NLAYERS = 2
D_MODEL = W_EMSIZE
HEAD_DIM = D_MODEL // NHEAD
LN_EPS = 1e-5
NEG = -1e9            # finite "-inf" for additive masks
BS = B * S
NPAD = 128            # lane-padded decoder output width (>= W_NTOKENS)
LOG2S = int(math.log2(S))
assert (1 << LOG2S) == S, "S must be a power of two for the in-kernel mask"


# ---------------- fused Pallas kernel ----------------
def _ln(x, g, b):
    mu = jnp.mean(x, axis=-1, keepdims=True)
    var = jnp.mean((x - mu) ** 2, axis=-1, keepdims=True)
    return (x - mu) * jax.lax.rsqrt(var + LN_EPS) * g + b


def fused_forward_kernel(w_ref, g_ref, gw_ref, gb_ref, pe_ref, pad_ref,
                         inw_ref, inb_ref, ow_ref, ob_ref,
                         g1_ref, be1_ref, w1_ref, b1_ref,
                         w2_ref, b2_ref, g2_ref, be2_ref,
                         dw_ref, db_ref, out_ref):
    scale = math.sqrt(D_MODEL)
    inv_sqrt_hd = 1.0 / math.sqrt(HEAD_DIM)

    # ---- mix: w_emb + Linear_g2w(g_emb), * sqrt(d_model), + positional enc ----
    g2w = jnp.dot(g_ref[...], gw_ref[...],
                  preferred_element_type=jnp.float32) + gb_ref[...]
    pe = jnp.tile(pe_ref[...], (B, 1))                        # [BS, D]
    x = (w_ref[...] + g2w) * scale + pe                       # [BS, D]

    # ---- additive mask [BS, BS]: block-diag causal + key padding (in-kernel) --
    r = jax.lax.broadcasted_iota(jnp.int32, (BS, BS), 0)
    c = jax.lax.broadcasted_iota(jnp.int32, (BS, BS), 1)
    same_batch = (r >> LOG2S) == (c >> LOG2S)
    causal = (c & (S - 1)) <= (r & (S - 1))
    mask = jnp.where(same_batch & causal, 0.0, NEG)
    mask = mask + jnp.where(pad_ref[...] > 0.5, NEG, 0.0)     # [1,BS] -> rows

    # ---- transformer encoder layers (post-LN, relu), static unroll ----
    for l in range(NLAYERS):
        qkv = jnp.dot(x, inw_ref[l],
                      preferred_element_type=jnp.float32) + inb_ref[l]   # [BS,3D]
        heads = []
        for h in range(NHEAD):                                 # static head loop
            q = qkv[:, h * HEAD_DIM:(h + 1) * HEAD_DIM]
            k = qkv[:, D_MODEL + h * HEAD_DIM:D_MODEL + (h + 1) * HEAD_DIM]
            v = qkv[:, 2 * D_MODEL + h * HEAD_DIM:2 * D_MODEL + (h + 1) * HEAD_DIM]
            s = jnp.dot(q, k.T, preferred_element_type=jnp.float32) * inv_sqrt_hd
            s = s + mask
            s = s - jnp.max(s, axis=-1, keepdims=True)
            p = jnp.exp(s)
            p = p / jnp.sum(p, axis=-1, keepdims=True)
            heads.append(jnp.dot(p, v, preferred_element_type=jnp.float32))
        ctx = jnp.concatenate(heads, axis=-1)                  # [BS, D]
        attn = jnp.dot(ctx, ow_ref[l],
                       preferred_element_type=jnp.float32) + ob_ref[l]

        y = _ln(x + attn, g1_ref[l], be1_ref[l])
        hdn = jnp.maximum(
            jnp.dot(y, w1_ref[l], preferred_element_type=jnp.float32) + b1_ref[l],
            0.0)
        ff = jnp.dot(hdn, w2_ref[l],
                     preferred_element_type=jnp.float32) + b2_ref[l]
        x = _ln(y + ff, g2_ref[l], be2_ref[l])

    # ---- decoder, lane-padded to NPAD columns (dense vst) ----
    out_ref[...] = jnp.dot(x, dw_ref[...],
                           preferred_element_type=jnp.float32) + db_ref[...]


# ---------------- parameter setup (deterministic, PyTorch layouts) ----------------
def make_pe(seq_len, d_model):
    position = jnp.arange(seq_len, dtype=jnp.float32)[:, None]
    div_term = jnp.exp(jnp.arange(0, d_model, 2, dtype=jnp.float32)
                       * (-math.log(10000.0) / d_model))
    pe = jnp.zeros((seq_len, d_model), jnp.float32)
    pe = pe.at[:, 0::2].set(jnp.sin(position * div_term))
    pe = pe.at[:, 1::2].set(jnp.cos(position * div_term))
    return pe


def init_params(key):
    ks = iter(jax.random.split(key, 16 + 12 * NLAYERS))

    def u(shape, scale):
        return jax.random.uniform(next(ks), shape, jnp.float32, -scale, scale)

    w_table = u((W_NTOKENS, W_EMSIZE), 0.1)                       # encoder.weight
    g_table = jax.random.normal(next(ks), (G_NTOKENS + 1, G_EMSIZE), jnp.float32)
    g_table = g_table.at[G_NTOKENS].set(0.0)                      # padding_idx row
    kg = 1.0 / math.sqrt(G_EMSIZE)
    g2w_w = u((W_EMSIZE, G_EMSIZE), kg)                           # g2w_encoder [out,in]
    g2w_b = u((W_EMSIZE,), kg)
    kd = 1.0 / math.sqrt(D_MODEL)
    dec_w = u((W_NTOKENS, D_MODEL), kd)                           # decoder [out,in]
    dec_b = u((W_NTOKENS,), kd)

    layers = []
    for _ in range(NLAYERS):
        layers.append(dict(
            in_proj_w=u((3 * D_MODEL, D_MODEL), math.sqrt(6.0 / (4 * D_MODEL))),
            in_proj_b=jnp.zeros((3 * D_MODEL,), jnp.float32),
            out_proj_w=u((D_MODEL, D_MODEL), kd),
            out_proj_b=jnp.zeros((D_MODEL,), jnp.float32),
            lin1_w=u((D_HID, D_MODEL), kd),
            lin1_b=u((D_HID,), kd),
            lin2_w=u((D_MODEL, D_HID), 1.0 / math.sqrt(D_HID)),
            lin2_b=u((D_MODEL,), 1.0 / math.sqrt(D_HID)),
            ln1_g=jnp.ones((D_MODEL,), jnp.float32),
            ln1_b=jnp.zeros((D_MODEL,), jnp.float32),
            ln2_g=jnp.ones((D_MODEL,), jnp.float32),
            ln2_b=jnp.zeros((D_MODEL,), jnp.float32),
        ))
    return dict(w_table=w_table, g_table=g_table, g2w_w=g2w_w, g2w_b=g2w_b,
                dec_w=dec_w, dec_b=dec_b, layers=layers, pe=make_pe(S, D_MODEL))


def stack_layers(layers):
    """Stack per-layer params on a leading NLAYERS axis, lane-packed layouts."""
    st = lambda f: jnp.stack([f(l) for l in layers])
    return dict(
        inw=st(lambda l: l["in_proj_w"].T),            # [L, D, 3D]  cols = q|k|v
        inb=st(lambda l: l["in_proj_b"][None, :]),     # [L, 1, 3D]
        ow=st(lambda l: l["out_proj_w"].T),            # [L, D, D]
        ob=st(lambda l: l["out_proj_b"][None, :]),     # [L, 1, D]
        g1=st(lambda l: l["ln1_g"][None, :]),
        be1=st(lambda l: l["ln1_b"][None, :]),
        w1=st(lambda l: l["lin1_w"].T),                # [L, D, F]
        b1=st(lambda l: l["lin1_b"][None, :]),
        w2=st(lambda l: l["lin2_w"].T),                # [L, F, D]
        b2=st(lambda l: l["lin2_b"][None, :]),
        g2=st(lambda l: l["ln2_g"][None, :]),
        be2=st(lambda l: l["ln2_b"][None, :]),
    )


# ---------------- Pallas forward (single fused call) ----------------
def pallas_forward(src, gestures, key_pad, params):
    # Embedding gathers are plain-JAX glue.
    w_emb = params["w_table"][src]                               # [S, B, Dw]
    g_emb = params["g_table"][gestures]                          # [S, B, Dg]
    w2d = jnp.transpose(w_emb, (1, 0, 2)).reshape(BS, W_EMSIZE)  # batch-major rows
    g2d = jnp.transpose(g_emb, (1, 0, 2)).reshape(BS, G_EMSIZE)
    padf = key_pad.astype(jnp.float32).reshape(1, BS)            # 1.0 where padded

    stk = stack_layers(params["layers"])
    dec_w_pad = jnp.zeros((D_MODEL, NPAD), jnp.float32).at[:, :W_NTOKENS].set(
        params["dec_w"].T)
    dec_b_pad = jnp.zeros((1, NPAD), jnp.float32).at[:, :W_NTOKENS].set(
        params["dec_b"])

    out = pl.pallas_call(
        fused_forward_kernel,
        out_shape=jax.ShapeDtypeStruct((BS, NPAD), jnp.float32),
    )(w2d, g2d, params["g2w_w"].T, params["g2w_b"][None, :],
      params["pe"], padf,
      stk["inw"], stk["inb"], stk["ow"], stk["ob"],
      stk["g1"], stk["be1"], stk["w1"], stk["b1"],
      stk["w2"], stk["b2"], stk["g2"], stk["be2"],
      dec_w_pad, dec_b_pad)

    logits = out[:, :W_NTOKENS].reshape(B, S, W_NTOKENS)
    return jnp.transpose(logits, (1, 0, 2))                     # [S, B, ntokens]


# ---------------- pure-JAX reference (PyTorch semantics) ----------------
def combined_mask(key_pad):
    causal = jnp.where(jnp.triu(jnp.ones((S, S), bool), k=1), NEG, 0.0).astype(jnp.float32)
    pad = jnp.where(key_pad, NEG, 0.0).astype(jnp.float32)[:, None, :]
    return causal[None, :, :] + pad                              # [B, S, S]


def ref_layer(x, mask, rp):
    Bc, Sc, Dc = x.shape
    H, hd = NHEAD, HEAD_DIM
    Wq_t, Wk_t, Wv_t = (rp["in_proj_w"][:Dc].T, rp["in_proj_w"][Dc:2 * Dc].T,
                        rp["in_proj_w"][2 * Dc:].T)
    bq, bk, bv = (rp["in_proj_b"][:Dc], rp["in_proj_b"][Dc:2 * Dc],
                  rp["in_proj_b"][2 * Dc:])
    q = (x @ Wq_t + bq).reshape(Bc, Sc, H, hd)
    k = (x @ Wk_t + bk).reshape(Bc, Sc, H, hd)
    v = (x @ Wv_t + bv).reshape(Bc, Sc, H, hd)
    s = jnp.einsum("bqhd,bkhd->bhqk", q, k) / math.sqrt(hd) + mask[:, None, :, :]
    p = jax.nn.softmax(s, axis=-1)
    ctx = jnp.einsum("bhqk,bkhd->bqhd", p, v).reshape(Bc, Sc, Dc)
    attn = ctx @ rp["out_proj_w"].T + rp["out_proj_b"]

    def ln(z, g, b):
        mu = z.mean(-1, keepdims=True)
        var = ((z - mu) ** 2).mean(-1, keepdims=True)
        return (z - mu) / jnp.sqrt(var + LN_EPS) * g + b

    y = ln(x + attn, rp["ln1_g"], rp["ln1_b"])
    hdn = jax.nn.relu(y @ rp["lin1_w"].T + rp["lin1_b"])
    ff = hdn @ rp["lin2_w"].T + rp["lin2_b"]
    return ln(y + ff, rp["ln2_g"], rp["ln2_b"])


def ref_forward(src, gestures, key_pad, params):
    w_emb = params["w_table"][src]
    g_emb = params["g_table"][gestures] @ params["g2w_w"].T + params["g2w_b"]
    x = (w_emb + g_emb) * math.sqrt(D_MODEL) + params["pe"][:, None, :]
    x = jnp.transpose(x, (1, 0, 2))
    mask = combined_mask(key_pad)
    for rp in params["layers"]:
        x = ref_layer(x, mask, rp)
    x = jnp.transpose(x, (1, 0, 2))
    return x @ params["dec_w"].T + params["dec_b"]


# ---------------- main ----------------
if __name__ == "__main__":
    params = init_params(jax.random.PRNGKey(0))
    k1, k2 = jax.random.split(jax.random.PRNGKey(42))
    src = jax.random.randint(k1, (S, B), 0, W_NTOKENS, dtype=jnp.int32)
    gestures = jax.random.randint(k2, (S, B), 0, G_NTOKENS, dtype=jnp.int32)
    # batch 1: last two positions padded (key_padding_mask True = pad)
    key_pad = jnp.zeros((B, S), bool).at[1, S - 2:].set(True)
    gestures = gestures.at[S - 2:, 1].set(G_NTOKENS)   # padding_idx gesture token

    out = pallas_forward(src, gestures, key_pad, params)
    out = jax.block_until_ready(out)

    ref = ref_forward(src, gestures, key_pad, params)
    assert out.shape == (S, B, W_NTOKENS)
    assert jnp.allclose(out, ref, atol=1e-3, rtol=1e-3), \
        float(jnp.max(jnp.abs(out - ref)))
    print("KERNEL_OK")
</pallas_src>

<mosaic_0001>
module attributes {stable_mosaic.version = 11 : i64} {
  func.func @fused_forward_kernel(%arg0: memref<16x32xf32, #tpu.memory_space<vmem>>, %arg1: memref<16x16xf32, #tpu.memory_space<vmem>>, %arg2: memref<16x32xf32, #tpu.memory_space<vmem>>, %arg3: memref<1x32xf32, #tpu.memory_space<vmem>>, %arg4: memref<8x32xf32, #tpu.memory_space<vmem>>, %arg5: memref<1x16xf32, #tpu.memory_space<vmem>>, %arg6: memref<2x32x96xf32, #tpu.memory_space<vmem>>, %arg7: memref<2x1x96xf32, #tpu.memory_space<vmem>>, %arg8: memref<2x32x32xf32, #tpu.memory_space<vmem>>, %arg9: memref<2x1x32xf32, #tpu.memory_space<vmem>>, %arg10: memref<2x1x32xf32, #tpu.memory_space<vmem>>, %arg11: memref<2x1x32xf32, #tpu.memory_space<vmem>>, %arg12: memref<2x32x64xf32, #tpu.memory_space<vmem>>, %arg13: memref<2x1x64xf32, #tpu.memory_space<vmem>>, %arg14: memref<2x64x32xf32, #tpu.memory_space<vmem>>, %arg15: memref<2x1x32xf32, #tpu.memory_space<vmem>>, %arg16: memref<2x1x32xf32, #tpu.memory_space<vmem>>, %arg17: memref<2x1x32xf32, #tpu.memory_space<vmem>>, %arg18: memref<32x128xf32, #tpu.memory_space<vmem>>, %arg19: memref<1x128xf32, #tpu.memory_space<vmem>>, %arg20: memref<16x128xf32, #tpu.memory_space<vmem>>) attributes {dimension_semantics = [], scalar_prefetch = 0 : i64, scratch_operands = 0 : i64, tpu.core_type = #tpu.core_type<tc>} {
    %c0 = arith.constant 0 : index
    %c0_0 = arith.constant 0 : index
    %0 = vector.load %arg1[%c0, %c0_0] : memref<16x16xf32, #tpu.memory_space<vmem>>, vector<16x16xf32>
    %c0_1 = arith.constant 0 : index
    %c0_2 = arith.constant 0 : index
    %1 = vector.load %arg2[%c0_1, %c0_2] : memref<16x32xf32, #tpu.memory_space<vmem>>, vector<16x32xf32>
    %cst = arith.constant dense<0.000000e+00> : vector<16x32xf32>
    %2 = tpu.matmul %0, %1, %cst {dimension_numbers = #tpu.dot_dimension_numbers<[1], [0], [0], [1], [0, 0, 1, 1], [], []>, precision = #tpu.contract_precision<fp32>} : vector<16x16xf32>, vector<16x32xf32>, vector<16x32xf32> -> vector<16x32xf32>
    %c0_3 = arith.constant 0 : index
    %c0_4 = arith.constant 0 : index
    %3 = vector.load %arg3[%c0_3, %c0_4] : memref<1x32xf32, #tpu.memory_space<vmem>>, vector<1x32xf32>
    %4 = vector.broadcast %3 : vector<1x32xf32> to vector<16x32xf32>
    %5 = arith.addf %2, %4 : vector<16x32xf32>
    %c0_5 = arith.constant 0 : index
    %c0_6 = arith.constant 0 : index
    %6 = vector.load %arg4[%c0_5, %c0_6] : memref<8x32xf32, #tpu.memory_space<vmem>>, vector<8x32xf32>
    %7 = tpu.concatenate %6, %6 in 0 : vector<8x32xf32>, vector<8x32xf32> -> vector<16x32xf32>
    %c0_7 = arith.constant 0 : index
    %c0_8 = arith.constant 0 : index
    %8 = vector.load %arg0[%c0_7, %c0_8] : memref<16x32xf32, #tpu.memory_space<vmem>>, vector<16x32xf32>
    %9 = arith.addf %8, %5 : vector<16x32xf32>
    %cst_9 = arith.constant 5.65685415 : f32
    %10 = vector.broadcast %cst_9 : f32 to vector<16x32xf32>
    %11 = arith.mulf %9, %10 : vector<16x32xf32>
    %12 = arith.addf %11, %7 : vector<16x32xf32>
    %13 = tpu.iota {dimensions = array<i32: 0>} : vector<16x16xi32>
    %14 = tpu.iota {dimensions = array<i32: 1>} : vector<16x16xi32>
    %c3_i32 = arith.constant 3 : i32
    %15 = vector.broadcast %c3_i32 : i32 to vector<16x16xi32>
    %16 = arith.shrsi %13, %15 : vector<16x16xi32>
    %c3_i32_10 = arith.constant 3 : i32
    %17 = vector.broadcast %c3_i32_10 : i32 to vector<16x16xi32>
    %18 = arith.shrsi %14, %17 : vector<16x16xi32>
    %19 = arith.cmpi eq, %16, %18 : vector<16x16xi32>
    %c7_i32 = arith.constant 7 : i32
    %20 = vector.broadcast %c7_i32 : i32 to vector<16x16xi32>
    %21 = arith.andi %14, %20 : vector<16x16xi32>
    %c7_i32_11 = arith.constant 7 : i32
    %22 = vector.broadcast %c7_i32_11 : i32 to vector<16x16xi32>
    %23 = arith.andi %13, %22 : vector<16x16xi32>
    %24 = arith.cmpi sle, %21, %23 : vector<16x16xi32>
    %25 = arith.andi %19, %24 : vector<16x16xi1>
    %cst_12 = arith.constant 0.000000e+00 : f32
    %cst_13 = arith.constant -1.000000e+09 : f32
    %26 = vector.broadcast %cst_12 : f32 to vector<16x16xf32>
    %27 = vector.broadcast %cst_13 : f32 to vector<16x16xf32>
    %28 = arith.select %25, %26, %27 : vector<16x16xi1>, vector<16x16xf32>
    %c0_14 = arith.constant 0 : index
    %c0_15 = arith.constant 0 : index
    %29 = vector.load %arg5[%c0_14, %c0_15] : memref<1x16xf32, #tpu.memory_space<vmem>>, vector<1x16xf32>
    %cst_16 = arith.constant 5.000000e-01 : f32
    %30 = vector.broadcast %cst_16 : f32 to vector<1x16xf32>
    %31 = arith.cmpf ogt, %29, %30 : vector<1x16xf32>
    %cst_17 = arith.constant -1.000000e+09 : f32
    %cst_18 = arith.constant 0.000000e+00 : f32
    %32 = vector.broadcast %cst_17 : f32 to vector<1x16xf32>
    %33 = vector.broadcast %cst_18 : f32 to vector<1x16xf32>
    %34 = arith.select %31, %32, %33 : vector<1x16xi1>, vector<1x16xf32>
    %35 = vector.broadcast %34 : vector<1x16xf32> to vector<16x16xf32>
    %36 = arith.addf %28, %35 : vector<16x16xf32>
    %c0_19 = arith.constant 0 : index
    %c0_20 = arith.constant 0 : index
    %c0_21 = arith.constant 0 : index
    %37 = vector.load %arg6[%c0_19, %c0_20, %c0_21] : memref<2x32x96xf32, #tpu.memory_space<vmem>>, vector<1x32x96xf32>
    %38 = vector.shape_cast %37 : vector<1x32x96xf32> to vector<32x96xf32>
    %cst_22 = arith.constant dense<0.000000e+00> : vector<16x96xf32>
    %39 = tpu.matmul %12, %38, %cst_22 {dimension_numbers = #tpu.dot_dimension_numbers<[1], [0], [0], [1], [0, 0, 1, 1], [], []>, precision = #tpu.contract_precision<fp32>} : vector<16x32xf32>, vector<32x96xf32>, vector<16x96xf32> -> vector<16x96xf32>
    %c0_23 = arith.constant 0 : index
    %c0_24 = arith.constant 0 : index
    %c0_25 = arith.constant 0 : index
    %40 = vector.load %arg7[%c0_23, %c0_24, %c0_25] : memref<2x1x96xf32, #tpu.memory_space<vmem>>, vector<1x1x96xf32>
    %41 = vector.shape_cast %40 : vector<1x1x96xf32> to vector<1x96xf32>
    %42 = vector.broadcast %41 : vector<1x96xf32> to vector<16x96xf32>
    %43 = arith.addf %39, %42 : vector<16x96xf32>
    %44 = vector.extract_strided_slice %43 {offsets = [0, 0], sizes = [16, 8], strides = [1, 1]} : vector<16x96xf32> to vector<16x8xf32>
    %45 = vector.extract_strided_slice %43 {offsets = [0, 32], sizes = [16, 8], strides = [1, 1]} : vector<16x96xf32> to vector<16x8xf32>
    %46 = vector.extract_strided_slice %43 {offsets = [0, 64], sizes = [16, 8], strides = [1, 1]} : vector<16x96xf32> to vector<16x8xf32>
    %47 = tpu.transpose %45, [1, 0] : vector<16x8xf32> -> vector<8x16xf32>
    %cst_26 = arith.constant dense<0.000000e+00> : vector<16x16xf32>
    %48 = tpu.matmul %44, %47, %cst_26 {dimension_numbers = #tpu.dot_dimension_numbers<[1], [0], [0], [1], [0, 0, 1, 1], [], []>, precision = #tpu.contract_precision<fp32>} : vector<16x8xf32>, vector<8x16xf32>, vector<16x16xf32> -> vector<16x16xf32>
    %cst_27 = arith.constant 0.353553385 : f32
    %49 = vector.broadcast %cst_27 : f32 to vector<16x16xf32>
    %50 = arith.mulf %48, %49 : vector<16x16xf32>
    %51 = arith.addf %50, %36 : vector<16x16xf32>
    %cst_28 = arith.constant dense<0xFF800000> : vector<16xf32>
    %52 = vector.multi_reduction <maximumf>, %51, %cst_28 [1] : vector<16x16xf32> to vector<16xf32>
    %53 = vector.shape_cast %52 : vector<16xf32> to vector<16x1xf32>
    %54 = vector.broadcast %53 : vector<16x1xf32> to vector<16x16xf32>
    %55 = arith.subf %51, %54 : vector<16x16xf32>
    %56 = math.exp %55 : vector<16x16xf32>
    %cst_29 = arith.constant dense<0.000000e+00> : vector<16xf32>
    %57 = vector.multi_reduction <add>, %56, %cst_29 [1] : vector<16x16xf32> to vector<16xf32>
    %58 = vector.shape_cast %57 : vector<16xf32> to vector<16x1xf32>
    %59 = vector.broadcast %58 : vector<16x1xf32> to vector<16x16xf32>
    %60 = arith.divf %56, %59 : vector<16x16xf32>
    %cst_30 = arith.constant dense<0.000000e+00> : vector<16x8xf32>
    %61 = tpu.matmul %60, %46, %cst_30 {dimension_numbers = #tpu.dot_dimension_numbers<[1], [0], [0], [1], [0, 0, 1, 1], [], []>, precision = #tpu.contract_precision<fp32>} : vector<16x16xf32>, vector<16x8xf32>, vector<16x8xf32> -> vector<16x8xf32>
    %62 = vector.extract_strided_slice %43 {offsets = [0, 8], sizes = [16, 8], strides = [1, 1]} : vector<16x96xf32> to vector<16x8xf32>
    %63 = vector.extract_strided_slice %43 {offsets = [0, 40], sizes = [16, 8], strides = [1, 1]} : vector<16x96xf32> to vector<16x8xf32>
    %64 = vector.extract_strided_slice %43 {offsets = [0, 72], sizes = [16, 8], strides = [1, 1]} : vector<16x96xf32> to vector<16x8xf32>
    %65 = tpu.transpose %63, [1, 0] : vector<16x8xf32> -> vector<8x16xf32>
    %cst_31 = arith.constant dense<0.000000e+00> : vector<16x16xf32>
    %66 = tpu.matmul %62, %65, %cst_31 {dimension_numbers = #tpu.dot_dimension_numbers<[1], [0], [0], [1], [0, 0, 1, 1], [], []>, precision = #tpu.contract_precision<fp32>} : vector<16x8xf32>, vector<8x16xf32>, vector<16x16xf32> -> vector<16x16xf32>
    %cst_32 = arith.constant 0.353553385 : f32
    %67 = vector.broadcast %cst_32 : f32 to vector<16x16xf32>
    %68 = arith.mulf %66, %67 : vector<16x16xf32>
    %69 = arith.addf %68, %36 : vector<16x16xf32>
    %cst_33 = arith.constant dense<0xFF800000> : vector<16xf32>
    %70 = vector.multi_reduction <maximumf>, %69, %cst_33 [1] : vector<16x16xf32> to vector<16xf32>
    %71 = vector.shape_cast %70 : vector<16xf32> to vector<16x1xf32>
    %72 = vector.broadcast %71 : vector<16x1xf32> to vector<16x16xf32>
    %73 = arith.subf %69, %72 : vector<16x16xf32>
    %74 = math.exp %73 : vector<16x16xf32>
    %cst_34 = arith.constant dense<0.000000e+00> : vector<16xf32>
    %75 = vector.multi_reduction <add>, %74, %cst_34 [1] : vector<16x16xf32> to vector<16xf32>
    %76 = vector.shape_cast %75 : vector<16xf32> to vector<16x1xf32>
    %77 = vector.broadcast %76 : vector<16x1xf32> to vector<16x16xf32>
    %78 = arith.divf %74, %77 : vector<16x16xf32>
    %cst_35 = arith.constant dense<0.000000e+00> : vector<16x8xf32>
    %79 = tpu.matmul %78, %64, %cst_35 {dimension_numbers = #tpu.dot_dimension_numbers<[1], [0], [0], [1], [0, 0, 1, 1], [], []>, precision = #tpu.contract_precision<fp32>} : vector<16x16xf32>, vector<16x8xf32>, vector<16x8xf32> -> vector<16x8xf32>
    %80 = vector.extract_strided_slice %43 {offsets = [0, 16], sizes = [16, 8], strides = [1, 1]} : vector<16x96xf32> to vector<16x8xf32>
    %81 = vector.extract_strided_slice %43 {offsets = [0, 48], sizes = [16, 8], strides = [1, 1]} : vector<16x96xf32> to vector<16x8xf32>
    %82 = vector.extract_strided_slice %43 {offsets = [0, 80], sizes = [16, 8], strides = [1, 1]} : vector<16x96xf32> to vector<16x8xf32>
    %83 = tpu.transpose %81, [1, 0] : vector<16x8xf32> -> vector<8x16xf32>
    %cst_36 = arith.constant dense<0.000000e+00> : vector<16x16xf32>
    %84 = tpu.matmul %80, %83, %cst_36 {dimension_numbers = #tpu.dot_dimension_numbers<[1], [0], [0], [1], [0, 0, 1, 1], [], []>, precision = #tpu.contract_precision<fp32>} : vector<16x8xf32>, vector<8x16xf32>, vector<16x16xf32> -> vector<16x16xf32>
    %cst_37 = arith.constant 0.353553385 : f32
    %85 = vector.broadcast %cst_37 : f32 to vector<16x16xf32>
    %86 = arith.mulf %84, %85 : vector<16x16xf32>
    %87 = arith.addf %86, %36 : vector<16x16xf32>
    %cst_38 = arith.constant dense<0xFF800000> : vector<16xf32>
    %88 = vector.multi_reduction <maximumf>, %87, %cst_38 [1] : vector<16x16xf32> to vector<16xf32>
    %89 = vector.shape_cast %88 : vector<16xf32> to vector<16x1xf32>
    %90 = vector.broadcast %89 : vector<16x1xf32> to vector<16x16xf32>
    %91 = arith.subf %87, %90 : vector<16x16xf32>
    %92 = math.exp %91 : vector<16x16xf32>
    %cst_39 = arith.constant dense<0.000000e+00> : vector<16xf32>
    %93 = vector.multi_reduction <add>, %92, %cst_39 [1] : vector<16x16xf32> to vector<16xf32>
    %94 = vector.shape_cast %93 : vector<16xf32> to vector<16x1xf32>
    %95 = vector.broadcast %94 : vector<16x1xf32> to vector<16x16xf32>
    %96 = arith.divf %92, %95 : vector<16x16xf32>
    %cst_40 = arith.constant dense<0.000000e+00> : vector<16x8xf32>
    %97 = tpu.matmul %96, %82, %cst_40 {dimension_numbers = #tpu.dot_dimension_numbers<[1], [0], [0], [1], [0, 0, 1, 1], [], []>, precision = #tpu.contract_precision<fp32>} : vector<16x16xf32>, vector<16x8xf32>, vector<16x8xf32> -> vector<16x8xf32>
    %98 = vector.extract_strided_slice %43 {offsets = [0, 24], sizes = [16, 8], strides = [1, 1]} : vector<16x96xf32> to vector<16x8xf32>
    %99 = vector.extract_strided_slice %43 {offsets = [0, 56], sizes = [16, 8], strides = [1, 1]} : vector<16x96xf32> to vector<16x8xf32>
    %100 = vector.extract_strided_slice %43 {offsets = [0, 88], sizes = [16, 8], strides = [1, 1]} : vector<16x96xf32> to vector<16x8xf32>
    %101 = tpu.transpose %99, [1, 0] : vector<16x8xf32> -> vector<8x16xf32>
    %cst_41 = arith.constant dense<0.000000e+00> : vector<16x16xf32>
    %102 = tpu.matmul %98, %101, %cst_41 {dimension_numbers = #tpu.dot_dimension_numbers<[1], [0], [0], [1], [0, 0, 1, 1], [], []>, precision = #tpu.contract_precision<fp32>} : vector<16x8xf32>, vector<8x16xf32>, vector<16x16xf32> -> vector<16x16xf32>
    %cst_42 = arith.constant 0.353553385 : f32
    %103 = vector.broadcast %cst_42 : f32 to vector<16x16xf32>
    %104 = arith.mulf %102, %103 : vector<16x16xf32>
    %105 = arith.addf %104, %36 : vector<16x16xf32>
    %cst_43 = arith.constant dense<0xFF800000> : vector<16xf32>
    %106 = vector.multi_reduction <maximumf>, %105, %cst_43 [1] : vector<16x16xf32> to vector<16xf32>
    %107 = vector.shape_cast %106 : vector<16xf32> to vector<16x1xf32>
    %108 = vector.broadcast %107 : vector<16x1xf32> to vector<16x16xf32>
    %109 = arith.subf %105, %108 : vector<16x16xf32>
    %110 = math.exp %109 : vector<16x16xf32>
    %cst_44 = arith.constant dense<0.000000e+00> : vector<16xf32>
    %111 = vector.multi_reduction <add>, %110, %cst_44 [1] : vector<16x16xf32> to vector<16xf32>
    %112 = vector.shape_cast %111 : vector<16xf32> to vector<16x1xf32>
    %113 = vector.broadcast %112 : vector<16x1xf32> to vector<16x16xf32>
    %114 = arith.divf %110, %113 : vector<16x16xf32>
    %cst_45 = arith.constant dense<0.000000e+00> : vector<16x8xf32>
    %115 = tpu.matmul %114, %100, %cst_45 {dimension_numbers = #tpu.dot_dimension_numbers<[1], [0], [0], [1], [0, 0, 1, 1], [], []>, precision = #tpu.contract_precision<fp32>} : vector<16x16xf32>, vector<16x8xf32>, vector<16x8xf32> -> vector<16x8xf32>
    %116 = tpu.concatenate %61, %79, %97, %115 in 1 : vector<16x8xf32>, vector<16x8xf32>, vector<16x8xf32>, vector<16x8xf32> -> vector<16x32xf32>
    %c0_46 = arith.constant 0 : index
    %c0_47 = arith.constant 0 : index
    %c0_48 = arith.constant 0 : index
    %117 = vector.load %arg8[%c0_46, %c0_47, %c0_48] : memref<2x32x32xf32, #tpu.memory_space<vmem>>, vector<1x32x32xf32>
    %118 = vector.shape_cast %117 : vector<1x32x32xf32> to vector<32x32xf32>
    %cst_49 = arith.constant dense<0.000000e+00> : vector<16x32xf32>
    %119 = tpu.matmul %116, %118, %cst_49 {dimension_numbers = #tpu.dot_dimension_numbers<[1], [0], [0], [1], [0, 0, 1, 1], [], []>, precision = #tpu.contract_precision<fp32>} : vector<16x32xf32>, vector<32x32xf32>, vector<16x32xf32> -> vector<16x32xf32>
    %c0_50 = arith.constant 0 : index
    %c0_51 = arith.constant 0 : index
    %c0_52 = arith.constant 0 : index
    %120 = vector.load %arg9[%c0_50, %c0_51, %c0_52] : memref<2x1x32xf32, #tpu.memory_space<vmem>>, vector<1x1x32xf32>
    %121 = vector.shape_cast %120 : vector<1x1x32xf32> to vector<1x32xf32>
    %122 = vector.broadcast %121 : vector<1x32xf32> to vector<16x32xf32>
    %123 = arith.addf %119, %122 : vector<16x32xf32>
    %124 = arith.addf %12, %123 : vector<16x32xf32>
    %c0_53 = arith.constant 0 : index
    %c0_54 = arith.constant 0 : index
    %c0_55 = arith.constant 0 : index
    %125 = vector.load %arg10[%c0_53, %c0_54, %c0_55] : memref<2x1x32xf32, #tpu.memory_space<vmem>>, vector<1x1x32xf32>
    %126 = vector.shape_cast %125 : vector<1x1x32xf32> to vector<1x32xf32>
    %c0_56 = arith.constant 0 : index
    %c0_57 = arith.constant 0 : index
    %c0_58 = arith.constant 0 : index
    %127 = vector.load %arg11[%c0_56, %c0_57, %c0_58] : memref<2x1x32xf32, #tpu.memory_space<vmem>>, vector<1x1x32xf32>
    %128 = vector.shape_cast %127 : vector<1x1x32xf32> to vector<1x32xf32>
    %cst_59 = arith.constant dense<0.000000e+00> : vector<16xf32>
    %129 = vector.multi_reduction <add>, %124, %cst_59 [1] : vector<16x32xf32> to vector<16xf32>
    %130 = vector.shape_cast %129 : vector<16xf32> to vector<16x1xf32>
    %cst_60 = arith.constant 3.200000e+01 : f32
    %131 = vector.broadcast %cst_60 : f32 to vector<16x1xf32>
    %132 = arith.divf %130, %131 : vector<16x1xf32>
    %133 = vector.broadcast %132 : vector<16x1xf32> to vector<16x32xf32>
    %134 = arith.subf %124, %133 : vector<16x32xf32>
    %135 = arith.mulf %134, %134 : vector<16x32xf32>
    %cst_61 = arith.constant dense<0.000000e+00> : vector<16xf32>
    %136 = vector.multi_reduction <add>, %135, %cst_61 [1] : vector<16x32xf32> to vector<16xf32>
    %137 = vector.shape_cast %136 : vector<16xf32> to vector<16x1xf32>
    %cst_62 = arith.constant 3.200000e+01 : f32
    %138 = vector.broadcast %cst_62 : f32 to vector<16x1xf32>
    %139 = arith.divf %137, %138 : vector<16x1xf32>
    %140 = vector.broadcast %132 : vector<16x1xf32> to vector<16x32xf32>
    %141 = arith.subf %124, %140 : vector<16x32xf32>
    %cst_63 = arith.constant 9.99999974E-6 : f32
    %142 = vector.broadcast %cst_63 : f32 to vector<16x1xf32>
    %143 = arith.addf %139, %142 : vector<16x1xf32>
    %144 = math.rsqrt %143 : vector<16x1xf32>
    %145 = vector.broadcast %144 : vector<16x1xf32> to vector<16x32xf32>
    %146 = arith.mulf %141, %145 : vector<16x32xf32>
    %147 = vector.broadcast %126 : vector<1x32xf32> to vector<16x32xf32>
    %148 = arith.mulf %146, %147 : vector<16x32xf32>
    %149 = vector.broadcast %128 : vector<1x32xf32> to vector<16x32xf32>
    %150 = arith.addf %148, %149 : vector<16x32xf32>
    %c0_64 = arith.constant 0 : index
    %c0_65 = arith.constant 0 : index
    %c0_66 = arith.constant 0 : index
    %151 = vector.load %arg12[%c0_64, %c0_65, %c0_66] : memref<2x32x64xf32, #tpu.memory_space<vmem>>, vector<1x32x64xf32>
    %152 = vector.shape_cast %151 : vector<1x32x64xf32> to vector<32x64xf32>
    %cst_67 = arith.constant dense<0.000000e+00> : vector<16x64xf32>
    %153 = tpu.matmul %150, %152, %cst_67 {dimension_numbers = #tpu.dot_dimension_numbers<[1], [0], [0], [1], [0, 0, 1, 1], [], []>, precision = #tpu.contract_precision<fp32>} : vector<16x32xf32>, vector<32x64xf32>, vector<16x64xf32> -> vector<16x64xf32>
    %c0_68 = arith.constant 0 : index
    %c0_69 = arith.constant 0 : index
    %c0_70 = arith.constant 0 : index
    %154 = vector.load %arg13[%c0_68, %c0_69, %c0_70] : memref<2x1x64xf32, #tpu.memory_space<vmem>>, vector<1x1x64xf32>
    %155 = vector.shape_cast %154 : vector<1x1x64xf32> to vector<1x64xf32>
    %156 = vector.broadcast %155 : vector<1x64xf32> to vector<16x64xf32>
    %157 = arith.addf %153, %156 : vector<16x64xf32>
    %cst_71 = arith.constant 0.000000e+00 : f32
    %158 = vector.broadcast %cst_71 : f32 to vector<16x64xf32>
    %159 = arith.maximumf %157, %158 : vector<16x64xf32>
    %c0_72 = arith.constant 0 : index
    %c0_73 = arith.constant 0 : index
    %c0_74 = arith.constant 0 : index
    %160 = vector.load %arg14[%c0_72, %c0_73, %c0_74] : memref<2x64x32xf32, #tpu.memory_space<vmem>>, vector<1x64x32xf32>
    %161 = vector.shape_cast %160 : vector<1x64x32xf32> to vector<64x32xf32>
    %cst_75 = arith.constant dense<0.000000e+00> : vector<16x32xf32>
    %162 = tpu.matmul %159, %161, %cst_75 {dimension_numbers = #tpu.dot_dimension_numbers<[1], [0], [0], [1], [0, 0, 1, 1], [], []>, precision = #tpu.contract_precision<fp32>} : vector<16x64xf32>, vector<64x32xf32>, vector<16x32xf32> -> vector<16x32xf32>
    %c0_76 = arith.constant 0 : index
    %c0_77 = arith.constant 0 : index
    %c0_78 = arith.constant 0 : index
    %163 = vector.load %arg15[%c0_76, %c0_77, %c0_78] : memref<2x1x32xf32, #tpu.memory_space<vmem>>, vector<1x1x32xf32>
    %164 = vector.shape_cast %163 : vector<1x1x32xf32> to vector<1x32xf32>
    %165 = vector.broadcast %164 : vector<1x32xf32> to vector<16x32xf32>
    %166 = arith.addf %162, %165 : vector<16x32xf32>
    %167 = arith.addf %150, %166 : vector<16x32xf32>
    %c0_79 = arith.constant 0 : index
    %c0_80 = arith.constant 0 : index
    %c0_81 = arith.constant 0 : index
    %168 = vector.load %arg16[%c0_79, %c0_80, %c0_81] : memref<2x1x32xf32, #tpu.memory_space<vmem>>, vector<1x1x32xf32>
    %169 = vector.shape_cast %168 : vector<1x1x32xf32> to vector<1x32xf32>
    %c0_82 = arith.constant 0 : index
    %c0_83 = arith.constant 0 : index
    %c0_84 = arith.constant 0 : index
    %170 = vector.load %arg17[%c0_82, %c0_83, %c0_84] : memref<2x1x32xf32, #tpu.memory_space<vmem>>, vector<1x1x32xf32>
    %171 = vector.shape_cast %170 : vector<1x1x32xf32> to vector<1x32xf32>
    %cst_85 = arith.constant dense<0.000000e+00> : vector<16xf32>
    %172 = vector.multi_reduction <add>, %167, %cst_85 [1] : vector<16x32xf32> to vector<16xf32>
    %173 = vector.shape_cast %172 : vector<16xf32> to vector<16x1xf32>
    %cst_86 = arith.constant 3.200000e+01 : f32
    %174 = vector.broadcast %cst_86 : f32 to vector<16x1xf32>
    %175 = arith.divf %173, %174 : vector<16x1xf32>
    %176 = vector.broadcast %175 : vector<16x1xf32> to vector<16x32xf32>
    %177 = arith.subf %167, %176 : vector<16x32xf32>
    %178 = arith.mulf %177, %177 : vector<16x32xf32>
    %cst_87 = arith.constant dense<0.000000e+00> : vector<16xf32>
    %179 = vector.multi_reduction <add>, %178, %cst_87 [1] : vector<16x32xf32> to vector<16xf32>
    %180 = vector.shape_cast %179 : vector<16xf32> to vector<16x1xf32>
    %cst_88 = arith.constant 3.200000e+01 : f32
    %181 = vector.broadcast %cst_88 : f32 to vector<16x1xf32>
    %182 = arith.divf %180, %181 : vector<16x1xf32>
    %183 = vector.broadcast %175 : vector<16x1xf32> to vector<16x32xf32>
    %184 = arith.subf %167, %183 : vector<16x32xf32>
    %cst_89 = arith.constant 9.99999974E-6 : f32
    %185 = vector.broadcast %cst_89 : f32 to vector<16x1xf32>
    %186 = arith.addf %182, %185 : vector<16x1xf32>
    %187 = math.rsqrt %186 : vector<16x1xf32>
    %188 = vector.broadcast %187 : vector<16x1xf32> to vector<16x32xf32>
    %189 = arith.mulf %184, %188 : vector<16x32xf32>
    %190 = vector.broadcast %169 : vector<1x32xf32> to vector<16x32xf32>
    %191 = arith.mulf %189, %190 : vector<16x32xf32>
    %192 = vector.broadcast %171 : vector<1x32xf32> to vector<16x32xf32>
    %193 = arith.addf %191, %192 : vector<16x32xf32>
    %c1 = arith.constant 1 : index
    %c0_90 = arith.constant 0 : index
    %c0_91 = arith.constant 0 : index
    %194 = vector.load %arg6[%c1, %c0_90, %c0_91] : memref<2x32x96xf32, #tpu.memory_space<vmem>>, vector<1x32x96xf32>
    %195 = vector.shape_cast %194 : vector<1x32x96xf32> to vector<32x96xf32>
    %cst_92 = arith.constant dense<0.000000e+00> : vector<16x96xf32>
    %196 = tpu.matmul %193, %195, %cst_92 {dimension_numbers = #tpu.dot_dimension_numbers<[1], [0], [0], [1], [0, 0, 1, 1], [], []>, precision = #tpu.contract_precision<fp32>} : vector<16x32xf32>, vector<32x96xf32>, vector<16x96xf32> -> vector<16x96xf32>
    %c1_93 = arith.constant 1 : index
    %c0_94 = arith.constant 0 : index
    %c0_95 = arith.constant 0 : index
    %197 = vector.load %arg7[%c1_93, %c0_94, %c0_95] : memref<2x1x96xf32, #tpu.memory_space<vmem>>, vector<1x1x96xf32>
    %198 = vector.shape_cast %197 : vector<1x1x96xf32> to vector<1x96xf32>
    %199 = vector.broadcast %198 : vector<1x96xf32> to vector<16x96xf32>
    %200 = arith.addf %196, %199 : vector<16x96xf32>
    %201 = vector.extract_strided_slice %200 {offsets = [0, 0], sizes = [16, 8], strides = [1, 1]} : vector<16x96xf32> to vector<16x8xf32>
    %202 = vector.extract_strided_slice %200 {offsets = [0, 32], sizes = [16, 8], strides = [1, 1]} : vector<16x96xf32> to vector<16x8xf32>
    %203 = vector.extract_strided_slice %200 {offsets = [0, 64], sizes = [16, 8], strides = [1, 1]} : vector<16x96xf32> to vector<16x8xf32>
    %204 = tpu.transpose %202, [1, 0] : vector<16x8xf32> -> vector<8x16xf32>
    %cst_96 = arith.constant dense<0.000000e+00> : vector<16x16xf32>
    %205 = tpu.matmul %201, %204, %cst_96 {dimension_numbers = #tpu.dot_dimension_numbers<[1], [0], [0], [1], [0, 0, 1, 1], [], []>, precision = #tpu.contract_precision<fp32>} : vector<16x8xf32>, vector<8x16xf32>, vector<16x16xf32> -> vector<16x16xf32>
    %cst_97 = arith.constant 0.353553385 : f32
    %206 = vector.broadcast %cst_97 : f32 to vector<16x16xf32>
    %207 = arith.mulf %205, %206 : vector<16x16xf32>
    %208 = arith.addf %207, %36 : vector<16x16xf32>
    %cst_98 = arith.constant dense<0xFF800000> : vector<16xf32>
    %209 = vector.multi_reduction <maximumf>, %208, %cst_98 [1] : vector<16x16xf32> to vector<16xf32>
    %210 = vector.shape_cast %209 : vector<16xf32> to vector<16x1xf32>
    %211 = vector.broadcast %210 : vector<16x1xf32> to vector<16x16xf32>
    %212 = arith.subf %208, %211 : vector<16x16xf32>
    %213 = math.exp %212 : vector<16x16xf32>
    %cst_99 = arith.constant dense<0.000000e+00> : vector<16xf32>
    %214 = vector.multi_reduction <add>, %213, %cst_99 [1] : vector<16x16xf32> to vector<16xf32>
    %215 = vector.shape_cast %214 : vector<16xf32> to vector<16x1xf32>
    %216 = vector.broadcast %215 : vector<16x1xf32> to vector<16x16xf32>
    %217 = arith.divf %213, %216 : vector<16x16xf32>
    %cst_100 = arith.constant dense<0.000000e+00> : vector<16x8xf32>
    %218 = tpu.matmul %217, %203, %cst_100 {dimension_numbers = #tpu.dot_dimension_numbers<[1], [0], [0], [1], [0, 0, 1, 1], [], []>, precision = #tpu.contract_precision<fp32>} : vector<16x16xf32>, vector<16x8xf32>, vector<16x8xf32> -> vector<16x8xf32>
    %219 = vector.extract_strided_slice %200 {offsets = [0, 8], sizes = [16, 8], strides = [1, 1]} : vector<16x96xf32> to vector<16x8xf32>
    %220 = vector.extract_strided_slice %200 {offsets = [0, 40], sizes = [16, 8], strides = [1, 1]} : vector<16x96xf32> to vector<16x8xf32>
    %221 = vector.extract_strided_slice %200 {offsets = [0, 72], sizes = [16, 8], strides = [1, 1]} : vector<16x96xf32> to vector<16x8xf32>
    %222 = tpu.transpose %220, [1, 0] : vector<16x8xf32> -> vector<8x16xf32>
    %cst_101 = arith.constant dense<0.000000e+00> : vector<16x16xf32>
    %223 = tpu.matmul %219, %222, %cst_101 {dimension_numbers = #tpu.dot_dimension_numbers<[1], [0], [0], [1], [0, 0, 1, 1], [], []>, precision = #tpu.contract_precision<fp32>} : vector<16x8xf32>, vector<8x16xf32>, vector<16x16xf32> -> vector<16x16xf32>
    %cst_102 = arith.constant 0.353553385 : f32
    %224 = vector.broadcast %cst_102 : f32 to vector<16x16xf32>
    %225 = arith.mulf %223, %224 : vector<16x16xf32>
    %226 = arith.addf %225, %36 : vector<16x16xf32>
    %cst_103 = arith.constant dense<0xFF800000> : vector<16xf32>
    %227 = vector.multi_reduction <maximumf>, %226, %cst_103 [1] : vector<16x16xf32> to vector<16xf32>
    %228 = vector.shape_cast %227 : vector<16xf32> to vector<16x1xf32>
    %229 = vector.broadcast %228 : vector<16x1xf32> to vector<16x16xf32>
    %230 = arith.subf %226, %229 : vector<16x16xf32>
    %231 = math.exp %230 : vector<16x16xf32>
    %cst_104 = arith.constant dense<0.000000e+00> : vector<16xf32>
    %232 = vector.multi_reduction <add>, %231, %cst_104 [1] : vector<16x16xf32> to vector<16xf32>
    %233 = vector.shape_cast %232 : vector<16xf32> to vector<16x1xf32>
    %234 = vector.broadcast %233 : vector<16x1xf32> to vector<16x16xf32>
    %235 = arith.divf %231, %234 : vector<16x16xf32>
    %cst_105 = arith.constant dense<0.000000e+00> : vector<16x8xf32>
    %236 = tpu.matmul %235, %221, %cst_105 {dimension_numbers = #tpu.dot_dimension_numbers<[1], [0], [0], [1], [0, 0, 1, 1], [], []>, precision = #tpu.contract_precision<fp32>} : vector<16x16xf32>, vector<16x8xf32>, vector<16x8xf32> -> vector<16x8xf32>
    %237 = vector.extract_strided_slice %200 {offsets = [0, 16], sizes = [16, 8], strides = [1, 1]} : vector<16x96xf32> to vector<16x8xf32>
    %238 = vector.extract_strided_slice %200 {offsets = [0, 48], sizes = [16, 8], strides = [1, 1]} : vector<16x96xf32> to vector<16x8xf32>
    %239 = vector.extract_strided_slice %200 {offsets = [0, 80], sizes = [16, 8], strides = [1, 1]} : vector<16x96xf32> to vector<16x8xf32>
    %240 = tpu.transpose %238, [1, 0] : vector<16x8xf32> -> vector<8x16xf32>
    %cst_106 = arith.constant dense<0.000000e+00> : vector<16x16xf32>
    %241 = tpu.matmul %237, %240, %cst_106 {dimension_numbers = #tpu.dot_dimension_numbers<[1], [0], [0], [1], [0, 0, 1, 1], [], []>, precision = #tpu.contract_precision<fp32>} : vector<16x8xf32>, vector<8x16xf32>, vector<16x16xf32> -> vector<16x16xf32>
    %cst_107 = arith.constant 0.353553385 : f32
    %242 = vector.broadcast %cst_107 : f32 to vector<16x16xf32>
    %243 = arith.mulf %241, %242 : vector<16x16xf32>
    %244 = arith.addf %243, %36 : vector<16x16xf32>
    %cst_108 = arith.constant dense<0xFF800000> : vector<16xf32>
    %245 = vector.multi_reduction <maximumf>, %244, %cst_108 [1] : vector<16x16xf32> to vector<16xf32>
    %246 = vector.shape_cast %245 : vector<16xf32> to vector<16x1xf32>
    %247 = vector.broadcast %246 : vector<16x1xf32> to vector<16x16xf32>
    %248 = arith.subf %244, %247 : vector<16x16xf32>
    %249 = math.exp %248 : vector<16x16xf32>
    %cst_109 = arith.constant dense<0.000000e+00> : vector<16xf32>
    %250 = vector.multi_reduction <add>, %249, %cst_109 [1] : vector<16x16xf32> to vector<16xf32>
    %251 = vector.shape_cast %250 : vector<16xf32> to vector<16x1xf32>
    %252 = vector.broadcast %251 : vector<16x1xf32> to vector<16x16xf32>
    %253 = arith.divf %249, %252 : vector<16x16xf32>
    %cst_110 = arith.constant dense<0.000000e+00> : vector<16x8xf32>
    %254 = tpu.matmul %253, %239, %cst_110 {dimension_numbers = #tpu.dot_dimension_numbers<[1], [0], [0], [1], [0, 0, 1, 1], [], []>, precision = #tpu.contract_precision<fp32>} : vector<16x16xf32>, vector<16x8xf32>, vector<16x8xf32> -> vector<16x8xf32>
    %255 = vector.extract_strided_slice %200 {offsets = [0, 24], sizes = [16, 8], strides = [1, 1]} : vector<16x96xf32> to vector<16x8xf32>
    %256 = vector.extract_strided_slice %200 {offsets = [0, 56], sizes = [16, 8], strides = [1, 1]} : vector<16x96xf32> to vector<16x8xf32>
    %257 = vector.extract_strided_slice %200 {offsets = [0, 88], sizes = [16, 8], strides = [1, 1]} : vector<16x96xf32> to vector<16x8xf32>
    %258 = tpu.transpose %256, [1, 0] : vector<16x8xf32> -> vector<8x16xf32>
    %cst_111 = arith.constant dense<0.000000e+00> : vector<16x16xf32>
    %259 = tpu.matmul %255, %258, %cst_111 {dimension_numbers = #tpu.dot_dimension_numbers<[1], [0], [0], [1], [0, 0, 1, 1], [], []>, precision = #tpu.contract_precision<fp32>} : vector<16x8xf32>, vector<8x16xf32>, vector<16x16xf32> -> vector<16x16xf32>
    %cst_112 = arith.constant 0.353553385 : f32
    %260 = vector.broadcast %cst_112 : f32 to vector<16x16xf32>
    %261 = arith.mulf %259, %260 : vector<16x16xf32>
    %262 = arith.addf %261, %36 : vector<16x16xf32>
    %cst_113 = arith.constant dense<0xFF800000> : vector<16xf32>
    %263 = vector.multi_reduction <maximumf>, %262, %cst_113 [1] : vector<16x16xf32> to vector<16xf32>
    %264 = vector.shape_cast %263 : vector<16xf32> to vector<16x1xf32>
    %265 = vector.broadcast %264 : vector<16x1xf32> to vector<16x16xf32>
    %266 = arith.subf %262, %265 : vector<16x16xf32>
    %267 = math.exp %266 : vector<16x16xf32>
    %cst_114 = arith.constant dense<0.000000e+00> : vector<16xf32>
    %268 = vector.multi_reduction <add>, %267, %cst_114 [1] : vector<16x16xf32> to vector<16xf32>
    %269 = vector.shape_cast %268 : vector<16xf32> to vector<16x1xf32>
    %270 = vector.broadcast %269 : vector<16x1xf32> to vector<16x16xf32>
    %271 = arith.divf %267, %270 : vector<16x16xf32>
    %cst_115 = arith.constant dense<0.000000e+00> : vector<16x8xf32>
    %272 = tpu.matmul %271, %257, %cst_115 {dimension_numbers = #tpu.dot_dimension_numbers<[1], [0], [0], [1], [0, 0, 1, 1], [], []>, precision = #tpu.contract_precision<fp32>} : vector<16x16xf32>, vector<16x8xf32>, vector<16x8xf32> -> vector<16x8xf32>
    %273 = tpu.concatenate %218, %236, %254, %272 in 1 : vector<16x8xf32>, vector<16x8xf32>, vector<16x8xf32>, vector<16x8xf32> -> vector<16x32xf32>
    %c1_116 = arith.constant 1 : index
    %c0_117 = arith.constant 0 : index
    %c0_118 = arith.constant 0 : index
    %274 = vector.load %arg8[%c1_116, %c0_117, %c0_118] : memref<2x32x32xf32, #tpu.memory_space<vmem>>, vector<1x32x32xf32>
    %275 = vector.shape_cast %274 : vector<1x32x32xf32> to vector<32x32xf32>
    %cst_119 = arith.constant dense<0.000000e+00> : vector<16x32xf32>
    %276 = tpu.matmul %273, %275, %cst_119 {dimension_numbers = #tpu.dot_dimension_numbers<[1], [0], [0], [1], [0, 0, 1, 1], [], []>, precision = #tpu.contract_precision<fp32>} : vector<16x32xf32>, vector<32x32xf32>, vector<16x32xf32> -> vector<16x32xf32>
    %c1_120 = arith.constant 1 : index
    %c0_121 = arith.constant 0 : index
    %c0_122 = arith.constant 0 : index
    %277 = vector.load %arg9[%c1_120, %c0_121, %c0_122] : memref<2x1x32xf32, #tpu.memory_space<vmem>>, vector<1x1x32xf32>
    %278 = vector.shape_cast %277 : vector<1x1x32xf32> to vector<1x32xf32>
    %279 = vector.broadcast %278 : vector<1x32xf32> to vector<16x32xf32>
    %280 = arith.addf %276, %279 : vector<16x32xf32>
    %281 = arith.addf %193, %280 : vector<16x32xf32>
    %c1_123 = arith.constant 1 : index
    %c0_124 = arith.constant 0 : index
    %c0_125 = arith.constant 0 : index
    %282 = vector.load %arg10[%c1_123, %c0_124, %c0_125] : memref<2x1x32xf32, #tpu.memory_space<vmem>>, vector<1x1x32xf32>
    %283 = vector.shape_cast %282 : vector<1x1x32xf32> to vector<1x32xf32>
    %c1_126 = arith.constant 1 : index
    %c0_127 = arith.constant 0 : index
    %c0_128 = arith.constant 0 : index
    %284 = vector.load %arg11[%c1_126, %c0_127, %c0_128] : memref<2x1x32xf32, #tpu.memory_space<vmem>>, vector<1x1x32xf32>
    %285 = vector.shape_cast %284 : vector<1x1x32xf32> to vector<1x32xf32>
    %cst_129 = arith.constant dense<0.000000e+00> : vector<16xf32>
    %286 = vector.multi_reduction <add>, %281, %cst_129 [1] : vector<16x32xf32> to vector<16xf32>
    %287 = vector.shape_cast %286 : vector<16xf32> to vector<16x1xf32>
    %cst_130 = arith.constant 3.200000e+01 : f32
    %288 = vector.broadcast %cst_130 : f32 to vector<16x1xf32>
    %289 = arith.divf %287, %288 : vector<16x1xf32>
    %290 = vector.broadcast %289 : vector<16x1xf32> to vector<16x32xf32>
    %291 = arith.subf %281, %290 : vector<16x32xf32>
    %292 = arith.mulf %291, %291 : vector<16x32xf32>
    %cst_131 = arith.constant dense<0.000000e+00> : vector<16xf32>
    %293 = vector.multi_reduction <add>, %292, %cst_131 [1] : vector<16x32xf32> to vector<16xf32>
    %294 = vector.shape_cast %293 : vector<16xf32> to vector<16x1xf32>
    %cst_132 = arith.constant 3.200000e+01 : f32
    %295 = vector.broadcast %cst_132 : f32 to vector<16x1xf32>
    %296 = arith.divf %294, %295 : vector<16x1xf32>
    %297 = vector.broadcast %289 : vector<16x1xf32> to vector<16x32xf32>
    %298 = arith.subf %281, %297 : vector<16x32xf32>
    %cst_133 = arith.constant 9.99999974E-6 : f32
    %299 = vector.broadcast %cst_133 : f32 to vector<16x1xf32>
    %300 = arith.addf %296, %299 : vector<16x1xf32>
    %301 = math.rsqrt %300 : vector<16x1xf32>
    %302 = vector.broadcast %301 : vector<16x1xf32> to vector<16x32xf32>
    %303 = arith.mulf %298, %302 : vector<16x32xf32>
    %304 = vector.broadcast %283 : vector<1x32xf32> to vector<16x32xf32>
    %305 = arith.mulf %303, %304 : vector<16x32xf32>
    %306 = vector.broadcast %285 : vector<1x32xf32> to vector<16x32xf32>
    %307 = arith.addf %305, %306 : vector<16x32xf32>
    %c1_134 = arith.constant 1 : index
    %c0_135 = arith.constant 0 : index
    %c0_136 = arith.constant 0 : index
    %308 = vector.load %arg12[%c1_134, %c0_135, %c0_136] : memref<2x32x64xf32, #tpu.memory_space<vmem>>, vector<1x32x64xf32>
    %309 = vector.shape_cast %308 : vector<1x32x64xf32> to vector<32x64xf32>
    %cst_137 = arith.constant dense<0.000000e+00> : vector<16x64xf32>
    %310 = tpu.matmul %307, %309, %cst_137 {dimension_numbers = #tpu.dot_dimension_numbers<[1], [0], [0], [1], [0, 0, 1, 1], [], []>, precision = #tpu.contract_precision<fp32>} : vector<16x32xf32>, vector<32x64xf32>, vector<16x64xf32> -> vector<16x64xf32>
    %c1_138 = arith.constant 1 : index
    %c0_139 = arith.constant 0 : index
    %c0_140 = arith.constant 0 : index
    %311 = vector.load %arg13[%c1_138, %c0_139, %c0_140] : memref<2x1x64xf32, #tpu.memory_space<vmem>>, vector<1x1x64xf32>
    %312 = vector.shape_cast %311 : vector<1x1x64xf32> to vector<1x64xf32>
    %313 = vector.broadcast %312 : vector<1x64xf32> to vector<16x64xf32>
    %314 = arith.addf %310, %313 : vector<16x64xf32>
    %cst_141 = arith.constant 0.000000e+00 : f32
    %315 = vector.broadcast %cst_141 : f32 to vector<16x64xf32>
    %316 = arith.maximumf %314, %315 : vector<16x64xf32>
    %c1_142 = arith.constant 1 : index
    %c0_143 = arith.constant 0 : index
    %c0_144 = arith.constant 0 : index
    %317 = vector.load %arg14[%c1_142, %c0_143, %c0_144] : memref<2x64x32xf32, #tpu.memory_space<vmem>>, vector<1x64x32xf32>
    %318 = vector.shape_cast %317 : vector<1x64x32xf32> to vector<64x32xf32>
    %cst_145 = arith.constant dense<0.000000e+00> : vector<16x32xf32>
    %319 = tpu.matmul %316, %318, %cst_145 {dimension_numbers = #tpu.dot_dimension_numbers<[1], [0], [0], [1], [0, 0, 1, 1], [], []>, precision = #tpu.contract_precision<fp32>} : vector<16x64xf32>, vector<64x32xf32>, vector<16x32xf32> -> vector<16x32xf32>
    %c1_146 = arith.constant 1 : index
    %c0_147 = arith.constant 0 : index
    %c0_148 = arith.constant 0 : index
    %320 = vector.load %arg15[%c1_146, %c0_147, %c0_148] : memref<2x1x32xf32, #tpu.memory_space<vmem>>, vector<1x1x32xf32>
    %321 = vector.shape_cast %320 : vector<1x1x32xf32> to vector<1x32xf32>
    %322 = vector.broadcast %321 : vector<1x32xf32> to vector<16x32xf32>
    %323 = arith.addf %319, %322 : vector<16x32xf32>
    %324 = arith.addf %307, %323 : vector<16x32xf32>
    %c1_149 = arith.constant 1 : index
    %c0_150 = arith.constant 0 : index
    %c0_151 = arith.constant 0 : index
    %325 = vector.load %arg16[%c1_149, %c0_150, %c0_151] : memref<2x1x32xf32, #tpu.memory_space<vmem>>, vector<1x1x32xf32>
    %326 = vector.shape_cast %325 : vector<1x1x32xf32> to vector<1x32xf32>
    %c1_152 = arith.constant 1 : index
    %c0_153 = arith.constant 0 : index
    %c0_154 = arith.constant 0 : index
    %327 = vector.load %arg17[%c1_152, %c0_153, %c0_154] : memref<2x1x32xf32, #tpu.memory_space<vmem>>, vector<1x1x32xf32>
    %328 = vector.shape_cast %327 : vector<1x1x32xf32> to vector<1x32xf32>
    %cst_155 = arith.constant dense<0.000000e+00> : vector<16xf32>
    %329 = vector.multi_reduction <add>, %324, %cst_155 [1] : vector<16x32xf32> to vector<16xf32>
    %330 = vector.shape_cast %329 : vector<16xf32> to vector<16x1xf32>
    %cst_156 = arith.constant 3.200000e+01 : f32
    %331 = vector.broadcast %cst_156 : f32 to vector<16x1xf32>
    %332 = arith.divf %330, %331 : vector<16x1xf32>
    %333 = vector.broadcast %332 : vector<16x1xf32> to vector<16x32xf32>
    %334 = arith.subf %324, %333 : vector<16x32xf32>
    %335 = arith.mulf %334, %334 : vector<16x32xf32>
    %cst_157 = arith.constant dense<0.000000e+00> : vector<16xf32>
    %336 = vector.multi_reduction <add>, %335, %cst_157 [1] : vector<16x32xf32> to vector<16xf32>
    %337 = vector.shape_cast %336 : vector<16xf32> to vector<16x1xf32>
    %cst_158 = arith.constant 3.200000e+01 : f32
    %338 = vector.broadcast %cst_158 : f32 to vector<16x1xf32>
    %339 = arith.divf %337, %338 : vector<16x1xf32>
    %340 = vector.broadcast %332 : vector<16x1xf32> to vector<16x32xf32>
    %341 = arith.subf %324, %340 : vector<16x32xf32>
    %cst_159 = arith.constant 9.99999974E-6 : f32
    %342 = vector.broadcast %cst_159 : f32 to vector<16x1xf32>
    %343 = arith.addf %339, %342 : vector<16x1xf32>
    %344 = math.rsqrt %343 : vector<16x1xf32>
    %345 = vector.broadcast %344 : vector<16x1xf32> to vector<16x32xf32>
    %346 = arith.mulf %341, %345 : vector<16x32xf32>
    %347 = vector.broadcast %326 : vector<1x32xf32> to vector<16x32xf32>
    %348 = arith.mulf %346, %347 : vector<16x32xf32>
    %349 = vector.broadcast %328 : vector<1x32xf32> to vector<16x32xf32>
    %350 = arith.addf %348, %349 : vector<16x32xf32>
    %c0_160 = arith.constant 0 : index
    %c0_161 = arith.constant 0 : index
    %351 = vector.load %arg18[%c0_160, %c0_161] : memref<32x128xf32, #tpu.memory_space<vmem>>, vector<32x128xf32>
    %cst_162 = arith.constant dense<0.000000e+00> : vector<16x128xf32>
    %352 = tpu.matmul %350, %351, %cst_162 {dimension_numbers = #tpu.dot_dimension_numbers<[1], [0], [0], [1], [0, 0, 1, 1], [], []>, precision = #tpu.contract_precision<fp32>} : vector<16x32xf32>, vector<32x128xf32>, vector<16x128xf32> -> vector<16x128xf32>
    %c0_163 = arith.constant 0 : index
    %c0_164 = arith.constant 0 : index
    %353 = vector.load %arg19[%c0_163, %c0_164] : memref<1x128xf32, #tpu.memory_space<vmem>>, vector<1x128xf32>
    %354 = vector.broadcast %353 : vector<1x128xf32> to vector<16x128xf32>
    %355 = arith.addf %352, %354 : vector<16x128xf32>
    %c0_165 = arith.constant 0 : index
    %c0_166 = arith.constant 0 : index
    %356 = vector.load %arg20[%c0_165, %c0_166] : memref<16x128xf32, #tpu.memory_space<vmem>>, vector<16x128xf32>
    tpu.vector_store %arg20[%c0_165, %c0_166], %355 {strides = array<i32>} : memref<16x128xf32, #tpu.memory_space<vmem>>, vector<16x128xf32>,
    return
  }
}

</mosaic_0001>

<bundles_post_ra>
// kernel: tpu_custom_call.1
= control target key start
LH: loop header
LB: loop body
LE: loop exit
PB: predicated region body
PF: predicated region fallthrough
CT: control target
= control target key end

     0   :  { %s19264_s0 = inlined_call_operand.hbm [shape: f32[16,32], index: 0, kind: input, shape index: {}]   ;;  %s19265_s1 = inlined_call_operand.hbm [shape: f32[16,16], index: 1, kind: input, shape index: {}]   ;;  %s19266_s2 = inlined_call_operand.hbm [shape: f32[16,32], index: 2, kind: input, shape index: {}]   ;;  %s19267_s3 = inlined_call_operand.hbm [shape: f32[1,32], index: 3, kind: input, shape index: {}]   ;;  %s19268_s4 = inlined_call_operand.hbm [shape: f32[8,32], index: 4, kind: input, shape index: {}]   ;;  %s19269_s5 = inlined_call_operand.hbm [shape: f32[1,16], index: 5, kind: input, shape index: {}]   ;;  %s19270_s6 = inlined_call_operand.vmem [shape: f32[2,32,96], index: 6, kind: input, shape index: {}]   ;;  %s19271_s7 = inlined_call_operand.vmem [shape: f32[2,1,96], index: 7, kind: input, shape index: {}]   ;;  %s19272_s8 = inlined_call_operand.vmem [shape: f32[2,32,32], index: 8, kind: input, shape index: {}]   ;;  %s19273_s9 = inlined_call_operand.hbm [shape: f32[2,1,32], index: 9, kind: input, shape index: {}]   ;;  %s19274_s10 = inlined_call_operand.vmem [shape: f32[2,1,32], index: 10, kind: input, shape index: {}]   ;;  %s19275_s11 = inlined_call_operand.vmem [shape: f32[2,1,32], index: 11, kind: input, shape index: {}]   ;;  %s19276_s12 = inlined_call_operand.vmem [shape: f32[2,32,64], index: 12, kind: input, shape index: {}]   ;;  %s19277_s13 = inlined_call_operand.vmem [shape: f32[2,1,64], index: 13, kind: input, shape index: {}]   ;;  %s19278_s14 = inlined_call_operand.vmem [shape: f32[2,64,32], index: 14, kind: input, shape index: {}]   ;;  %s19279_s15 = inlined_call_operand.vmem [shape: f32[2,1,32], index: 15, kind: input, shape index: {}]   ;;  %s19280_s16 = inlined_call_operand.vmem [shape: f32[2,1,32], index: 16, kind: input, shape index: {}]   ;;  %s19281_s17 = inlined_call_operand.vmem [shape: f32[2,1,32], index: 17, kind: input, shape index: {}]   ;;  %s19282_s18 = inlined_call_operand.vmem [shape: f32[32,128], index: 18, kind: input, shape index: {}]   ;;  %s19283_s19 = inlined_call_operand.vmem [shape: f32[1,128], index: 19, kind: input, shape index: {}]   ;;  %s19284_s20 = inlined_call_operand.hbm [shape: f32[16,128], index: 20, kind: output, shape index: {}]  }
   0x1   :  { %19303 = sst [smem:[#allocation20_spill]] %s19264_s0 }
   0x2   :  { %19304 = sst [smem:[#allocation21_spill]] %s19265_s1 }
   0x3   :  { %19305 = sst [smem:[#allocation22_spill]] %s19266_s2 }
   0x4   :  { %19306 = sst [smem:[#allocation23_spill]] %s19267_s3 }
   0x5   :  { %19307 = sst [smem:[#allocation24_spill]] %s19268_s4 }
   0x6   :  { %19308 = sst [smem:[#allocation25_spill]] %s19283_s19 }
   0x7   :  { %19309 = sst [smem:[#allocation26_spill]] %s19284_s20 }
   0x8   :  { %25 = vsyncpa [#allocation3], 0 }
   0x9   :  { %26 = vsyncpa [#allocation6], 0 }
   0xa   :  { %27 = vsyncpa [#allocation9], 0 }
   0xb   :  { %28 = vsyncpa [#allocation12], 0 }
   0xc   :  { %29 = vsyncpa [#allocation4], 0  ;;  %s18215_s1 = smov [#allocation5]   ;;  %s18216_s23 = smov [#allocation8]  }
   0xd   :  { %s47_s22 = sshll.u32 %s18215_s1, 4  ;;  %s72_s24 = sshll.u32 %s18216_s23, 4  ;;  %s48_s22 = int_to_ptr.vmem [resolvable:$true] %s47_s22  ;;  %s18346_s24 = int_to_ptr.vmem [resolvable:$true] %s72_s24 }
   0xe   :  { %s19310_s3 = sld [smem:[#allocation21_spill]] }
  0x14   :  { %s18029_s26 = scalar_lea.hbm %s19310_s3, 256 }
  0x15   :  { %p18030_p0 = scmp.ne.s32.totalorder %s19310_s3, %s18029_s26  ;;  %p18033_p1 = scmp.lt.u32.totalorder %s18029_s26, %s19310_s3 }
  0x17   :  { %p18035_p2 = pnand %p18033_p1, %p18030_p0 }
  0x19   :  { %18038 = shalt.err (!%p18035_p2)
}
  0x1a   :  { %s18039_s30 = scalar_lea.vmem %s48_s22, 256  ;;  %p18044_p4 = scmp.lt.s32.totalorder %s48_s22, %s48_s22 }
  0x1b   :  { %p18040_p3 = scmp.ne.s32.totalorder %s48_s22, %s18039_s30  ;;  %p18045_p5 = scmp.lt.s32.totalorder %s18039_s30, %s18039_s30 }
  0x1d   :  { %p18046_p6 = por %p18045_p5, %p18044_p4 }
  0x1f   :  { %p18047_p7 = pnand %p18046_p6, %p18040_p3 }
  0x21   :  { %18050 = shalt.err (!%p18047_p7)
}
  0x22   :  { %s19290_s0 = smov 128   ;;  %s19292_s21 = smov 8  }
  0x23   :  { %53 = dma.hbm_to_vmem [thread:$0]  %s19310_s3, 256, %s48_s22, [#allocation6], %s19290_s0, %s19290_s0, %s19292_s21  }
  0x24   :  { %s19311_s26 = sld [smem:[#allocation23_spill]] }
  0x2a   :  { %s18051_s27 = scalar_lea.hbm %s19311_s26, 16 }
  0x2b   :  { %p18052_p8 = scmp.ne.s32.totalorder %s19311_s26, %s18051_s27  ;;  %p18055_p9 = scmp.lt.u32.totalorder %s18051_s27, %s19311_s26 }
  0x2d   :  { %p18057_p10 = pnand %p18055_p9, %p18052_p8 }
  0x2f   :  { %18060 = shalt.err (!%p18057_p10)
}
  0x30   :  { %s18061_s1 = scalar_lea.vmem %s18346_s24, 16  ;;  %s18065_s22 = scalar_lea.vmem %s18346_s24, 32 }
  0x31   :  { %p18062_p11 = scmp.ne.s32.totalorder %s18346_s24, %s18061_s1  ;;  %p18066_p12 = scmp.lt.s32.totalorder %s18346_s24, %s18346_s24 }
  0x32   :  { %p18067_p13 = scmp.lt.s32.totalorder %s18065_s22, %s18061_s1 }
  0x34   :  { %p18068_p0 = por %p18067_p13, %p18066_p12 }
  0x36   :  { %p18069_p1 = pnand %p18068_p0, %p18062_p11 }
  0x38   :  { %18072 = shalt.err (!%p18069_p1)
}
  0x39   :  { %75 = dma.hbm_to_vmem [thread:$0]  %s19311_s26, 16, %s18346_s24, [#allocation9]  }
  0x3a   :  { %s18219_s2 = smov [#allocation11]   ;;  %s18220_s27 = smov [#allocation2]  }
  0x3b   :  { %s92_s25 = sshll.u32 %s18219_s2, 4  ;;  %s35_s28 = sshll.u32 %s18220_s27, 4  ;;  %s93_s25 = int_to_ptr.vmem [resolvable:$true] %s92_s25  ;;  %s18381_s28 = int_to_ptr.vmem [resolvable:$true] %s35_s28 }
  0x3c   :  { %s18073_s30 = scalar_lea.hbm %s19269_s5, 16 }
  0x3d   :  { %p18074_p2 = scmp.ne.s32.totalorder %s19269_s5, %s18073_s30  ;;  %p18077_p3 = scmp.lt.u32.totalorder %s18073_s30, %s19269_s5 }
  0x3f   :  { %p18079_p4 = pnand %p18077_p3, %p18074_p2 }
  0x41   :  { %18082 = shalt.err (!%p18079_p4)
}
  0x42   :  { %s18083_s24 = scalar_lea.vmem %s93_s25, 16  ;;  %s18087_s26 = scalar_lea.vmem %s93_s25, 32 }
  0x43   :  { %p18084_p5 = scmp.ne.s32.totalorder %s93_s25, %s18083_s24  ;;  %p18088_p6 = scmp.lt.s32.totalorder %s93_s25, %s93_s25 }
  0x44   :  { %p18089_p7 = scmp.lt.s32.totalorder %s18087_s26, %s18083_s24 }
  0x46   :  { %p18090_p8 = por %p18089_p7, %p18088_p6 }
  0x48   :  { %p18091_p9 = pnand %p18090_p8, %p18084_p5 }
  0x4a   :  { %18094 = shalt.err (!%p18091_p9)
}
  0x4b   :  { %95 = dma.hbm_to_vmem [thread:$0]  %s19269_s5, 16, %s93_s25, [#allocation12]  }
  0x4c   :  { %s19312_s4 = sld [smem:[#allocation20_spill]] }
  0x52   :  { %s18095_s29 = scalar_lea.hbm %s19312_s4, 256 }
  0x53   :  { %p18096_p10 = scmp.ne.s32.totalorder %s19312_s4, %s18095_s29  ;;  %p18099_p11 = scmp.lt.u32.totalorder %s18095_s29, %s19312_s4 }
  0x55   :  { %p18101_p12 = pnand %p18099_p11, %p18096_p10 }
  0x57   :  { %18104 = shalt.err (!%p18101_p12)
}
  0x58   :  { %s18105_s22 = scalar_lea.vmem %s18381_s28, 256  ;;  %p18110_p0 = scmp.lt.s32.totalorder %s18381_s28, %s18381_s28 }
  0x59   :  { %p18106_p13 = scmp.ne.s32.totalorder %s18381_s28, %s18105_s22  ;;  %p18111_p1 = scmp.lt.s32.totalorder %s18105_s22, %s18105_s22 }
  0x5b   :  { %p18112_p2 = por %p18111_p1, %p18110_p0 }
  0x5d   :  { %p18113_p3 = pnand %p18112_p2, %p18106_p13 }
  0x5f   :  { %18116 = shalt.err (!%p18113_p3)
}
  0x60   :  { %s19313_s5 = smov 8   ;;  %s19314_s25 = smov 128  }
  0x61   :  { %41 = dma.hbm_to_vmem [thread:$0]  %s19312_s4, 256, %s18381_s28, [#allocation3], %s19314_s25, %s19314_s25, %s19313_s5  }
  0x62   :  { %s18221_s3 = smov [#allocation7]   ;;  %s18222_s2 = smov [#allocation10]  }
  0x63   :  { %s59_s23 = sshll.u32 %s18221_s3, 4  ;;  %s82_s27 = sshll.u32 %s18222_s2, 4  ;;  %s60_s23 = int_to_ptr.vmem [resolvable:$true] %s59_s23  ;;  %s83_s27 = int_to_ptr.vmem [resolvable:$true] %s82_s27 }
  0x64   :  { %s19315_s21 = sld [smem:[#allocation22_spill]] }
  0x6a   :  { %s18117_s30 = scalar_lea.hbm %s19315_s21, 256 }
  0x6b   :  { %p18118_p4 = scmp.ne.s32.totalorder %s19315_s21, %s18117_s30  ;;  %p18121_p5 = scmp.lt.u32.totalorder %s18117_s30, %s19315_s21 }
  0x6d   :  { %p18123_p6 = pnand %p18121_p5, %p18118_p4 }
  0x6f   :  { %18126 = shalt.err (!%p18123_p6)
}
  0x70   :  { %s18127_s28 = scalar_lea.vmem %s60_s23, 256  ;;  %p18132_p8 = scmp.lt.s32.totalorder %s60_s23, %s60_s23 }
  0x71   :  { %p18128_p7 = scmp.ne.s32.totalorder %s60_s23, %s18127_s28  ;;  %p18133_p9 = scmp.lt.s32.totalorder %s18127_s28, %s18127_s28 }
  0x73   :  { %p18134_p10 = por %p18133_p9, %p18132_p8 }
  0x75   :  { %p18135_p11 = pnand %p18134_p10, %p18128_p7 }
  0x77   :  { %18138 = shalt.err (!%p18135_p11)
}
  0x78   :  { %65 = dma.hbm_to_vmem [thread:$0]  %s19315_s21, 256, %s60_s23, [#allocation6], %s19314_s25, %s19314_s25, %s19313_s5  }
  0x79   :  { %s19316_s19 = sld [smem:[#allocation24_spill]] }
  0x7f   :  { %s18139_s20 = scalar_lea.hbm %s19316_s19, 128 }
  0x80   :  { %p18140_p12 = scmp.ne.s32.totalorder %s19316_s19, %s18139_s20  ;;  %p18143_p13 = scmp.lt.u32.totalorder %s18139_s20, %s19316_s19 }
  0x82   :  { %p18145_p0 = pnand %p18143_p13, %p18140_p12 }
  0x84   :  { %18148 = shalt.err (!%p18145_p0)
}
  0x85   :  { %s18149_s1 = scalar_lea.vmem %s83_s27, 128  ;;  %p18154_p2 = scmp.lt.s32.totalorder %s83_s27, %s83_s27 }
  0x86   :  { %p18150_p1 = scmp.ne.s32.totalorder %s83_s27, %s18149_s1  ;;  %p18155_p3 = scmp.lt.s32.totalorder %s18149_s1, %s18149_s1 }
  0x88   :  { %p18156_p4 = por %p18155_p3, %p18154_p2 }
  0x8a   :  { %p18157_p5 = pnand %p18156_p4, %p18150_p1 }
  0x8c   :  { %18160 = shalt.err (!%p18157_p5)
}
  0x8d   :  { %85 = dma.hbm_to_vmem [thread:$0]  %s19316_s19, 128, %s83_s27, [#allocation9]  }
  0x8e   :  { %s18223_s22 = smov [#allocation13]   ;;  %s18161_s26 = scalar_lea.hbm %s19273_s9, 32 }
  0x8f   :  { %s107_s28 = sshll.u32 %s18223_s22, 4  ;;  %p18162_p6 = scmp.ne.s32.totalorder %s19273_s9, %s18161_s26  ;;  %s108_s28 = int_to_ptr.vmem [resolvable:$true] %s107_s28 }
  0x90   :  { %p18165_p7 = scmp.lt.u32.totalorder %s18161_s26, %s19273_s9 }
  0x92   :  { %p18167_p8 = pnand %p18165_p7, %p18162_p6 }
  0x94   :  { %18170 = shalt.err (!%p18167_p8)
}
  0x95   :  { %s18171_s0 = scalar_lea.vmem %s108_s28, 32  ;;  %p18176_p10 = scmp.lt.s32.totalorder %s108_s28, %s108_s28 }
  0x96   :  { %p18172_p9 = scmp.ne.s32.totalorder %s108_s28, %s18171_s0  ;;  %p18177_p11 = scmp.lt.s32.totalorder %s18171_s0, %s18171_s0 }
  0x98   :  { %p18178_p12 = por %p18177_p11, %p18176_p10 }
  0x9a   :  { %p18179_p13 = pnand %p18178_p12, %p18172_p9 }
  0x9c   :  { %18182 = shalt.err (!%p18179_p13)
}
  0x9d   :  { %s19295_s27 = smov 16   ;;  %s18225_s19 = smov 1  }
  0x9e   :  { %113 = dma.hbm_to_vmem [thread:$0]  %s19273_s9, 32, %s108_s28, [#allocation12], %s19295_s27, %s19295_s27, %s18225_s19  }
  0x9f   :  { %18205 = dma.done.wait [#allocation3], 256  }
  0xa0   :  { %18206 = vsyncadd [#allocation3], 4294967040 }
  0xa1   :  { %18207 = dma.done.wait [#allocation6], 512  }
  0xa2   :  { %18208 = vsyncadd [#allocation6], 4294966784 }
  0xa3   :  { %18209 = dma.done.wait [#allocation9], 144  }
  0xa4   :  { %18210 = vsyncadd [#allocation9], 4294967152 }
  0xa5   :  { %18211 = dma.done.wait [#allocation12], 48  }
  0xa6   :  { %18212 = vsyncadd [#allocation12], 4294967248  ;;  %vm166_vm0 = vcmask 130048   ;;  %v157_v0 = vld [vmem:[#allocation7] sm:$0xff]  ;;  %v158_v1 = vld [vmem:[#allocation7 + $0x8] sm:$0xff]  ;;  %vm725_vm1 = vcmask 261120  }
  0xa7   :  { %v155_v2 = vld [vmem:[#allocation5] sm:$0xff]  ;;  %v174_v3 = vand.u32 4294901760, %v157_v0  ;;  %v177_v4 = vand.u32 4294901760, %v158_v1  ;;  %v156_v6 = vld [vmem:[#allocation5 + $0x8] sm:$0xff]  ;;  %v714_v30 = vld [vmem:[%s19270_s6] sm:$0xff]  ;;  %vm1266_vm2 = vcmask 64512  }
  0xa8   :  { %v168_v5 = vsel %vm166_vm0, %v155_v2, 0  ;;  %v171_v8 = vsel %vm166_vm0, %v156_v6, 0  ;;  %v715_v31 = vld [vmem:[%s19270_s6 + $0x8] sm:$0xff]  ;;  %v733_v32 = vand.u32 4294901760, %v714_v30  ;;  %v716_v36 = vld [vmem:[%s19270_s6 + $0x10] sm:$0xff]  ;;  %v717_v37 = vld [vmem:[%s19270_s6 + $0x18] sm:$0xff] }
  0xa9   :  { %v240_v7 = vand.u32 4294901760, %v168_v5  ;;  %v16707_v9 = vpack.c.bf16 %v177_v4, %v174_v3  ;;  %v250_v10 = vand.u32 4294901760, %v171_v8  ;;  %v262_v11 = vsub.f32 %v157_v0, %v174_v3  ;;  %v14478_v62 = vld [vmem:[#allocation8] ss:$0 sm:$0xff]  ;;  %v677_v0 = vld [vmem:[#allocation2 + $0x8] sm:$0xff]  ;;  %v676_v3 = vld [vmem:[#allocation2] sm:$0xff] }
  0xaa   :  { %v269_v12 = vsub.f32 %v158_v1, %v177_v4  ;;  %v736_v33 = vand.u32 4294901760, %v715_v31  ;;  %v823_v34 = vsub.f32 %v714_v30, %v733_v32  ;;  %v739_v40 = vand.u32 4294901760, %v716_v36  ;;  %v675_v6 = vld [vmem:[#allocation10] sm:$0xff]  ;;  %s18226_s2 = smov 96   ;;  %s18229_s29 = smov 64  }
  0xab   :  { %v241_v13 = vsub.f32 %v168_v5, %v240_v7  ;;  %16708 = vmatprep.subr.bf16.mxu0 %v16707_v9  ;;  %v251_v14 = vsub.f32 %v171_v8, %v250_v10  ;;  %v263_v15 = vand.u32 4294901760, %v262_v11  ;;  %v742_v41 = vand.u32 4294901760, %v717_v37  ;;  %s18230_s0 = smov 120   ;;  %s18231_s19 = smov 88  }
  0xac   :  { %v270_v16 = vand.u32 4294901760, %v269_v12  ;;  %16710 = vmatpush3.bf16.msra.mxu0 %v16707_v9  ;;  %v16715_v28 = vpack.c.bf16 %v269_v12, %v262_v11  ;;  %v830_v35 = vsub.f32 %v715_v31, %v736_v33  ;;  %v824_v38 = vand.u32 4294901760, %v823_v34  ;;  %s18232_s30 = smov 56   ;;  %s18233_s1 = smov 112  }
  0xad   :  { %v242_v17 = vand.u32 4294901760, %v241_v13  ;;  %v252_v18 = vand.u32 4294901760, %v251_v14  ;;  %v264_v19 = vsub.f32 %v262_v11, %v263_v15  ;;  %v837_v44 = vsub.f32 %v716_v36, %v739_v40  ;;  %s18234_s9 = smov 80   ;;  %s18235_s23 = smov 48  }
  0xae   :  { %v271_v20 = vsub.f32 %v269_v12, %v270_v16  ;;  %v16723_v29 = vpack.c.bf16 %v270_v16, %v263_v15  ;;  %v831_v39 = vand.u32 4294901760, %v830_v35  ;;  %v825_v42 = vsub.f32 %v823_v34, %v824_v38  ;;  %s18236_s21 = smov 72   ;;  %s19299_s22 = smov 104  }
  0xaf   :  { %v243_v21 = vsub.f32 %v241_v13, %v242_v17  ;;  %v253_v22 = vsub.f32 %v251_v14, %v252_v18  ;;  %v265_v23 = vand.u32 4294901760, %v264_v19  ;;  %v844_v45 = vsub.f32 %v717_v37, %v742_v41  ;;  %s19297_s28 = smov 40  }
  0xb0   :  { %v272_v24 = vand.u32 4294901760, %v271_v20  ;;  %v832_v43 = vsub.f32 %v830_v35, %v831_v39  ;;  %v826_v46 = vand.u32 4294901760, %v825_v42  ;;  %v838_v48 = vand.u32 4294901760, %v837_v44 }
  0xb1   :  { %v244_v25 = vand.u32 4294901760, %v243_v21  ;;  %v254_v26 = vand.u32 4294901760, %v253_v22  ;;  %v845_v49 = vand.u32 4294901760, %v844_v45  ;;  %v16731_v56 = vpack.c.bf16 %v736_v33, %v733_v32 }
  0xb2   :  { %v16711_v27 = vpack.c.bf16 %v272_v24, %v265_v23  ;;  %v833_v47 = vand.u32 4294901760, %v832_v43  ;;  %v839_v51 = vsub.f32 %v837_v44, %v838_v48  ;;  %v18470_v57 = vpack.c.bf16 %v742_v41, %v739_v40 }
  0xb3   :  { %15307 = vmatprep.mubr.f32.mxu0 %v244_v25  ;;  %v846_v52 = vsub.f32 %v844_v45, %v845_v49  ;;  %v16747_v58 = vpack.c.bf16 %v830_v35, %v823_v34  ;;  %v16751_v59 = vpack.c.bf16 %v844_v45, %v837_v44  ;;  %v16763_v60 = vpack.c.bf16 %v831_v39, %v824_v38 }
  0xb4   :  { %15308 = vmatmul.mubr.f32.vlgmr.msra.gmra.mrb[0].mxu0 %v254_v26  ;;  %16712 = vmatprep.subr.bf16.mxu0 %v16711_v27  ;;  %v16739_v50 = vpack.c.bf16 %v833_v47, %v826_v46  ;;  %v840_v53 = vand.u32 4294901760, %v839_v51  ;;  %v16767_v61 = vpack.c.bf16 %v845_v49, %v838_v48  ;;  %v14479_v26 = vld [vmem:[%s19271_s7] ss:$0 sm:$0xff]  ;;  %vm5519_vm10 = vcmask 195584  }
  0xb5   :  { %16714 = vmatpush3.bf16.msra.mxu0 %v16711_v27  ;;  %15314 = vmatprep.mubr.f32.mxu0 %v240_v7  ;;  %v847_v54 = vand.u32 4294901760, %v846_v52  ;;  %vm6676_vm11 = vcmask 523264  }
  0xb6   :  { %16716 = vmatprep.subr.bf16.mxu0 %v16715_v28  ;;  %16740 = vmatprep.subr.bf16.mxu1 %v16739_v50 }
  0xb7   :  { %16742 = vmatpush3.bf16.msra.mxu1 %v16739_v50  ;;  %v16743_v55 = vpack.c.bf16 %v847_v54, %v840_v53 }
  0xb9   :  { %16744 = vmatprep.subr.bf16.mxu1 %v16743_v55 }
  0xbb   :  { %16746 = vmatpush3.bf16.msra.mxu1 %v16743_v55 }
  0xbc   :  { %15315 = vmatmul.mubr.f32.vlgmr.msra.gmra.mrb[0].mxu0 %v250_v10  ;;  %16748 = vmatprep.subr.bf16.mxu1 %v16747_v58 }
  0xbd   :  { %16718 = vmatpush3.bf16.msra.mxu0 %v16715_v28  ;;  %15321 = vmatprep.mubr.f32.mxu0 %v241_v13 }
  0xbe   :  { %16720 = vmatprep.subr.bf16.mxu0 %v16707_v9 }
  0xc4   :  { %15322 = vmatmul.mubr.f32.vlgmr.msra.gmra.mrb[0].mxu0 %v251_v14 }
  0xc5   :  { %16722 = vmatpush3.bf16.msra.mxu0 %v16707_v9  ;;  %15328 = vmatprep.mubr.f32.mxu0 %v242_v17 }
  0xc6   :  { %16724 = vmatprep.subr.bf16.mxu0 %v16723_v29 }
  0xcc   :  { %15329 = vmatmul.mubr.f32.vlgmr.msra.gmra.mrb[0].mxu0 %v252_v18 }
  0xcd   :  { %16726 = vmatpush3.bf16.msra.mxu0 %v16723_v29  ;;  %15335 = vmatprep.mubr.f32.mxu0 %v240_v7 }
  0xce   :  { %16728 = vmatprep.subr.bf16.mxu0 %v16707_v9 }
  0xd4   :  { %15336 = vmatmul.mubr.f32.vlgmr.msra.gmra.mrb[0].mxu0 %v250_v10 }
  0xd5   :  { %16730 = vmatpush3.bf16.msra.mxu0 %v16707_v9  ;;  %15342 = vmatprep.mubr.f32.mxu0 %v240_v7 }
  0xd6   :  { %16732 = vmatprep.subr.bf16.mxu0 %v16731_v56 }
  0xdc   :  { %15343 = vmatmul.mubr.f32.vlgmr.msra.gmra.mrb[0].mxu0 %v250_v10 }
  0xdd   :  { %16734 = vmatpush3.bf16.msra.mxu0 %v16731_v56 }
  0xde   :  { %16736 = vmatprep.subr.bf16.mxu0 %v18470_v57 }
  0xe1   :  { %16738 = vmatpush3.bf16.msra.mxu0 %v18470_v57 }
 0x1af   :  { %v15344_v63 = vpop.f32.mrb[0].mxu0 }
 0x1b0   :  { %v17643_v1 = vadd.f32 %v15344_v63, %v14478_v62  ;;  %v665_v2 = vpop.f32.mrb[1].mxu0  ;;  %v684_v63 = vlaneseq }
 0x1b1   :  { %v17644_v4 = vadd.f32 %v14478_v62, %v665_v2 }
 0x1b2   :  { %v679_v5 = vadd.f32 %v17643_v1, %v677_v0  ;;  %v685_v0 = vshrl.u32 %v684_v63, 7  ;;  %v688_v1 = vand.u32 127, %v684_v63 }
 0x1b3   :  { %v678_v7 = vadd.f32 %v17644_v4, %v676_v3 }
 0x1b4   :  { %v681_v8 = vmul.f32 5.656854, %v679_v5  ;;  %v686_v2 = vadd.s32 8, %v685_v0  ;;  %v689_v3 = vshra.s32 %v685_v0, 3  ;;  %v691_v4 = vshra.s32 %v688_v1, 3 }
 0x1b5   :  { %v680_v9 = vmul.f32 5.656854, %v678_v7  ;;  %v694_v5 = vand.u32 7, %v688_v1  ;;  %v703_v7 = vld [vmem:[#allocation11] sm:$0x1] }
 0x1b6   :  { %v18474_v10 = vadd.f32 %v681_v8, %v675_v6  ;;  %v690_v8 = vshra.s32 %v686_v2, 3  ;;  %vm704_vm3 = vcmp.gt.f32.partialorder %v703_v7, 0.5  ;;  %vm692_vm4 = vcmp.eq.s32.totalorder %v689_v3, %v691_v4 }
 0x1b7   :  { %v18476_v11 = vadd.f32 %v680_v9, %v675_v6  ;;  %v695_v6 = vand.u32 7, %v685_v0  ;;  %v696_v9 = vand.u32 7, %v686_v2 }
 0x1b8   :  { %v730_v12 = vsel %vm725_vm1, %v18474_v10, 0  ;;  %vm693_vm6 = vcmp.eq.s32.totalorder %v690_v8, %v691_v4 }
 0x1b9   :  { %v727_v13 = vsel %vm725_vm1, %v18476_v11, 0  ;;  %v811_v14 = vand.u32 4294901760, %v730_v12  ;;  %vm697_vm5 = vcmp.le.s32.totalorder %v694_v5, %v695_v6  ;;  %vm698_vm7 = vcmp.le.s32.totalorder %v694_v5, %v696_v9 }
 0x1ba   :  { %v801_v15 = vand.u32 4294901760, %v727_v13  ;;  %vm699_vm8 = vmand %vm692_vm4, %vm697_vm5 }
 0x1bb   :  { %v812_v16 = vsub.f32 %v730_v12, %v811_v14  ;;  %v709_v12 = vsub.s32 0, %v685_v0  ;;  %vm700_vm9 = vmand %vm693_vm6, %vm698_vm7 }
 0x1bc   :  { %15364 = vmatprep.mubr.f32.mxu1 %v801_v15  ;;  %v802_v17 = vsub.f32 %v727_v13, %v801_v15  ;;  %v18227_v13 = vmov 0.0  }
 0x1bd   :  { %15365 = vmatmul.mubr.f32.vlgmr.msra.gmra.mrb[0].mxu1 %v811_v14  ;;  %v813_v18 = vand.u32 4294901760, %v812_v16 }
 0x1be   :  { %16750 = vmatpush3.bf16.msra.mxu1 %v16747_v58  ;;  %15375 = vmatprep.mubr.f32.mxu1 %v802_v17  ;;  %v803_v19 = vand.u32 4294901760, %v802_v17 }
 0x1bf   :  { %16752 = vmatprep.subr.bf16.mxu1 %v16751_v59  ;;  %v814_v20 = vsub.f32 %v812_v16, %v813_v18 }
 0x1c0   :  { %v804_v21 = vsub.f32 %v802_v17, %v803_v19 }
 0x1c1   :  { %v815_v23 = vand.u32 4294901760, %v814_v20 }
 0x1c2   :  { %16754 = vmatpush3.bf16.msra.mxu1 %v16751_v59  ;;  %v805_v22 = vand.u32 4294901760, %v804_v21 }
 0x1c3   :  { %16756 = vmatprep.subr.bf16.mxu1 %v16731_v56 }
 0x1c4   :  { %15353 = vmatprep.mubr.f32.mxu0 %v805_v22 }
 0x1c5   :  { %15354 = vmatmul.mubr.f32.vlgmr.msra.gmra.mrb[2].mxu0 %v815_v23  ;;  %15376 = vmatmul.mubr.f32.vlgmr.msra.gmra.mrb[0].mxu1 %v812_v16  ;;  %v18228_v16 = vmov -1e+09  }
 0x1c6   :  { %16758 = vmatpush3.bf16.msra.mxu1 %v16731_v56  ;;  %15386 = vmatprep.mubr.f32.mxu1 %v803_v19  ;;  %v701_v17 = vsel %vm699_vm8, 0.0, %v18228_v16 }
 0x1c7   :  { %16760 = vmatprep.subr.bf16.mxu1 %v18470_v57 }
 0x1ca   :  { %16762 = vmatpush3.bf16.msra.mxu1 %v18470_v57 }
 0x1cb   :  { %16764 = vmatprep.subr.bf16.mxu1 %v16763_v60 }
 0x1cd   :  { %15387 = vmatmul.mubr.f32.vlgmr.msra.gmra.mrb[0].mxu1 %v813_v18  ;;  %v702_v18 = vsel %vm700_vm9, 0.0, %v18228_v16 }
 0x1ce   :  { %16766 = vmatpush3.bf16.msra.mxu1 %v16763_v60  ;;  %15397 = vmatprep.mubr.f32.mxu1 %v801_v15 }
 0x1cf   :  { %16768 = vmatprep.subr.bf16.mxu1 %v16767_v61 }
 0x1d2   :  { %16770 = vmatpush3.bf16.msra.mxu1 %v16767_v61 }
 0x1d3   :  { %16772 = vmatprep.subr.bf16.mxu1 %v16731_v56 }
 0x1d5   :  { %15398 = vmatmul.mubr.f32.vlgmr.msra.gmra.mrb[0].mxu1 %v811_v14 }
 0x1d6   :  { %16774 = vmatpush3.bf16.msra.mxu1 %v16731_v56  ;;  %15408 = vmatprep.mubr.f32.mxu1 %v801_v15 }
 0x1d7   :  { %16776 = vmatprep.subr.bf16.mxu1 %v18470_v57 }
 0x1da   :  { %16778 = vmatpush3.bf16.msra.mxu1 %v18470_v57 }
 0x1dd   :  { %15409 = vmatmul.mubr.f32.vlgmr.msra.gmra.mrb[0].mxu1 %v811_v14  ;;  %v705_v14 = vsel %vm704_vm3, -1e+09, %v18227_v13 }
 0x1de   :  { %v710_v15 = vrot.slane %v705_v14, %v709_v12 }
 0x1e0   :  { %v18503_v20 = vadd.f32 %v710_v15, %v701_v17 }
 0x298   :  { %v15355_v24 = vpop.f32.mrb[2].mxu0 }
 0x299   :  { %v807_v25 = vpop.f32.mrb[3].mxu0  ;;  %v818_v27 = vadd.f32 %v15355_v24, %v14479_v26  ;;  %v18505_v24 = vadd.f32 %v710_v15, %v702_v18 }
 0x29a   :  { %v808_v28 = vadd.f32 %v14479_v26, %v807_v25 }
 0x2b0   :  { %v15410_v29 = vpop.f32.mrb[0].mxu1 }
 0x2b1   :  { %v18489_v30 = vadd.f32 %v15410_v29, %v818_v27  ;;  %v1250_v31 = vpop.f32.mrb[1].mxu1 }
 0x2b2   :  { %v18491_v32 = vadd.f32 %v1250_v31, %v808_v28 }
 0x2b3   :  { %v1269_v39 = vsel %vm1266_vm2, %v18489_v30, 0 }
 0x2b4   :  { %1262 = vrot.lane.b32.xlu0 %v18491_v32, %s18226_s2  ;;  %v1267_v33 = vsel %vm1266_vm2, %v18491_v32, 0  ;;  %v1352_v41 = vand.u32 4294901760, %v1269_v39 }
 0x2b5   :  { %v1342_v34 = vand.u32 4294901760, %v1267_v33 }
 0x2b6   :  { %v1353_v46 = vsub.f32 %v1269_v39, %v1352_v41 }
 0x2b7   :  { %v1343_v35 = vsub.f32 %v1267_v33, %v1342_v34 }
 0x2b8   :  { %1264 = vrot.lane.b32.xlu0 %v18489_v30, %s18226_s2  ;;  %v1354_v52 = vand.u32 4294901760, %v1353_v46 }
 0x2b9   :  { %v1344_v36 = vand.u32 4294901760, %v1343_v35 }
 0x2ba   :  { %v1355_v56 = vsub.f32 %v1353_v46, %v1354_v52 }
 0x2bb   :  { %v1345_v37 = vsub.f32 %v1343_v35, %v1344_v36 }
 0x2bc   :  { %v1356_v59 = vand.u32 4294901760, %v1355_v56 }
 0x2bd   :  { %v1346_v38 = vand.u32 4294901760, %v1345_v37 }
 0x2bf   :  { %15415 = vmatprep.mubr.f32.mxu0 %v1346_v38 }
 0x326   :  { %v1263_v40 = vpop.permute.xlu0 %1262 }
 0x327   :  { %v1271_v42 = vsel %vm1266_vm2, %v1263_v40, 0 }
 0x328   :  { %v1276_v43 = vand.u32 4294901760, %v1271_v42 }
 0x32a   :  { %v1364_v44 = vsub.f32 %v1271_v42, %v1276_v43  ;;  %v1265_v45 = vpop.permute.xlu0 %1264 }
 0x32b   :  { %v1273_v47 = vsel %vm1266_vm2, %v1265_v45, 0 }
 0x32c   :  { %v1365_v48 = vand.u32 4294901760, %v1364_v44  ;;  %v1279_v49 = vand.u32 4294901760, %v1273_v47 }
 0x32e   :  { %v16779_v50 = vpack.c.bf16 %v1279_v49, %v1276_v43  ;;  %v1371_v51 = vsub.f32 %v1273_v47, %v1279_v49  ;;  %v1366_v53 = vsub.f32 %v1364_v44, %v1365_v48 }
 0x330   :  { %v1372_v54 = vand.u32 4294901760, %v1371_v51  ;;  %16780 = vmatprep.subr.bf16.mxu0 %v16779_v50  ;;  %v1367_v57 = vand.u32 4294901760, %v1366_v53  ;;  %v16787_v61 = vpack.c.bf16 %v1371_v51, %v1364_v44 }
 0x331   :  { %16782 = vmatpush3.bf16.xpose.msra.mxu0 %v16779_v50 }
 0x332   :  { %v1373_v55 = vsub.f32 %v1371_v51, %v1372_v54  ;;  %v16795_v62 = vpack.c.bf16 %v1372_v54, %v1365_v48 }
 0x334   :  { %v1374_v58 = vand.u32 4294901760, %v1373_v55 }
 0x336   :  { %v16783_v60 = vpack.c.bf16 %v1374_v58, %v1367_v57 }
 0x338   :  { %15416 = vmatmul.mubr.f32.vlgmr.msra.gmra.mrb[4].mxu0 %v1356_v59  ;;  %16784 = vmatprep.subr.bf16.mxu0 %v16783_v60 }
 0x339   :  { %16786 = vmatpush3.bf16.xpose.msra.mxu0 %v16783_v60  ;;  %15422 = vmatprep.mubr.f32.mxu0 %v1342_v34 }
 0x33a   :  { %16788 = vmatprep.subr.bf16.mxu0 %v16787_v61 }
 0x340   :  { %15423 = vmatmul.mubr.f32.vlgmr.msra.gmra.mrb[4].mxu0 %v1352_v41 }
 0x341   :  { %16790 = vmatpush3.bf16.xpose.msra.mxu0 %v16787_v61  ;;  %15429 = vmatprep.mubr.f32.mxu0 %v1343_v35 }
 0x342   :  { %16792 = vmatprep.subr.bf16.mxu0 %v16779_v50 }
 0x348   :  { %15430 = vmatmul.mubr.f32.vlgmr.msra.gmra.mrb[4].mxu0 %v1353_v46 }
 0x349   :  { %16794 = vmatpush3.bf16.xpose.msra.mxu0 %v16779_v50  ;;  %15436 = vmatprep.mubr.f32.mxu0 %v1344_v36 }
 0x34a   :  { %16796 = vmatprep.subr.bf16.mxu0 %v16795_v62 }
 0x350   :  { %15437 = vmatmul.mubr.f32.vlgmr.msra.gmra.mrb[4].mxu0 %v1354_v52 }
 0x351   :  { %16798 = vmatpush3.bf16.xpose.msra.mxu0 %v16795_v62  ;;  %15443 = vmatprep.mubr.f32.mxu0 %v1342_v34 }
 0x352   :  { %16800 = vmatprep.subr.bf16.mxu0 %v16779_v50 }
 0x358   :  { %15444 = vmatmul.mubr.f32.vlgmr.msra.gmra.mrb[4].mxu0 %v1352_v41 }
 0x359   :  { %16802 = vmatpush3.bf16.xpose.msra.mxu0 %v16779_v50  ;;  %15450 = vmatprep.mubr.f32.mxu0 %v1342_v34 }
 0x360   :  { %15451 = vmatmul.mubr.f32.vlgmr.msra.gmra.mrb[4].mxu0 %v1352_v41 }
 0x433   :  { %v15452_v19 = vpop.f32.mrb[4].mxu0 }
 0x434   :  { %v1767_v21 = vpop.f32.mrb[5].mxu0  ;;  %v1778_v22 = vmul.f32 0.35355338, %v15452_v19 }
 0x435   :  { %v1777_v23 = vmul.f32 0.35355338, %v1767_v21 }
 0x436   :  { %v1780_v27 = vadd.f32 %v1778_v22, %v18505_v24 }
 0x437   :  { %v1779_v25 = vadd.f32 %v1777_v23, %v18503_v20 }
 0x438   :  { %v1784_v28 = vsel %vm166_vm0, %v1780_v27, -inf }
 0x439   :  { %v1781_v26 = vsel %vm166_vm0, %v1779_v25, -inf }
 0x43a   :  { %1782 = vmax.xlane.f32.xlu1 %v1781_v26 }
 0x43e   :  { %1785 = vmax.xlane.f32.xlu1 %v1784_v28 }
 0x4c7   :  { %v1783_v29 = vpop.xlane.xlu1 %1782 }
 0x4c8   :  { %v1787_v31 = vsub.f32 %v1779_v25, %v1783_v29 }
 0x4ca   :  { %v1789_v33 = vmul.f32 1.442695, %v1787_v31 }
 0x4cb   :  { %v1786_v34 = vpop.xlane.xlu1 %1785 }
 0x4cc   :  { %17949 = vpow2.f32 %v1789_v33  ;;  %v1788_v35 = vsub.f32 %v1780_v27, %v1786_v34 }
 0x4ce   :  { %v1791_v36 = vmul.f32 1.442695, %v1788_v35 }
 0x4d0   :  { %17951 = vpow2.f32 %v1791_v36 }
 0x4d6   :  { %v17950_v37 = vpop.eup %17949 }
 0x4d7   :  { %v1793_v38 = vsel %vm166_vm0, %v17950_v37, 0.0 }
 0x4d8   :  { %1794 = vadd.xlane.f32.xlu0 %v1793_v38 }
 0x4da   :  { %v17952_v39 = vpop.eup %17951 }
 0x4db   :  { %v1796_v40 = vsel %vm166_vm0, %v17952_v39, 0.0 }
 0x4dc   :  { %1797 = vadd.xlane.f32.xlu1 %v1796_v40 }
 0x4ed   :  { %1803 = vrot.lane.b32.xlu1 %v18491_v32, %s18229_s29 }
 0x4ee   :  { %2317 = vrot.lane.b32.xlu0 %v18491_v32, %s18230_s0 }
 0x4f1   :  { %1805 = vrot.lane.b32.xlu1 %v18489_v30, %s18229_s29 }
 0x4f5   :  { %2321 = vrot.lane.b32.xlu1 %v18491_v32, %s18231_s19 }
 0x4f9   :  { %2323 = vrot.lane.b32.xlu1 %v18489_v30, %s18231_s19 }
 0x4fd   :  { %2319 = vrot.lane.b32.xlu1 %v18489_v30, %s18230_s0 }
 0x565   :  { %v1795_v41 = vpop.xlane.xlu0 %1794 }
 0x566   :  { %17953 = vrcp.f32 %v1795_v41 }
 0x569   :  { %v1798_v42 = vpop.xlane.xlu1 %1797  ;;  %v2318_v43 = vpop.permute.xlu0 %2317 }
 0x56a   :  { %17955 = vrcp.f32 %v1798_v42  ;;  %v2325_v45 = vsel %vm1266_vm2, %v2318_v43, 0 }
 0x56b   :  { %v18528_v49 = vand.u32 4294901760, %v2325_v45 }
 0x56d   :  { %v1804_v44 = vpop.permute.xlu1 %1803  ;;  %v18539_v59 = vsub.f32 %v2325_v45, %v18528_v49 }
 0x56e   :  { %v1816_v46 = vand.u32 4294901760, %v1804_v44 }
 0x56f   :  { %v2402_v7 = vand.u32 4294901760, %v18539_v59 }
 0x570   :  { %v17954_v47 = vpop.eup %17953  ;;  %v18526_v48 = vsub.f32 %v1804_v44, %v1816_v46 }
 0x571   :  { %v1806_v50 = vpop.permute.xlu1 %1805  ;;  %v1800_v51 = vmul.f32 %v17954_v47, %v17950_v37  ;;  %v2403_v31 = vsub.f32 %v18539_v59, %v2402_v7 }
 0x572   :  { %v1905_v52 = vand.u32 4294901760, %v18526_v48  ;;  %v1819_v53 = vand.u32 4294901760, %v1806_v50 }
 0x573   :  { %v1810_v54 = vsel %vm166_vm0, %v1800_v51, 0 }
 0x574   :  { %v17956_v55 = vpop.eup %17955  ;;  %v18532_v56 = vpack.c.bf16 %v1819_v53, %v1816_v46  ;;  %v18534_v57 = vsub.f32 %v1806_v50, %v1819_v53  ;;  %v18536_v58 = vand.u32 4294901760, %v1810_v54  ;;  %v1906_v62 = vsub.f32 %v18526_v48, %v1905_v52 }
 0x575   :  { %v1802_v60 = vmul.f32 %v17956_v55, %v17952_v39  ;;  %v2322_v61 = vpop.permute.xlu1 %2321  ;;  %v2404_v39 = vand.u32 4294901760, %v2403_v31 }
 0x576   :  { %v1912_v63 = vand.u32 4294901760, %v18534_v57  ;;  %v2329_v0 = vsel %vm1266_vm2, %v2322_v61, 0  ;;  %16804 = vmatprep.subr.bf16.mxu0 %v18532_v56  ;;  %15464 = vmatprep.mubr.f32.mxu1 %v18536_v58  ;;  %v1883_v1 = vsub.f32 %v1810_v54, %v18536_v58  ;;  %v1907_v12 = vand.u32 4294901760, %v1906_v62 }
 0x577   :  { %v2334_v2 = vand.u32 4294901760, %v2329_v0  ;;  %16806 = vmatpush3.bf16.msra.mxu0 %v18532_v56  ;;  %v1813_v3 = vsel %vm166_vm0, %v1802_v60, 0  ;;  %v16811_v28 = vpack.c.bf16 %v18534_v57, %v18526_v48 }
 0x578   :  { %v1884_v4 = vand.u32 4294901760, %v1883_v1  ;;  %v1913_v5 = vsub.f32 %v18534_v57, %v1912_v63  ;;  %v18552_v6 = vand.u32 4294901760, %v1813_v3  ;;  %v16819_v46 = vpack.c.bf16 %v1912_v63, %v1905_v52 }
 0x579   :  { %v18555_v8 = vsub.f32 %v2329_v0, %v2334_v2  ;;  %v2324_v9 = vpop.permute.xlu1 %2323 }
 0x57a   :  { %v2331_v13 = vsel %vm1266_vm2, %v2324_v9, 0  ;;  %v1885_v14 = vsub.f32 %v1883_v1, %v1884_v4  ;;  %v1914_v15 = vand.u32 4294901760, %v1913_v5  ;;  %v1893_v16 = vsub.f32 %v1813_v3, %v18552_v6 }
 0x57b   :  { %v2423_v17 = vand.u32 4294901760, %v18555_v8  ;;  %v2337_v18 = vand.u32 4294901760, %v2331_v13 }
 0x57c   :  { %v1886_v19 = vand.u32 4294901760, %v1885_v14  ;;  %v16807_v21 = vpack.c.bf16 %v1914_v15, %v1907_v12  ;;  %v1894_v22 = vand.u32 4294901760, %v1893_v16 }
 0x57d   :  { %v18560_v23 = vpack.c.bf16 %v2337_v18, %v2334_v2  ;;  %v2429_v25 = vsub.f32 %v2331_v13, %v2337_v18  ;;  %v2320_v26 = vpop.permute.xlu1 %2319  ;;  %v2424_v35 = vsub.f32 %v18555_v8, %v2423_v17 }
 0x57e   :  { %v2327_v27 = vsel %vm1266_vm2, %v2320_v26, 0  ;;  %15457 = vmatprep.mubr.f32.mxu0 %v1886_v19  ;;  %16808 = vmatprep.subr.bf16.mxu1 %v16807_v21  ;;  %v1895_v29 = vsub.f32 %v1893_v16, %v1894_v22 }
 0x57f   :  { %v2430_v33 = vand.u32 4294901760, %v2429_v25  ;;  %v2410_v34 = vand.u32 4294901760, %v2327_v27  ;;  %16810 = vmatpush3.bf16.msra.mxu1 %v16807_v21  ;;  %16828 = vmatprep.subr.bf16.mxu0 %v18560_v23  ;;  %v2425_v41 = vand.u32 4294901760, %v2424_v35  ;;  %v16835_v47 = vpack.c.bf16 %v2429_v25, %v18555_v8 }
 0x580   :  { %16812 = vmatprep.subr.bf16.mxu1 %v16811_v28  ;;  %v1896_v36 = vand.u32 4294901760, %v1895_v29 }
 0x581   :  { %v2431_v37 = vsub.f32 %v2429_v25, %v2430_v33  ;;  %v2411_v38 = vsub.f32 %v2327_v27, %v2410_v34  ;;  %v16843_v48 = vpack.c.bf16 %v2430_v33, %v2423_v17 }
 0x582   :  { %15458 = vmatmul.mubr.f32.vlgmr.msra.gmra.mrb[6].mxu0 %v1896_v36  ;;  %15465 = vmatmul.mubr.f32.vlgmr.msra.gmra.mrb[2].mxu1 %v18552_v6 }
 0x583   :  { %v2412_v40 = vand.u32 4294901760, %v2411_v38  ;;  %16830 = vmatpush3.bf16.xpose.msra.mxu0 %v18560_v23  ;;  %16814 = vmatpush3.bf16.msra.mxu1 %v16811_v28  ;;  %v2432_v42 = vand.u32 4294901760, %v2431_v37 }
 0x584   :  { %15471 = vmatprep.mubr.f32.mxu1 %v1883_v1  ;;  %15499 = vmatprep.mubr.f32.mxu0 %v2404_v39 }
 0x585   :  { %v2413_v43 = vsub.f32 %v2411_v38, %v2412_v40  ;;  %16816 = vmatprep.subr.bf16.mxu1 %v18532_v56  ;;  %v16831_v44 = vpack.c.bf16 %v2432_v42, %v2425_v41 }
 0x587   :  { %v2414_v45 = vand.u32 4294901760, %v2413_v43  ;;  %16832 = vmatprep.subr.bf16.mxu0 %v16831_v44 }
 0x58a   :  { %15500 = vmatmul.mubr.f32.vlgmr.msra.gmra.mrb[8].mxu0 %v2414_v45  ;;  %15472 = vmatmul.mubr.f32.vlgmr.msra.gmra.mrb[2].mxu1 %v1893_v16 }
 0x58b   :  { %16818 = vmatpush3.bf16.msra.mxu1 %v18532_v56  ;;  %16834 = vmatpush3.bf16.xpose.msra.mxu0 %v16831_v44 }
 0x58c   :  { %15506 = vmatprep.mubr.f32.mxu0 %v18528_v49  ;;  %15478 = vmatprep.mubr.f32.mxu1 %v1884_v4 }
 0x58d   :  { %16820 = vmatprep.subr.bf16.mxu1 %v16819_v46  ;;  %16836 = vmatprep.subr.bf16.mxu0 %v16835_v47 }
 0x592   :  { %15507 = vmatmul.mubr.f32.vlgmr.msra.gmra.mrb[8].mxu0 %v2410_v34  ;;  %15479 = vmatmul.mubr.f32.vlgmr.msra.gmra.mrb[2].mxu1 %v1894_v22 }
 0x593   :  { %16822 = vmatpush3.bf16.msra.mxu1 %v16819_v46  ;;  %16838 = vmatpush3.bf16.xpose.msra.mxu0 %v16835_v47 }
 0x594   :  { %15513 = vmatprep.mubr.f32.mxu0 %v18539_v59  ;;  %15485 = vmatprep.mubr.f32.mxu1 %v18536_v58 }
 0x595   :  { %16824 = vmatprep.subr.bf16.mxu1 %v18532_v56  ;;  %16840 = vmatprep.subr.bf16.mxu0 %v18560_v23 }
 0x59a   :  { %15514 = vmatmul.mubr.f32.vlgmr.msra.gmra.mrb[8].mxu0 %v2411_v38  ;;  %15486 = vmatmul.mubr.f32.vlgmr.msra.gmra.mrb[2].mxu1 %v18552_v6 }
 0x59b   :  { %16826 = vmatpush3.bf16.msra.mxu1 %v18532_v56  ;;  %16842 = vmatpush3.bf16.xpose.msra.mxu0 %v18560_v23 }
 0x59c   :  { %15520 = vmatprep.mubr.f32.mxu0 %v2402_v7  ;;  %15492 = vmatprep.mubr.f32.mxu1 %v18536_v58 }
 0x59d   :  { %16844 = vmatprep.subr.bf16.mxu0 %v16843_v48 }
 0x5a2   :  { %15521 = vmatmul.mubr.f32.vlgmr.msra.gmra.mrb[8].mxu0 %v2412_v40  ;;  %15493 = vmatmul.mubr.f32.vlgmr.msra.gmra.mrb[2].mxu1 %v18552_v6 }
 0x5a3   :  { %16846 = vmatpush3.bf16.xpose.msra.mxu0 %v16843_v48  ;;  %15527 = vmatprep.mubr.f32.mxu0 %v18528_v49 }
 0x5a4   :  { %16848 = vmatprep.subr.bf16.mxu0 %v18560_v23 }
 0x5aa   :  { %15528 = vmatmul.mubr.f32.vlgmr.msra.gmra.mrb[8].mxu0 %v2410_v34 }
 0x5ab   :  { %16850 = vmatpush3.bf16.xpose.msra.mxu0 %v18560_v23  ;;  %15534 = vmatprep.mubr.f32.mxu0 %v18528_v49 }
 0x5b2   :  { %15535 = vmatmul.mubr.f32.vlgmr.msra.gmra.mrb[8].mxu0 %v2410_v34 }
 0x655   :  { %v15459_v50 = vpop.f32.mrb[6].mxu0 }
 0x656   :  { %v1888_v51 = vpop.f32.mrb[7].mxu0 }
 0x675   :  { %v15494_v52 = vpop.f32.mrb[2].mxu1 }
 0x676   :  { %v18593_v53 = vadd.f32 %v15494_v52, %v15459_v50  ;;  %v2307_v54 = vpop.f32.mrb[3].mxu1 }
 0x677   :  { %v18595_v55 = vadd.f32 %v2307_v54, %v1888_v51 }
 0x685   :  { %v15536_v56 = vpop.f32.mrb[8].mxu0 }
 0x686   :  { %v2836_v57 = vmul.f32 0.35355338, %v15536_v56  ;;  %v2825_v58 = vpop.f32.mrb[9].mxu0 }
 0x687   :  { %v2835_v59 = vmul.f32 0.35355338, %v2825_v58 }
 0x688   :  { %v2838_v60 = vadd.f32 %v2836_v57, %v18505_v24 }
 0x689   :  { %v2837_v61 = vadd.f32 %v2835_v59, %v18503_v20 }
 0x68a   :  { %v2842_v62 = vsel %vm166_vm0, %v2838_v60, -inf }
 0x68b   :  { %2843 = vmax.xlane.f32.xlu0 %v2842_v62  ;;  %v2839_v49 = vsel %vm166_vm0, %v2837_v61, -inf }
 0x68c   :  { %2840 = vmax.xlane.f32.xlu1 %v2839_v49 }
 0x6a1   :  { %2863 = vrot.lane.b32.xlu0 %v18489_v30, %s18232_s30 }
 0x6a5   :  { %3375 = vrot.lane.b32.xlu0 %v18491_v32, %s18233_s1 }
 0x718   :  { %v2844_v63 = vpop.xlane.xlu0 %2843 }
 0x719   :  { %v2846_v0 = vsub.f32 %v2838_v60, %v2844_v63  ;;  %v2841_v1 = vpop.xlane.xlu1 %2840 }
 0x71a   :  { %v2845_v2 = vsub.f32 %v2837_v61, %v2841_v1 }
 0x71b   :  { %v2849_v3 = vmul.f32 1.442695, %v2846_v0 }
 0x71c   :  { %v2847_v4 = vmul.f32 1.442695, %v2845_v2  ;;  %v2864_v9 = vpop.permute.xlu0 %2863 }
 0x71d   :  { %17957 = vpow2.f32 %v2849_v3  ;;  %v2877_v13 = vand.u32 4294901760, %v2864_v9 }
 0x71e   :  { %17959 = vpow2.f32 %v2847_v4 }
 0x71f   :  { %v2969_v15 = vsub.f32 %v2864_v9, %v2877_v13 }
 0x720   :  { %v3376_v52 = vpop.permute.xlu0 %3375 }
 0x721   :  { %v2970_v17 = vand.u32 4294901760, %v2969_v15  ;;  %v3383_v56 = vsel %vm1266_vm2, %v3376_v52, 0 }
 0x722   :  { %v3458_v59 = vand.u32 4294901760, %v3383_v56 }
 0x723   :  { %v2971_v25 = vsub.f32 %v2969_v15, %v2970_v17 }
 0x724   :  { %v3459_v49 = vsub.f32 %v3383_v56, %v3458_v59 }
 0x725   :  { %v2972_v35 = vand.u32 4294901760, %v2971_v25 }
 0x726   :  { %v3460_v2 = vand.u32 4294901760, %v3459_v49 }
 0x727   :  { %v17958_v5 = vpop.eup %17957 }
 0x728   :  { %v2854_v6 = vsel %vm166_vm0, %v17958_v5, 0.0  ;;  %v17960_v7 = vpop.eup %17959  ;;  %v3461_v9 = vsub.f32 %v3459_v49, %v3460_v2 }
 0x729   :  { %2855 = vadd.xlane.f32.xlu1 %v2854_v6  ;;  %v2851_v8 = vsel %vm166_vm0, %v17960_v7, 0.0 }
 0x72d   :  { %2852 = vadd.xlane.f32.xlu1 %v2851_v8 }
 0x73e   :  { %2861 = vrot.lane.b32.xlu1 %v18491_v32, %s18232_s30 }
 0x742   :  { %3379 = vrot.lane.b32.xlu1 %v18491_v32, %s18234_s9 }
 0x746   :  { %3381 = vrot.lane.b32.xlu1 %v18489_v30, %s18234_s9 }
 0x74a   :  { %3377 = vrot.lane.b32.xlu1 %v18489_v30, %s18233_s1 }
 0x7b6   :  { %v2856_v12 = vpop.xlane.xlu1 %2855 }
 0x7b7   :  { %17961 = vrcp.f32 %v2856_v12 }
 0x7ba   :  { %v2853_v14 = vpop.xlane.xlu1 %2852 }
 0x7bb   :  { %17963 = vrcp.f32 %v2853_v14  ;;  %v3462_v14 = vand.u32 4294901760, %v3461_v9 }
 0x7be   :  { %v2862_v16 = vpop.permute.xlu1 %2861 }
 0x7bf   :  { %v2874_v18 = vand.u32 4294901760, %v2862_v16 }
 0x7c1   :  { %v17962_v19 = vpop.eup %17961  ;;  %v18615_v21 = vpack.c.bf16 %v2877_v13, %v2874_v18  ;;  %v2962_v22 = vsub.f32 %v2862_v16, %v2874_v18 }
 0x7c2   :  { %v2860_v23 = vmul.f32 %v17962_v19, %v17958_v5  ;;  %v3380_v48 = vpop.permute.xlu1 %3379 }
 0x7c3   :  { %v2963_v26 = vand.u32 4294901760, %v2962_v22  ;;  %16852 = vmatprep.subr.bf16.mxu1 %v18615_v21  ;;  %v16859_v47 = vpack.c.bf16 %v2969_v15, %v2962_v22  ;;  %v3387_v57 = vsel %vm1266_vm2, %v3380_v48, 0 }
 0x7c4   :  { %16854 = vmatpush3.bf16.msra.mxu1 %v18615_v21  ;;  %v2871_v27 = vsel %vm166_vm0, %v2860_v23, 0  ;;  %v3392_v60 = vand.u32 4294901760, %v3387_v57 }
 0x7c5   :  { %v17964_v28 = vpop.eup %17963  ;;  %v2964_v29 = vsub.f32 %v2962_v22, %v2963_v26  ;;  %v18620_v31 = vand.u32 4294901760, %v2871_v27  ;;  %v16867_v51 = vpack.c.bf16 %v2970_v17, %v2963_v26 }
 0x7c6   :  { %v2858_v33 = vmul.f32 %v17964_v28, %v17960_v7  ;;  %v3382_v50 = vpop.permute.xlu1 %3381  ;;  %v3480_v63 = vsub.f32 %v3387_v57, %v3392_v60 }
 0x7c7   :  { %v2965_v34 = vand.u32 4294901760, %v2964_v29  ;;  %v2951_v36 = vsub.f32 %v2871_v27, %v18620_v31  ;;  %v3389_v54 = vsel %vm1266_vm2, %v3382_v50, 0 }
 0x7c8   :  { %v2868_v37 = vsel %vm166_vm0, %v2858_v33, 0  ;;  %v3395_v58 = vand.u32 4294901760, %v3389_v54  ;;  %v3481_v3 = vand.u32 4294901760, %v3480_v63 }
 0x7c9   :  { %v16855_v38 = vpack.c.bf16 %v2972_v35, %v2965_v34  ;;  %v2940_v39 = vand.u32 4294901760, %v2868_v37  ;;  %v2952_v40 = vand.u32 4294901760, %v2951_v36 }
 0x7ca   :  { %v3487_v61 = vsub.f32 %v3389_v54, %v3395_v58  ;;  %v3378_v62 = vpop.permute.xlu1 %3377  ;;  %v16875_v5 = vpack.c.bf16 %v3395_v58, %v3392_v60  ;;  %v3482_v7 = vsub.f32 %v3480_v63, %v3481_v3 }
 0x7cb   :  { %16856 = vmatprep.subr.bf16.mxu1 %v16855_v38  ;;  %v2941_v41 = vsub.f32 %v2868_v37, %v2940_v39  ;;  %v2953_v43 = vsub.f32 %v2951_v36, %v2952_v40  ;;  %v3385_v0 = vsel %vm1266_vm2, %v3378_v62, 0 }
 0x7cc   :  { %v3488_v1 = vand.u32 4294901760, %v3487_v61  ;;  %v3468_v4 = vand.u32 4294901760, %v3385_v0  ;;  %v3483_v15 = vand.u32 4294901760, %v3482_v7  ;;  %v16883_v19 = vpack.c.bf16 %v3487_v61, %v3480_v63 }
 0x7cd   :  { %v2942_v42 = vand.u32 4294901760, %v2941_v41  ;;  %v2954_v46 = vand.u32 4294901760, %v2953_v43 }
 0x7ce   :  { %v3489_v6 = vsub.f32 %v3487_v61, %v3488_v1  ;;  %v3469_v8 = vsub.f32 %v3385_v0, %v3468_v4 }
 0x7cf   :  { %v2943_v44 = vsub.f32 %v2941_v41, %v2942_v42 }
 0x7d0   :  { %v3490_v12 = vand.u32 4294901760, %v3489_v6  ;;  %v3470_v13 = vand.u32 4294901760, %v3469_v8 }
 0x7d1   :  { %v2944_v45 = vand.u32 4294901760, %v2943_v44 }
 0x7d2   :  { %v16879_v16 = vpack.c.bf16 %v3490_v12, %v3483_v15  ;;  %v3471_v17 = vsub.f32 %v3469_v8, %v3470_v13 }
 0x7d3   :  { %15541 = vmatprep.mubr.f32.mxu1 %v2944_v45 }
 0x7d4   :  { %15542 = vmatmul.mubr.f32.vlgmr.msra.gmra.mrb[4].mxu1 %v2954_v46  ;;  %v3472_v18 = vand.u32 4294901760, %v3471_v17 }
 0x7d5   :  { %16858 = vmatpush3.bf16.msra.mxu1 %v16855_v38  ;;  %15548 = vmatprep.mubr.f32.mxu1 %v2940_v39 }
 0x7d6   :  { %16860 = vmatprep.subr.bf16.mxu1 %v16859_v47 }
 0x7dc   :  { %15549 = vmatmul.mubr.f32.vlgmr.msra.gmra.mrb[4].mxu1 %v18620_v31 }
 0x7dd   :  { %16862 = vmatpush3.bf16.msra.mxu1 %v16859_v47  ;;  %15555 = vmatprep.mubr.f32.mxu1 %v2941_v41 }
 0x7de   :  { %16864 = vmatprep.subr.bf16.mxu1 %v18615_v21 }
 0x7e4   :  { %15556 = vmatmul.mubr.f32.vlgmr.msra.gmra.mrb[4].mxu1 %v2951_v36 }
 0x7e5   :  { %16866 = vmatpush3.bf16.msra.mxu1 %v18615_v21  ;;  %15562 = vmatprep.mubr.f32.mxu1 %v2942_v42 }
 0x7e6   :  { %16868 = vmatprep.subr.bf16.mxu1 %v16867_v51 }
 0x7ec   :  { %15563 = vmatmul.mubr.f32.vlgmr.msra.gmra.mrb[4].mxu1 %v2952_v40 }
 0x7ed   :  { %16870 = vmatpush3.bf16.msra.mxu1 %v16867_v51  ;;  %15569 = vmatprep.mubr.f32.mxu1 %v2940_v39 }
 0x7ee   :  { %16872 = vmatprep.subr.bf16.mxu1 %v18615_v21 }
 0x7f4   :  { %15570 = vmatmul.mubr.f32.vlgmr.msra.gmra.mrb[4].mxu1 %v18620_v31 }
 0x7f5   :  { %16874 = vmatpush3.bf16.msra.mxu1 %v18615_v21  ;;  %15576 = vmatprep.mubr.f32.mxu1 %v2940_v39  ;;  %v16891_v21 = vpack.c.bf16 %v3488_v1, %v3481_v3 }
 0x7f6   :  { %16876 = vmatprep.subr.bf16.mxu1 %v16875_v5 }
 0x7fc   :  { %15577 = vmatmul.mubr.f32.vlgmr.msra.gmra.mrb[4].mxu1 %v18620_v31 }
 0x7fd   :  { %15583 = vmatprep.mubr.f32.mxu1 %v3462_v14 }
 0x7fe   :  { %16878 = vmatpush3.bf16.xpose.msra.mxu1 %v16875_v5 }
 0x7ff   :  { %16880 = vmatprep.subr.bf16.mxu1 %v16879_v16 }
 0x805   :  { %15584 = vmatmul.mubr.f32.vlgmr.msra.gmra.mrb[6].mxu1 %v3472_v18 }
 0x806   :  { %16882 = vmatpush3.bf16.xpose.msra.mxu1 %v16879_v16  ;;  %15590 = vmatprep.mubr.f32.mxu1 %v3458_v59 }
 0x807   :  { %16884 = vmatprep.subr.bf16.mxu1 %v16883_v19 }
 0x80d   :  { %15591 = vmatmul.mubr.f32.vlgmr.msra.gmra.mrb[6].mxu1 %v3468_v4 }
 0x80e   :  { %16886 = vmatpush3.bf16.xpose.msra.mxu1 %v16883_v19  ;;  %15597 = vmatprep.mubr.f32.mxu1 %v3459_v49 }
 0x80f   :  { %16888 = vmatprep.subr.bf16.mxu1 %v16875_v5 }
 0x815   :  { %15598 = vmatmul.mubr.f32.vlgmr.msra.gmra.mrb[6].mxu1 %v3469_v8 }
 0x816   :  { %16890 = vmatpush3.bf16.xpose.msra.mxu1 %v16875_v5  ;;  %15604 = vmatprep.mubr.f32.mxu1 %v3460_v2 }
 0x817   :  { %16892 = vmatprep.subr.bf16.mxu1 %v16891_v21 }
 0x81d   :  { %15605 = vmatmul.mubr.f32.vlgmr.msra.gmra.mrb[6].mxu1 %v3470_v13 }
 0x81e   :  { %16894 = vmatpush3.bf16.xpose.msra.mxu1 %v16891_v21  ;;  %15611 = vmatprep.mubr.f32.mxu1 %v3458_v59 }
 0x81f   :  { %16896 = vmatprep.subr.bf16.mxu1 %v16875_v5 }
 0x825   :  { %15612 = vmatmul.mubr.f32.vlgmr.msra.gmra.mrb[6].mxu1 %v3468_v4 }
 0x826   :  { %16898 = vmatpush3.bf16.xpose.msra.mxu1 %v16875_v5  ;;  %15618 = vmatprep.mubr.f32.mxu1 %v3458_v59 }
 0x82d   :  { %15619 = vmatmul.mubr.f32.vlgmr.msra.gmra.mrb[6].mxu1 %v3468_v4 }
 0x8cf   :  { %v18635_v22 = vpop.f32.mrb[4].mxu1 }
 0x8d0   :  { %v18637_v23 = vpop.f32.mrb[5].mxu1 }
 0x900   :  { %v15620_v25 = vpop.f32.mrb[6].mxu1 }
 0x901   :  { %v3894_v26 = vmul.f32 0.35355338, %v15620_v25  ;;  %v3883_v27 = vpop.f32.mrb[7].mxu1 }
 0x902   :  { %v3893_v28 = vmul.f32 0.35355338, %v3883_v27 }
 0x903   :  { %v3896_v29 = vadd.f32 %v3894_v26, %v18505_v24 }
 0x904   :  { %v3895_v31 = vadd.f32 %v3893_v28, %v18503_v20 }
 0x905   :  { %v3900_v33 = vsel %vm166_vm0, %v3896_v29, -inf }
 0x906   :  { %3901 = vmax.xlane.f32.xlu1 %v3900_v33  ;;  %v3897_v34 = vsel %vm166_vm0, %v3895_v31, -inf }
 0x907   :  { %3898 = vmax.xlane.f32.xlu0 %v3897_v34 }
 0x917   :  { %3919 = vrot.lane.b32.xlu1 %v18491_v32, %s18235_s23 }
 0x91b   :  { %4437 = vrot.lane.b32.xlu1 %v18491_v32, %s18236_s21 }
 0x91f   :  { %4439 = vrot.lane.b32.xlu1 %v18489_v30, %s18236_s21 }
 0x923   :  { %4435 = vrot.lane.b32.xlu1 %v18489_v30, %s19299_s22 }
 0x993   :  { %v3902_v35 = vpop.xlane.xlu1 %3901 }
 0x994   :  { %v3904_v36 = vsub.f32 %v3896_v29, %v3902_v35  ;;  %v3899_v37 = vpop.xlane.xlu0 %3898 }
 0x995   :  { %v3903_v38 = vsub.f32 %v3895_v31, %v3899_v37 }
 0x996   :  { %v3907_v39 = vmul.f32 1.442695, %v3904_v36 }
 0x997   :  { %v3905_v40 = vmul.f32 1.442695, %v3903_v38  ;;  %v3920_v45 = vpop.permute.xlu1 %3919 }
 0x998   :  { %17965 = vpow2.f32 %v3907_v39  ;;  %v3932_v47 = vand.u32 4294901760, %v3920_v45 }
 0x999   :  { %17967 = vpow2.f32 %v3905_v40 }
 0x99a   :  { %v4020_v50 = vsub.f32 %v3920_v45, %v3932_v47 }
 0x99b   :  { %v4438_v18 = vpop.permute.xlu1 %4437 }
 0x99c   :  { %v4021_v52 = vand.u32 4294901760, %v4020_v50  ;;  %v4445_v27 = vsel %vm1266_vm2, %v4438_v18, 0 }
 0x99d   :  { %v4450_v31 = vand.u32 4294901760, %v4445_v27 }
 0x99e   :  { %v4022_v60 = vsub.f32 %v4020_v50, %v4021_v52 }
 0x99f   :  { %v4440_v19 = vpop.permute.xlu1 %4439  ;;  %v4538_v36 = vsub.f32 %v4445_v27, %v4450_v31 }
 0x9a0   :  { %v4023_v2 = vand.u32 4294901760, %v4022_v60  ;;  %v4447_v26 = vsel %vm1266_vm2, %v4440_v19, 0 }
 0x9a1   :  { %v4453_v29 = vand.u32 4294901760, %v4447_v26  ;;  %v4539_v40 = vand.u32 4294901760, %v4538_v36 }
 0x9a2   :  { %v17966_v41 = vpop.eup %17965 }
 0x9a3   :  { %v3912_v42 = vsel %vm166_vm0, %v17966_v41, 0.0  ;;  %v17968_v43 = vpop.eup %17967  ;;  %v4545_v34 = vsub.f32 %v4447_v26, %v4453_v29  ;;  %v4436_v35 = vpop.permute.xlu1 %4435  ;;  %v4540_v45 = vsub.f32 %v4538_v36, %v4539_v40 }
 0x9a4   :  { %3913 = vadd.xlane.f32.xlu0 %v3912_v42  ;;  %v3909_v44 = vsel %vm166_vm0, %v17968_v43, 0.0  ;;  %v4443_v38 = vsel %vm1266_vm2, %v4436_v35, 0 }
 0x9a5   :  { %v4546_v39 = vand.u32 4294901760, %v4545_v34 }
 0x9a8   :  { %3910 = vadd.xlane.f32.xlu0 %v3909_v44  ;;  %v4547_v44 = vsub.f32 %v4545_v34, %v4546_v39 }
 0x9be   :  { %3921 = vrot.lane.b32.xlu0 %v18489_v30, %s18235_s23 }
 0x9c2   :  { %4433 = vrot.lane.b32.xlu0 %v18491_v32, %s19299_s22 }
 0xa31   :  { %v3914_v46 = vpop.xlane.xlu0 %3913 }
 0xa32   :  { %17969 = vrcp.f32 %v3914_v46 }
 0xa35   :  { %v3911_v48 = vpop.xlane.xlu0 %3910 }
 0xa36   :  { %17971 = vrcp.f32 %v3911_v48  ;;  %v4548_v48 = vand.u32 4294901760, %v4547_v44 }
 0xa39   :  { %v3922_v51 = vpop.permute.xlu0 %3921 }
 0xa3a   :  { %v3935_v54 = vand.u32 4294901760, %v3922_v51 }
 0xa3c   :  { %v17970_v56 = vpop.eup %17969  ;;  %v18657_v57 = vpack.c.bf16 %v3935_v54, %v3932_v47  ;;  %v4027_v58 = vsub.f32 %v3922_v51, %v3935_v54 }
 0xa3d   :  { %v3918_v59 = vmul.f32 %v17970_v56, %v17966_v41  ;;  %v4434_v25 = vpop.permute.xlu0 %4433  ;;  %v4526_v41 = vand.u32 4294901760, %v4443_v38 }
 0xa3e   :  { %v4028_v61 = vand.u32 4294901760, %v4027_v58  ;;  %16900 = vmatprep.subr.bf16.mxu0 %v18657_v57  ;;  %v16907_v17 = vpack.c.bf16 %v4027_v58, %v4020_v50  ;;  %v4441_v28 = vsel %vm1266_vm2, %v4434_v25, 0 }
 0xa3f   :  { %16902 = vmatpush3.bf16.msra.mxu0 %v18657_v57  ;;  %v3929_v62 = vsel %vm166_vm0, %v3918_v59, 0  ;;  %v4516_v33 = vand.u32 4294901760, %v4441_v28  ;;  %v4527_v46 = vsub.f32 %v4443_v38, %v4526_v41  ;;  %v16931_v59 = vpack.c.bf16 %v4545_v34, %v4538_v36 }
 0xa40   :  { %v17972_v49 = vpop.eup %17971  ;;  %v4029_v63 = vsub.f32 %v4027_v58, %v4028_v61  ;;  %v18662_v0 = vand.u32 4294901760, %v3929_v62  ;;  %v16915_v21 = vpack.c.bf16 %v4028_v61, %v4021_v52  ;;  %v4541_v52 = vand.u32 4294901760, %v4540_v45 }
 0xa41   :  { %v3916_v1 = vmul.f32 %v17972_v49, %v17968_v43  ;;  %v4517_v37 = vsub.f32 %v4441_v28, %v4516_v33  ;;  %v16923_v43 = vpack.c.bf16 %v4453_v29, %v4450_v31  ;;  %v4528_v50 = vand.u32 4294901760, %v4527_v46 }
 0xa42   :  { %v4030_v3 = vand.u32 4294901760, %v4029_v63  ;;  %v4009_v4 = vsub.f32 %v3929_v62, %v18662_v0  ;;  %v16927_v54 = vpack.c.bf16 %v4548_v48, %v4541_v52 }
 0xa43   :  { %v3926_v5 = vsel %vm166_vm0, %v3916_v1, 0  ;;  %v4518_v42 = vand.u32 4294901760, %v4517_v37  ;;  %v4529_v56 = vsub.f32 %v4527_v46, %v4528_v50 }
 0xa44   :  { %v16903_v6 = vpack.c.bf16 %v4030_v3, %v4023_v2  ;;  %v3998_v7 = vand.u32 4294901760, %v3926_v5  ;;  %v4010_v8 = vand.u32 4294901760, %v4009_v4 }
 0xa45   :  { %v4519_v47 = vsub.f32 %v4517_v37, %v4518_v42  ;;  %v4530_v58 = vand.u32 4294901760, %v4529_v56  ;;  %v5522_v56 = vld [vmem:[%s19272_s8] sm:$0xff] }
 0xa46   :  { %16904 = vmatprep.subr.bf16.mxu0 %v16903_v6  ;;  %v3999_v9 = vsub.f32 %v3926_v5, %v3998_v7  ;;  %v4011_v13 = vsub.f32 %v4009_v4, %v4010_v8 }
 0xa47   :  { %v4520_v51 = vand.u32 4294901760, %v4519_v47 }
 0xa48   :  { %v4000_v12 = vand.u32 4294901760, %v3999_v9  ;;  %v4012_v16 = vand.u32 4294901760, %v4011_v13 }
 0xa4a   :  { %v4001_v14 = vsub.f32 %v3999_v9, %v4000_v12 }
 0xa4c   :  { %v4002_v15 = vand.u32 4294901760, %v4001_v14 }
 0xa4e   :  { %15625 = vmatprep.mubr.f32.mxu0 %v4002_v15 }
 0xa4f   :  { %15626 = vmatmul.mubr.f32.vlgmr.msra.gmra.mrb[10].mxu0 %v4012_v16 }
 0xa50   :  { %16906 = vmatpush3.bf16.msra.mxu0 %v16903_v6  ;;  %15632 = vmatprep.mubr.f32.mxu0 %v3998_v7 }
 0xa51   :  { %16908 = vmatprep.subr.bf16.mxu0 %v16907_v17 }
 0xa57   :  { %15633 = vmatmul.mubr.f32.vlgmr.msra.gmra.mrb[10].mxu0 %v18662_v0 }
 0xa58   :  { %16910 = vmatpush3.bf16.msra.mxu0 %v16907_v17  ;;  %15639 = vmatprep.mubr.f32.mxu0 %v3999_v9 }
 0xa59   :  { %16912 = vmatprep.subr.bf16.mxu0 %v18657_v57 }
 0xa5f   :  { %15640 = vmatmul.mubr.f32.vlgmr.msra.gmra.mrb[10].mxu0 %v4009_v4 }
 0xa60   :  { %16914 = vmatpush3.bf16.msra.mxu0 %v18657_v57  ;;  %15646 = vmatprep.mubr.f32.mxu0 %v4000_v12 }
 0xa61   :  { %16916 = vmatprep.subr.bf16.mxu0 %v16915_v21 }
 0xa67   :  { %15647 = vmatmul.mubr.f32.vlgmr.msra.gmra.mrb[10].mxu0 %v4010_v8 }
 0xa68   :  { %16918 = vmatpush3.bf16.msra.mxu0 %v16915_v21  ;;  %15653 = vmatprep.mubr.f32.mxu0 %v3998_v7 }
 0xa69   :  { %16920 = vmatprep.subr.bf16.mxu0 %v18657_v57 }
 0xa6f   :  { %15654 = vmatmul.mubr.f32.vlgmr.msra.gmra.mrb[10].mxu0 %v18662_v0 }
 0xa70   :  { %16922 = vmatpush3.bf16.msra.mxu0 %v18657_v57  ;;  %15660 = vmatprep.mubr.f32.mxu0 %v3998_v7  ;;  %v16939_v57 = vpack.c.bf16 %v4546_v39, %v4539_v40 }
 0xa71   :  { %16924 = vmatprep.subr.bf16.mxu0 %v16923_v43 }
 0xa77   :  { %15661 = vmatmul.mubr.f32.vlgmr.msra.gmra.mrb[10].mxu0 %v18662_v0 }
 0xa78   :  { %15667 = vmatprep.mubr.f32.mxu0 %v4520_v51 }
 0xa79   :  { %16926 = vmatpush3.bf16.xpose.msra.mxu0 %v16923_v43 }
 0xa7a   :  { %16928 = vmatprep.subr.bf16.mxu0 %v16927_v54 }
 0xa80   :  { %15668 = vmatmul.mubr.f32.vlgmr.msra.gmra.mrb[12].mxu0 %v4530_v58  ;;  %v5523_v58 = vld [vmem:[%s19272_s8 + $0x8] sm:$0xff] }
 0xa81   :  { %16930 = vmatpush3.bf16.xpose.msra.mxu0 %v16927_v54  ;;  %15674 = vmatprep.mubr.f32.mxu0 %v4516_v33 }
 0xa82   :  { %16932 = vmatprep.subr.bf16.mxu0 %v16931_v59 }
 0xa88   :  { %15675 = vmatmul.mubr.f32.vlgmr.msra.gmra.mrb[12].mxu0 %v4526_v41 }
 0xa89   :  { %16934 = vmatpush3.bf16.xpose.msra.mxu0 %v16931_v59  ;;  %15681 = vmatprep.mubr.f32.mxu0 %v4517_v37  ;;  %v5540_v59 = vand.u32 4294901760, %v5522_v56 }
 0xa8a   :  { %16936 = vmatprep.subr.bf16.mxu0 %v16923_v43 }
 0xa90   :  { %15682 = vmatmul.mubr.f32.vlgmr.msra.gmra.mrb[12].mxu0 %v4527_v46 }
 0xa91   :  { %16938 = vmatpush3.bf16.xpose.msra.mxu0 %v16923_v43  ;;  %15688 = vmatprep.mubr.f32.mxu0 %v4518_v42 }
 0xa92   :  { %16940 = vmatprep.subr.bf16.mxu0 %v16939_v57 }
 0xa98   :  { %15689 = vmatmul.mubr.f32.vlgmr.msra.gmra.mrb[12].mxu0 %v4528_v50 }
 0xa99   :  { %16942 = vmatpush3.bf16.xpose.msra.mxu0 %v16939_v57  ;;  %15695 = vmatprep.mubr.f32.mxu0 %v4516_v33  ;;  %v5543_v57 = vand.u32 4294901760, %v5523_v58 }
 0xa9a   :  { %16944 = vmatprep.subr.bf16.mxu0 %v16923_v43 }
 0xaa0   :  { %15696 = vmatmul.mubr.f32.vlgmr.msra.gmra.mrb[12].mxu0 %v4526_v41 }
 0xaa1   :  { %16946 = vmatpush3.bf16.xpose.msra.mxu0 %v16923_v43  ;;  %15702 = vmatprep.mubr.f32.mxu0 %v4516_v33 }
 0xaa8   :  { %15703 = vmatmul.mubr.f32.vlgmr.msra.gmra.mrb[12].mxu0 %v4526_v41 }
 0xb4a   :  { %v15662_v60 = vpop.f32.mrb[10].mxu0 }
 0xb4b   :  { %v4423_v61 = vpop.f32.mrb[11].mxu0 }
 0xb7b   :  { %v15704_v62 = vpop.f32.mrb[12].mxu0 }
 0xb7c   :  { %v4952_v49 = vmul.f32 0.35355338, %v15704_v62  ;;  %v4941_v63 = vpop.f32.mrb[13].mxu0  ;;  %v5637_v62 = vsub.f32 %v5523_v58, %v5543_v57 }
 0xb7d   :  { %v4951_v0 = vmul.f32 0.35355338, %v4941_v63  ;;  %v5525_v63 = vld [vmem:[%s19272_s8 + $0x18] sm:$0xff] }
 0xb7e   :  { %v4954_v1 = vadd.f32 %v4952_v49, %v18505_v24  ;;  %v5524_v49 = vld [vmem:[%s19272_s8 + $0x10] sm:$0xff] }
 0xb7f   :  { %v4953_v2 = vadd.f32 %v4951_v0, %v18503_v20  ;;  %v5546_v0 = vand.u32 4294901760, %v5524_v49 }
 0xb80   :  { %v4958_v3 = vsel %vm166_vm0, %v4954_v1, -inf }
 0xb81   :  { %4959 = vmax.xlane.f32.xlu1 %v4958_v3  ;;  %v4955_v4 = vsel %vm166_vm0, %v4953_v2, -inf  ;;  %v5638_v3 = vand.u32 4294901760, %v5637_v62 }
 0xb82   :  { %4956 = vmax.xlane.f32.xlu0 %v4955_v4 }
 0xb92   :  { %4977 = vrot.lane.b32.xlu1 %v18491_v32, %s19297_s28 }
 0xb96   :  { %5493 = vrot.lane.b32.xlu1 %v18637_v23, %s19313_s5 }
 0xb9a   :  { %5495 = vrot.lane.b32.xlu1 %v18635_v22, %s19313_s5 }
 0xb9e   :  { %5503 = vrot.lane.b32.xlu1 %v15662_v60, %s19295_s27  ;;  %v18701_v60 = vpack.c.bf16 %v5543_v57, %v5540_v59 }
 0xc0e   :  { %v4960_v5 = vpop.xlane.xlu1 %4959 }
 0xc0f   :  { %v4962_v6 = vsub.f32 %v4954_v1, %v4960_v5  ;;  %v4957_v7 = vpop.xlane.xlu0 %4956  ;;  %v5549_v1 = vand.u32 4294901760, %v5525_v63 }
 0xc10   :  { %v4961_v8 = vsub.f32 %v4953_v2, %v4957_v7  ;;  %v5644_v7 = vsub.f32 %v5524_v49, %v5546_v0 }
 0xc11   :  { %v4965_v9 = vmul.f32 1.442695, %v4962_v6  ;;  %v18711_v4 = vpack.c.bf16 %v5549_v1, %v5546_v0  ;;  %v5639_v6 = vsub.f32 %v5637_v62, %v5638_v3 }
 0xc12   :  { %v4963_v12 = vmul.f32 1.442695, %v4961_v8  ;;  %v4978_v22 = vpop.permute.xlu1 %4977  ;;  %v5651_v8 = vsub.f32 %v5525_v63, %v5549_v1 }
 0xc13   :  { %17973 = vpow2.f32 %v4965_v9  ;;  %v4990_v16 = vand.u32 4294901760, %v4978_v22 }
 0xc14   :  { %17975 = vpow2.f32 %v4963_v12  ;;  %v5640_v12 = vand.u32 4294901760, %v5639_v6 }
 0xc15   :  { %v5078_v18 = vsub.f32 %v4978_v22, %v4990_v16 }
 0xc17   :  { %v5079_v21 = vand.u32 4294901760, %v5078_v18 }
 0xc19   :  { %v5080_v31 = vsub.f32 %v5078_v18, %v5079_v21 }
 0xc1b   :  { %v5081_v38 = vand.u32 4294901760, %v5080_v31 }
 0xc1d   :  { %v17974_v13 = vpop.eup %17973 }
 0xc1e   :  { %v4970_v14 = vsel %vm166_vm0, %v17974_v13, 0.0  ;;  %v17976_v32 = vpop.eup %17975 }
 0xc1f   :  { %4971 = vadd.xlane.f32.xlu0 %v4970_v14  ;;  %v4967_v23 = vsel %vm166_vm0, %v17976_v32, 0.0 }
 0xc23   :  { %4968 = vadd.xlane.f32.xlu0 %v4967_v23 }
 0xc39   :  { %4979 = vrot.lane.b32.xlu0 %v18489_v30, %s19297_s28 }
 0xc3d   :  { %5501 = vrot.lane.b32.xlu0 %v4423_v61, %s19295_s27  ;;  %v5630_v61 = vsub.f32 %v5522_v56, %v5540_v59  ;;  %s19301_s27 = smov 24  }
 0xc3f   :  { %v5631_v2 = vand.u32 4294901760, %v5630_v61 }
 0xc41   :  { %v5632_v5 = vsub.f32 %v5630_v61, %v5631_v2 }
 0xc43   :  { %v5633_v9 = vand.u32 4294901760, %v5632_v5 }
 0xc45   :  { %v16979_v22 = vpack.c.bf16 %v5640_v12, %v5633_v9 }
 0xcac   :  { %v4972_v15 = vpop.xlane.xlu0 %4971 }
 0xcad   :  { %17977 = vrcp.f32 %v4972_v15 }
 0xcb0   :  { %v4969_v17 = vpop.xlane.xlu0 %4968 }
 0xcb1   :  { %17979 = vrcp.f32 %v4969_v17 }
 0xcb4   :  { %v4980_v19 = vpop.permute.xlu0 %4979 }
 0xcb5   :  { %v4993_v25 = vand.u32 4294901760, %v4980_v19 }
 0xcb7   :  { %v17978_v26 = vpop.eup %17977  ;;  %v16947_v27 = vpack.c.bf16 %v4993_v25, %v4990_v16  ;;  %v5085_v28 = vsub.f32 %v4980_v19, %v4993_v25  ;;  %v16991_v25 = vpack.c.bf16 %v5651_v8, %v5644_v7 }
 0xcb8   :  { %v4976_v29 = vmul.f32 %v17978_v26, %v17974_v13  ;;  %v5645_v13 = vand.u32 4294901760, %v5644_v7  ;;  %v17003_v26 = vpack.c.bf16 %v5638_v3, %v5631_v2 }
 0xcb9   :  { %v5086_v33 = vand.u32 4294901760, %v5085_v28  ;;  %16948 = vmatprep.subr.bf16.mxu1 %v16947_v27  ;;  %v16955_v52 = vpack.c.bf16 %v5085_v28, %v5078_v18 }
 0xcba   :  { %16950 = vmatpush3.bf16.msra.mxu1 %v16947_v27  ;;  %v4987_v30 = vsel %vm166_vm0, %v4976_v29, 0  ;;  %v5646_v15 = vsub.f32 %v5644_v7, %v5645_v13  ;;  %v6115_v7 = vld [vmem:[%s19276_s12 + $0x8] sm:$0xff] }
 0xcbb   :  { %v17980_v34 = vpop.eup %17979  ;;  %v5087_v35 = vsub.f32 %v5085_v28, %v5086_v33  ;;  %v5066_v36 = vand.u32 4294901760, %v4987_v30  ;;  %v16963_v54 = vpack.c.bf16 %v5086_v33, %v5079_v21  ;;  %v16987_v21 = vpack.c.bf16 %v5637_v62, %v5630_v61  ;;  %v5494_v28 = vpop.permute.xlu1 %5493 }
 0xcbc   :  { %v4974_v37 = vmul.f32 %v17980_v34, %v17976_v32  ;;  %v5652_v32 = vand.u32 4294901760, %v5651_v8  ;;  %v5647_v17 = vand.u32 4294901760, %v5646_v15  ;;  %v5502_v33 = vpop.permute.xlu0 %5501  ;;  %v5515_v34 = vsel %vm1266_vm2, %v18595_v55, %v5494_v28 }
 0xcbd   :  { %v5088_v39 = vand.u32 4294901760, %v5087_v35  ;;  %v5067_v40 = vsub.f32 %v4987_v30, %v5066_v36  ;;  %v6135_v12 = vand.u32 4294901760, %v6115_v7 }
 0xcbe   :  { %v4984_v41 = vsel %vm166_vm0, %v4974_v37, 0  ;;  %v5653_v16 = vsub.f32 %v5651_v8, %v5652_v32  ;;  %v5517_v37 = vsel %vm166_vm0, %v5515_v34, %v5502_v33  ;;  %v6116_v8 = vld [vmem:[%s19276_s12 + $0x10] sm:$0xff] }
 0xcbf   :  { %v16951_v42 = vpack.c.bf16 %v5088_v39, %v5081_v38  ;;  %v5056_v43 = vand.u32 4294901760, %v4984_v41  ;;  %v5068_v44 = vand.u32 4294901760, %v5067_v40  ;;  %v5496_v29 = vpop.permute.xlu1 %5495 }
 0xcc0   :  { %v5654_v18 = vand.u32 4294901760, %v5653_v16  ;;  %v5516_v30 = vsel %vm1266_vm2, %v18593_v53, %v5496_v29  ;;  %v6229_v16 = vsub.f32 %v6115_v7, %v6135_v12 }
 0xcc1   :  { %16952 = vmatprep.subr.bf16.mxu1 %v16951_v42  ;;  %v5057_v45 = vsub.f32 %v4984_v41, %v5056_v43  ;;  %v5069_v47 = vsub.f32 %v5067_v40, %v5068_v44 }
 0xcc2   :  { %v16983_v19 = vpack.c.bf16 %v5654_v18, %v5647_v17  ;;  %v6230_v18 = vand.u32 4294901760, %v6229_v16 }
 0xcc3   :  { %v5058_v46 = vand.u32 4294901760, %v5057_v45  ;;  %v5070_v51 = vand.u32 4294901760, %v5069_v47  ;;  %v5504_v31 = vpop.permute.xlu1 %5503 }
 0xcc4   :  { %v5518_v35 = vsel %vm166_vm0, %v5516_v30, %v5504_v31 }
 0xcc5   :  { %v5059_v48 = vsub.f32 %v5057_v45, %v5058_v46 }
 0xcc7   :  { %v5060_v50 = vand.u32 4294901760, %v5059_v48 }
 0xcc9   :  { %15709 = vmatprep.mubr.f32.mxu1 %v5060_v50 }
 0xcca   :  { %15710 = vmatmul.mubr.f32.vlgmr.msra.gmra.mrb[8].mxu1 %v5070_v51 }
 0xccb   :  { %16954 = vmatpush3.bf16.msra.mxu1 %v16951_v42  ;;  %15716 = vmatprep.mubr.f32.mxu1 %v5056_v43 }
 0xccc   :  { %16956 = vmatprep.subr.bf16.mxu1 %v16955_v52 }
 0xcd2   :  { %15717 = vmatmul.mubr.f32.vlgmr.msra.gmra.mrb[8].mxu1 %v5066_v36 }
 0xcd3   :  { %16958 = vmatpush3.bf16.msra.mxu1 %v16955_v52  ;;  %15723 = vmatprep.mubr.f32.mxu1 %v5057_v45  ;;  %v14480_v52 = vld [vmem:[#allocation13] ss:$0 sm:$0xff] }
 0xcd4   :  { %16960 = vmatprep.subr.bf16.mxu1 %v16947_v27 }
 0xcda   :  { %15724 = vmatmul.mubr.f32.vlgmr.msra.gmra.mrb[8].mxu1 %v5067_v40 }
 0xcdb   :  { %16962 = vmatpush3.bf16.msra.mxu1 %v16947_v27  ;;  %15730 = vmatprep.mubr.f32.mxu1 %v5058_v46 }
 0xcdc   :  { %16964 = vmatprep.subr.bf16.mxu1 %v16963_v54 }
 0xce2   :  { %15731 = vmatmul.mubr.f32.vlgmr.msra.gmra.mrb[8].mxu1 %v5068_v44 }
 0xce3   :  { %16966 = vmatpush3.bf16.msra.mxu1 %v16963_v54  ;;  %15737 = vmatprep.mubr.f32.mxu1 %v5056_v43 }
 0xce4   :  { %16968 = vmatprep.subr.bf16.mxu1 %v16947_v27 }
 0xcea   :  { %15738 = vmatmul.mubr.f32.vlgmr.msra.gmra.mrb[8].mxu1 %v5066_v36 }
 0xceb   :  { %16970 = vmatpush3.bf16.msra.mxu1 %v16947_v27  ;;  %15744 = vmatprep.mubr.f32.mxu1 %v5056_v43  ;;  %v17007_v27 = vpack.c.bf16 %v5652_v32, %v5645_v13  ;;  %v6117_v13 = vld [vmem:[%s19276_s12 + $0x18] sm:$0xff] }
 0xcec   :  { %16972 = vmatprep.subr.bf16.mxu1 %v18701_v60  ;;  %v6141_v32 = vand.u32 4294901760, %v6117_v13 }
 0xcf2   :  { %15745 = vmatmul.mubr.f32.vlgmr.msra.gmra.mrb[8].mxu1 %v5066_v36 }
 0xcf3   :  { %16974 = vmatpush3.bf16.msra.mxu1 %v18701_v60 }
 0xcf4   :  { %16976 = vmatprep.subr.bf16.mxu1 %v18711_v4 }
 0xcf7   :  { %16978 = vmatpush3.bf16.msra.mxu1 %v18711_v4 }
 0xcf8   :  { %16980 = vmatprep.subr.bf16.mxu1 %v16979_v22 }
 0xdc5   :  { %v15746_v14 = vpop.f32.mrb[8].mxu1 }
 0xdc6   :  { %5511 = vrot.lane.b32.xlu1 %v15746_v14, %s19301_s27  ;;  %v5481_v23 = vpop.f32.mrb[9].mxu1  ;;  %v6138_v14 = vand.u32 4294901760, %v6116_v8 }
 0xdc7   :  { %5509 = vrot.lane.b32.xlu0 %v5481_v23, %s19301_s27 }
 0xe38   :  { %v5512_v36 = vpop.permute.xlu1 %5511 }
 0xe39   :  { %v5521_v38 = vsel %vm5519_vm10, %v5518_v35, %v5512_v36  ;;  %v5510_v39 = vpop.permute.xlu0 %5509 }
 0xe3a   :  { %v5537_v40 = vsel %vm725_vm1, %v5521_v38, 0  ;;  %v5520_v41 = vsel %vm5519_vm10, %v5517_v37, %v5510_v39 }
 0xe3b   :  { %v5618_v42 = vand.u32 4294901760, %v5537_v40  ;;  %v5534_v43 = vsel %vm725_vm1, %v5520_v41, 0 }
 0xe3c   :  { %v5608_v44 = vand.u32 4294901760, %v5534_v43 }
 0xe3d   :  { %v5619_v53 = vsub.f32 %v5537_v40, %v5618_v42 }
 0xe3e   :  { %v5609_v45 = vsub.f32 %v5534_v43, %v5608_v44 }
 0xe3f   :  { %v5620_v46 = vand.u32 4294901760, %v5619_v53 }
 0xe40   :  { %v5610_v55 = vand.u32 4294901760, %v5609_v45 }
 0xe41   :  { %v5621_v47 = vsub.f32 %v5619_v53, %v5620_v46 }
 0xe42   :  { %v5611_v48 = vsub.f32 %v5609_v45, %v5610_v55 }
 0xe43   :  { %v5622_v51 = vand.u32 4294901760, %v5621_v47  ;;  %v14481_v47 = vld [vmem:[%s19274_s10] ss:$0 sm:$0xff] }
 0xe44   :  { %v5612_v50 = vand.u32 4294901760, %v5611_v48 }
 0xe46   :  { %15755 = vmatprep.mubr.f32.mxu1 %v5612_v50  ;;  %v14482_v50 = vld [vmem:[%s19275_s11] ss:$0 sm:$0xff] }
 0xe47   :  { %15756 = vmatmul.mubr.f32.vlgmr.msra.gmra.mrb[10].mxu1 %v5622_v51 }
 0xe48   :  { %16982 = vmatpush3.bf16.msra.mxu1 %v16979_v22  ;;  %15766 = vmatprep.mubr.f32.mxu1 %v5608_v44  ;;  %v18755_v22 = vpack.c.bf16 %v6141_v32, %v6138_v14 }
 0xe49   :  { %16984 = vmatprep.subr.bf16.mxu1 %v16983_v19 }
 0xe4c   :  { %16986 = vmatpush3.bf16.msra.mxu1 %v16983_v19 }
 0xe4d   :  { %16988 = vmatprep.subr.bf16.mxu1 %v16987_v21 }
 0xe4f   :  { %15767 = vmatmul.mubr.f32.vlgmr.msra.gmra.mrb[10].mxu1 %v5618_v42 }
 0xe50   :  { %16990 = vmatpush3.bf16.msra.mxu1 %v16987_v21  ;;  %15777 = vmatprep.mubr.f32.mxu1 %v5609_v45  ;;  %v6231_v21 = vsub.f32 %v6229_v16, %v6230_v18 }
 0xe51   :  { %16992 = vmatprep.subr.bf16.mxu1 %v16991_v25 }
 0xe52   :  { %v6232_v28 = vand.u32 4294901760, %v6231_v21  ;;  %v6667_v21 = vld [vmem:[%s19278_s14 + $0x30] sm:$0xff] }
 0xe54   :  { %16994 = vmatpush3.bf16.msra.mxu1 %v16991_v25  ;;  %v6236_v25 = vsub.f32 %v6116_v8, %v6138_v14 }
 0xe55   :  { %16996 = vmatprep.subr.bf16.mxu1 %v18701_v60 }
 0xe56   :  { %v6237_v29 = vand.u32 4294901760, %v6236_v25 }
 0xe57   :  { %15778 = vmatmul.mubr.f32.vlgmr.msra.gmra.mrb[10].mxu1 %v5619_v53 }
 0xe58   :  { %16998 = vmatpush3.bf16.msra.mxu1 %v18701_v60  ;;  %15788 = vmatprep.mubr.f32.mxu1 %v5610_v55  ;;  %v6238_v30 = vsub.f32 %v6236_v25, %v6237_v29 }
 0xe59   :  { %17000 = vmatprep.subr.bf16.mxu1 %v18711_v4 }
 0xe5a   :  { %v6239_v35 = vand.u32 4294901760, %v6238_v30 }
 0xe5c   :  { %17002 = vmatpush3.bf16.msra.mxu1 %v18711_v4 }
 0xe5d   :  { %17004 = vmatprep.subr.bf16.mxu1 %v17003_v26 }
 0xe5f   :  { %15789 = vmatmul.mubr.f32.vlgmr.msra.gmra.mrb[10].mxu1 %v5620_v46 }
 0xe60   :  { %17006 = vmatpush3.bf16.msra.mxu1 %v17003_v26  ;;  %15799 = vmatprep.mubr.f32.mxu1 %v5608_v44  ;;  %v6243_v26 = vsub.f32 %v6117_v13, %v6141_v32 }
 0xe61   :  { %17008 = vmatprep.subr.bf16.mxu1 %v17007_v27 }
 0xe62   :  { %v6244_v31 = vand.u32 4294901760, %v6243_v26  ;;  %v17039_v39 = vpack.c.bf16 %v6243_v26, %v6236_v25  ;;  %v6668_v25 = vld [vmem:[%s19278_s14 + $0x38] sm:$0xff] }
 0xe64   :  { %17010 = vmatpush3.bf16.msra.mxu1 %v17007_v27  ;;  %v6245_v34 = vsub.f32 %v6243_v26, %v6244_v31  ;;  %v17055_v41 = vpack.c.bf16 %v6244_v31, %v6237_v29  ;;  %v6702_v26 = vand.u32 4294901760, %v6667_v21 }
 0xe65   :  { %17012 = vmatprep.subr.bf16.mxu1 %v18701_v60 }
 0xe66   :  { %v6246_v36 = vand.u32 4294901760, %v6245_v34 }
 0xe67   :  { %15800 = vmatmul.mubr.f32.vlgmr.msra.gmra.mrb[10].mxu1 %v5618_v42 }
 0xe68   :  { %17014 = vmatpush3.bf16.msra.mxu1 %v18701_v60  ;;  %15810 = vmatprep.mubr.f32.mxu1 %v5608_v44  ;;  %v17031_v37 = vpack.c.bf16 %v6246_v36, %v6239_v35 }
 0xe69   :  { %17016 = vmatprep.subr.bf16.mxu1 %v18711_v4 }
 0xe6c   :  { %17018 = vmatpush3.bf16.msra.mxu1 %v18711_v4 }
 0xe6f   :  { %15811 = vmatmul.mubr.f32.vlgmr.msra.gmra.mrb[10].mxu1 %v5618_v42 }
 0xf42   :  { %v15812_v54 = vpop.f32.mrb[10].mxu1 }
 0xf43   :  { %v17651_v56 = vadd.f32 %v15812_v54, %v14480_v52  ;;  %v6057_v58 = vpop.f32.mrb[11].mxu1 }
 0xf44   :  { %v17652_v59 = vadd.f32 %v14480_v52, %v6057_v58 }
 0xf45   :  { %v6068_v57 = vadd.f32 %v17651_v56, %v18474_v10 }
 0xf46   :  { %v6067_v61 = vadd.f32 %v17652_v59, %v18476_v11  ;;  %v6114_v11 = vld [vmem:[%s19276_s12] sm:$0xff] }
 0xf47   :  { %v6074_v62 = vsel %vm725_vm1, %v6068_v57, 0.0  ;;  %v6132_v9 = vand.u32 4294901760, %v6114_v11 }
 0xf48   :  { %6075 = vadd.xlane.f32.xlu1 %v6074_v62  ;;  %v6071_v60 = vsel %vm725_vm1, %v6067_v61, 0.0 }
 0xf49   :  { %6072 = vadd.xlane.f32.xlu0 %v6071_v60  ;;  %v18753_v23 = vpack.c.bf16 %v6135_v12, %v6132_v9  ;;  %v6222_v15 = vsub.f32 %v6114_v11, %v6132_v9  ;;  %v6663_v9 = vld [vmem:[%s19278_s14 + $0x10] sm:$0xff]  ;;  %v6664_v12 = vld [vmem:[%s19278_s14 + $0x18] sm:$0xff] }
 0xf4a   :  { %v6690_v13 = vand.u32 4294901760, %v6663_v9  ;;  %v6693_v14 = vand.u32 4294901760, %v6664_v12 }
 0xf4b   :  { %17020 = vmatprep.subr.bf16.mxu0 %v18753_v23  ;;  %v6223_v17 = vand.u32 4294901760, %v6222_v15  ;;  %v17035_v38 = vpack.c.bf16 %v6229_v16, %v6222_v15 }
 0xf4c   :  { %17022 = vmatpush3.bf16.msra.mxu0 %v18753_v23  ;;  %v18799_v32 = vpack.c.bf16 %v6693_v14, %v6690_v13  ;;  %v6792_v34 = vsub.f32 %v6663_v9, %v6690_v13  ;;  %v6799_v35 = vsub.f32 %v6664_v12, %v6693_v14  ;;  %v14483_v9 = vld [vmem:[%s19277_s13] ss:$0 sm:$0xff] }
 0xf4d   :  { %17024 = vmatprep.subr.bf16.mxu0 %v18755_v22  ;;  %v6224_v19 = vsub.f32 %v6222_v15, %v6223_v17  ;;  %v17051_v40 = vpack.c.bf16 %v6230_v18, %v6223_v17 }
 0xf4f   :  { %v6225_v27 = vand.u32 4294901760, %v6224_v19 }
 0xf50   :  { %17026 = vmatpush3.bf16.msra.mxu0 %v18755_v22 }
 0xf51   :  { %v17027_v33 = vpack.c.bf16 %v6232_v28, %v6225_v27  ;;  %v6705_v27 = vand.u32 4294901760, %v6668_v25 }
 0xf53   :  { %17028 = vmatprep.subr.bf16.mxu0 %v17027_v33  ;;  %v18819_v31 = vpack.c.bf16 %v6705_v27, %v6702_v26 }
 0xfd5   :  { %v6076_v49 = vpop.xlane.xlu1 %6075 }
 0xfd6   :  { %v6079_v63 = vmul.f32 0.03125, %v6076_v49  ;;  %v6073_v0 = vpop.xlane.xlu0 %6072 }
 0xfd7   :  { %v6078_v1 = vmul.f32 0.03125, %v6073_v0 }
 0xfd8   :  { %v6081_v2 = vsub.f32 %v6068_v57, %v6079_v63 }
 0xfd9   :  { %v6080_v3 = vsub.f32 %v6067_v61, %v6078_v1 }
 0xfda   :  { %v6083_v6 = vmul.f32 %v6081_v2, %v6081_v2 }
 0xfdb   :  { %v6082_v4 = vmul.f32 %v6080_v3, %v6080_v3 }
 0xfdc   :  { %v6087_v10 = vsel %vm725_vm1, %v6083_v6, 0.0  ;;  %v6661_v6 = vld [vmem:[%s19278_s14] sm:$0xff] }
 0xfdd   :  { %v6084_v5 = vsel %vm725_vm1, %v6082_v4, 0.0  ;;  %v6684_v11 = vand.u32 4294901760, %v6661_v6 }
 0xfde   :  { %6085 = vadd.xlane.f32.xlu0 %v6084_v5 }
 0xfdf   :  { %v6778_v18 = vsub.f32 %v6661_v6, %v6684_v11 }
 0xfe1   :  { %v6779_v28 = vand.u32 4294901760, %v6778_v18 }
 0xfe2   :  { %6088 = vadd.xlane.f32.xlu0 %v6087_v10  ;;  %v6662_v10 = vld [vmem:[%s19278_s14 + $0x8] sm:$0xff] }
 0xfe3   :  { %v6687_v7 = vand.u32 4294901760, %v6662_v10 }
 0xfe5   :  { %v18789_v8 = vpack.c.bf16 %v6687_v7, %v6684_v11  ;;  %v6785_v19 = vsub.f32 %v6662_v10, %v6687_v7 }
 0xfe7   :  { %17068 = vmatprep.subr.bf16.mxu1 %v18789_v8  ;;  %v6786_v29 = vand.u32 4294901760, %v6785_v19 }
 0xfe8   :  { %17070 = vmatpush3.bf16.msra.mxu1 %v18789_v8 }
 0xfe9   :  { %17072 = vmatprep.subr.bf16.mxu1 %v18799_v32  ;;  %v6787_v30 = vsub.f32 %v6785_v19, %v6786_v29  ;;  %v17131_v6 = vpack.c.bf16 %v6786_v29, %v6779_v28 }
 0xfec   :  { %17074 = vmatpush3.bf16.msra.mxu1 %v18799_v32 }
0x106b   :  { %v6086_v42 = vpop.xlane.xlu0 %6085 }
0x106c   :  { %v6090_v43 = vmul.f32 0.03125, %v6086_v42 }
0x106e   :  { %v6092_v44 = vadd.f32 1e-05, %v6090_v43 }
0x106f   :  { %v6089_v53 = vpop.xlane.xlu0 %6088 }
0x1070   :  { %17981 = vrsqrt.f32 %v6092_v44  ;;  %v6091_v45 = vmul.f32 0.03125, %v6089_v53 }
0x1072   :  { %v6093_v46 = vadd.f32 1e-05, %v6091_v45 }
0x1074   :  { %17983 = vrsqrt.f32 %v6093_v46 }
0x107a   :  { %v17982_v55 = vpop.eup %17981 }
0x107b   :  { %v6096_v48 = vmul.f32 %v17982_v55, %v6080_v3 }
0x107d   :  { %v6104_v51 = vmul.f32 %v14481_v47, %v6096_v48 }
0x107e   :  { %v17984_v52 = vpop.eup %17983 }
0x107f   :  { %v6097_v54 = vmul.f32 %v17984_v52, %v6081_v2  ;;  %v18767_v56 = vadd.f32 %v14482_v50, %v6104_v51  ;;  %v6827_v51 = vsub.f32 %v6668_v25, %v6705_v27 }
0x1081   :  { %v6105_v58 = vmul.f32 %v14481_v47, %v6097_v54  ;;  %v6126_v59 = vsel %vm725_vm1, %v18767_v56, 0 }
0x1082   :  { %v6200_v57 = vand.u32 4294901760, %v6126_v59 }
0x1083   :  { %v18771_v61 = vadd.f32 %v14482_v50, %v6105_v58  ;;  %v6820_v50 = vsub.f32 %v6667_v21, %v6702_v26 }
0x1084   :  { %v6201_v62 = vsub.f32 %v6126_v59, %v6200_v57 }
0x1085   :  { %v6129_v60 = vsel %vm725_vm1, %v18771_v61, 0  ;;  %v6821_v59 = vand.u32 4294901760, %v6820_v50 }
0x1086   :  { %v6202_v49 = vand.u32 4294901760, %v6201_v62  ;;  %v6210_v63 = vand.u32 4294901760, %v6129_v60 }
0x1088   :  { %v6203_v0 = vsub.f32 %v6201_v62, %v6202_v49  ;;  %v6211_v1 = vsub.f32 %v6129_v60, %v6210_v63  ;;  %v6822_v60 = vsub.f32 %v6820_v50, %v6821_v59 }
0x108a   :  { %v6204_v3 = vand.u32 4294901760, %v6203_v0  ;;  %v6212_v4 = vand.u32 4294901760, %v6211_v1 }
0x108c   :  { %15821 = vmatprep.mubr.f32.mxu0 %v6204_v3  ;;  %v6213_v2 = vsub.f32 %v6211_v1, %v6212_v4  ;;  %v17099_v3 = vpack.c.bf16 %v6785_v19, %v6778_v18 }
0x108e   :  { %v6214_v5 = vand.u32 4294901760, %v6213_v2 }
0x1090   :  { %15822 = vmatmul.mubr.f32.vlgmr.msra.gmra.mrb[14].mxu0 %v6214_v5  ;;  %v17111_v5 = vpack.c.bf16 %v6827_v51, %v6820_v50 }
0x1091   :  { %17030 = vmatpush3.bf16.msra.mxu0 %v17027_v33  ;;  %15832 = vmatprep.mubr.f32.mxu0 %v6200_v57  ;;  %v6780_v33 = vsub.f32 %v6778_v18, %v6779_v28 }
0x1092   :  { %17032 = vmatprep.subr.bf16.mxu0 %v17031_v37 }
0x1093   :  { %v6781_v36 = vand.u32 4294901760, %v6780_v33 }
0x1095   :  { %17034 = vmatpush3.bf16.msra.mxu0 %v17031_v37  ;;  %v6788_v37 = vand.u32 4294901760, %v6787_v30 }
0x1096   :  { %17036 = vmatprep.subr.bf16.mxu0 %v17035_v38 }
0x1098   :  { %15833 = vmatmul.mubr.f32.vlgmr.msra.gmra.mrb[14].mxu0 %v6210_v63 }
0x1099   :  { %17038 = vmatpush3.bf16.msra.mxu0 %v17035_v38  ;;  %15843 = vmatprep.mubr.f32.mxu0 %v6201_v62  ;;  %v6793_v38 = vand.u32 4294901760, %v6792_v34 }
0x109a   :  { %17040 = vmatprep.subr.bf16.mxu0 %v17039_v39 }
0x109d   :  { %17042 = vmatpush3.bf16.msra.mxu0 %v17039_v39  ;;  %v6800_v39 = vand.u32 4294901760, %v6799_v35 }
0x109e   :  { %17044 = vmatprep.subr.bf16.mxu0 %v18753_v23 }
0x109f   :  { %v6801_v44 = vsub.f32 %v6799_v35, %v6800_v39  ;;  %v17135_v10 = vpack.c.bf16 %v6800_v39, %v6793_v38 }
0x10a0   :  { %15844 = vmatmul.mubr.f32.vlgmr.msra.gmra.mrb[14].mxu0 %v6211_v1 }
0x10a1   :  { %17046 = vmatpush3.bf16.msra.mxu0 %v18753_v23  ;;  %15854 = vmatprep.mubr.f32.mxu0 %v6202_v49  ;;  %v6802_v55 = vand.u32 4294901760, %v6801_v44 }
0x10a2   :  { %17048 = vmatprep.subr.bf16.mxu0 %v18755_v22 }
0x10a5   :  { %17050 = vmatpush3.bf16.msra.mxu0 %v18755_v22 }
0x10a6   :  { %17052 = vmatprep.subr.bf16.mxu0 %v17051_v40 }
0x10a8   :  { %15855 = vmatmul.mubr.f32.vlgmr.msra.gmra.mrb[14].mxu0 %v6212_v4  ;;  %v17103_v4 = vpack.c.bf16 %v6799_v35, %v6792_v34  ;;  %v14484_v35 = vld [vmem:[%s19279_s15] ss:$0 sm:$0xff] }
0x10a9   :  { %17054 = vmatpush3.bf16.msra.mxu0 %v17051_v40  ;;  %15865 = vmatprep.mubr.f32.mxu0 %v6200_v57  ;;  %v17083_v40 = vpack.c.bf16 %v6788_v37, %v6781_v36 }
0x10aa   :  { %17056 = vmatprep.subr.bf16.mxu0 %v17055_v41 }
0x10ad   :  { %17058 = vmatpush3.bf16.msra.mxu0 %v17055_v41  ;;  %v6794_v41 = vsub.f32 %v6792_v34, %v6793_v38 }
0x10ae   :  { %17060 = vmatprep.subr.bf16.mxu0 %v18753_v23 }
0x10af   :  { %v6795_v53 = vand.u32 4294901760, %v6794_v41 }
0x10b0   :  { %15866 = vmatmul.mubr.f32.vlgmr.msra.gmra.mrb[14].mxu0 %v6210_v63 }
0x10b1   :  { %17062 = vmatpush3.bf16.msra.mxu0 %v18753_v23  ;;  %15876 = vmatprep.mubr.f32.mxu0 %v6200_v57  ;;  %v6665_v23 = vld [vmem:[%s19278_s14 + $0x20] sm:$0xff]  ;;  %v17087_v52 = vpack.c.bf16 %v6802_v55, %v6795_v53  ;;  %v6828_v57 = vand.u32 4294901760, %v6827_v51 }
0x10b2   :  { %17064 = vmatprep.subr.bf16.mxu0 %v18755_v22  ;;  %v6696_v15 = vand.u32 4294901760, %v6665_v23 }
0x10b3   :  { %v6829_v49 = vsub.f32 %v6827_v51, %v6828_v57  ;;  %v17143_v7 = vpack.c.bf16 %v6828_v57, %v6821_v59 }
0x10b4   :  { %v6806_v42 = vsub.f32 %v6665_v23, %v6696_v15 }
0x10b5   :  { %17066 = vmatpush3.bf16.msra.mxu0 %v18755_v22  ;;  %v6666_v22 = vld [vmem:[%s19278_s14 + $0x28] sm:$0xff]  ;;  %v6830_v0 = vand.u32 4294901760, %v6829_v49 }
0x10b6   :  { %v6699_v16 = vand.u32 4294901760, %v6666_v22  ;;  %v6807_v45 = vand.u32 4294901760, %v6806_v42 }
0x10b8   :  { %15877 = vmatmul.mubr.f32.vlgmr.msra.gmra.mrb[14].mxu0 %v6210_v63  ;;  %v18809_v17 = vpack.c.bf16 %v6699_v16, %v6696_v15  ;;  %v6813_v43 = vsub.f32 %v6666_v22, %v6699_v16  ;;  %v6808_v47 = vsub.f32 %v6806_v42, %v6807_v45  ;;  %v6823_v63 = vand.u32 4294901760, %v6822_v60 }
0x10ba   :  { %17076 = vmatprep.subr.bf16.mxu1 %v18809_v17  ;;  %v6814_v46 = vand.u32 4294901760, %v6813_v43  ;;  %v6809_v54 = vand.u32 4294901760, %v6808_v47  ;;  %v17095_v1 = vpack.c.bf16 %v6830_v0, %v6823_v63  ;;  %v17107_v2 = vpack.c.bf16 %v6813_v43, %v6806_v42  ;;  %v14488_v47 = vld [vmem:[%s19270_s6 + $0x28] sm:$0xff] }
0x10bb   :  { %17078 = vmatpush3.bf16.msra.mxu1 %v18809_v17  ;;  %v7332_v51 = vand.u32 4294901760, %v14488_v47 }
0x10bc   :  { %17080 = vmatprep.subr.bf16.mxu1 %v18819_v31  ;;  %v6815_v48 = vsub.f32 %v6813_v43, %v6814_v46  ;;  %v17139_v11 = vpack.c.bf16 %v6814_v46, %v6807_v45 }
0x10bd   :  { %v7426_v60 = vsub.f32 %v14488_v47, %v7332_v51 }
0x10be   :  { %v6816_v58 = vand.u32 4294901760, %v6815_v48  ;;  %v14489_v48 = vld [vmem:[%s19270_s6 + $0x30] sm:$0xff] }
0x10bf   :  { %17082 = vmatpush3.bf16.msra.mxu1 %v18819_v31  ;;  %v7427_v63 = vand.u32 4294901760, %v7426_v60 }
0x10c0   :  { %17084 = vmatprep.subr.bf16.mxu1 %v17083_v40  ;;  %v17091_v62 = vpack.c.bf16 %v6816_v58, %v6809_v54  ;;  %v7335_v54 = vand.u32 4294901760, %v14489_v48 }
0x118b   :  { %v15878_v12 = vpop.f32.mrb[14].mxu0 }
0x118c   :  { %v17653_v13 = vadd.f32 %v15878_v12, %v14483_v9  ;;  %v6649_v14 = vpop.f32.mrb[15].mxu0 }
0x118d   :  { %v17654_v23 = vadd.f32 %v14483_v9, %v6649_v14 }
0x118e   :  { %v6660_v22 = vmax.f32 %v17653_v13, 0.0 }
0x118f   :  { %v6659_v15 = vmax.f32 %v17654_v23, 0.0 }
0x1190   :  { %v6681_v16 = vsel %vm6676_vm11, %v6660_v22, 0 }
0x1191   :  { %v6766_v18 = vand.u32 4294901760, %v6681_v16  ;;  %v6678_v19 = vsel %vm6676_vm11, %v6659_v15, 0 }
0x1192   :  { %v6756_v21 = vand.u32 4294901760, %v6678_v19 }
0x1193   :  { %v6767_v25 = vsub.f32 %v6681_v16, %v6766_v18 }
0x1194   :  { %v6757_v26 = vsub.f32 %v6678_v19, %v6756_v21 }
0x1195   :  { %v6768_v27 = vand.u32 4294901760, %v6767_v25 }
0x1196   :  { %v6758_v28 = vand.u32 4294901760, %v6757_v26 }
0x1197   :  { %v6769_v29 = vsub.f32 %v6767_v25, %v6768_v27 }
0x1198   :  { %v6759_v33 = vsub.f32 %v6757_v26, %v6758_v28 }
0x1199   :  { %v6770_v34 = vand.u32 4294901760, %v6769_v29  ;;  %v14485_v29 = vld [vmem:[%s19280_s16] ss:$0 sm:$0xff] }
0x119a   :  { %v6760_v30 = vand.u32 4294901760, %v6759_v33 }
0x119c   :  { %15895 = vmatprep.mubr.f32.mxu1 %v6760_v30 }
0x119d   :  { %15896 = vmatmul.mubr.f32.vlgmr.msra.gmra.mrb[12].mxu1 %v6770_v34 }
0x119e   :  { %17086 = vmatpush3.bf16.msra.mxu1 %v17083_v40  ;;  %15914 = vmatprep.mubr.f32.mxu1 %v6756_v21 }
0x119f   :  { %17088 = vmatprep.subr.bf16.mxu1 %v17087_v52 }
0x11a2   :  { %17090 = vmatpush3.bf16.msra.mxu1 %v17087_v52  ;;  %v14490_v52 = vld [vmem:[%s19270_s6 + $0x38] sm:$0xff] }
0x11a3   :  { %17092 = vmatprep.subr.bf16.mxu1 %v17091_v62  ;;  %v7338_v58 = vand.u32 4294901760, %v14490_v52 }
0x11a5   :  { %v18867_v57 = vpack.c.bf16 %v7338_v58, %v7335_v54 }
0x11a6   :  { %17094 = vmatpush3.bf16.msra.mxu1 %v17091_v62 }
0x11a7   :  { %17096 = vmatprep.subr.bf16.mxu1 %v17095_v1 }
0x11aa   :  { %17098 = vmatpush3.bf16.msra.mxu1 %v17095_v1  ;;  %v7428_v1 = vsub.f32 %v7426_v60, %v7427_v63 }
0x11ab   :  { %17100 = vmatprep.subr.bf16.mxu1 %v17099_v3 }
0x11ad   :  { %15915 = vmatmul.mubr.f32.vlgmr.msra.gmra.mrb[12].mxu1 %v6766_v18 }
0x11ae   :  { %17102 = vmatpush3.bf16.msra.mxu1 %v17099_v3  ;;  %15933 = vmatprep.mubr.f32.mxu1 %v6757_v26  ;;  %v7433_v3 = vsub.f32 %v14489_v48, %v7335_v54 }
0x11af   :  { %17104 = vmatprep.subr.bf16.mxu1 %v17103_v4 }
0x11b2   :  { %17106 = vmatpush3.bf16.msra.mxu1 %v17103_v4  ;;  %v7440_v4 = vsub.f32 %v14490_v52, %v7338_v58 }
0x11b3   :  { %17108 = vmatprep.subr.bf16.mxu1 %v17107_v2 }
0x11b4   :  { %v17183_v22 = vpack.c.bf16 %v7440_v4, %v7433_v3 }
0x11b6   :  { %17110 = vmatpush3.bf16.msra.mxu1 %v17107_v2 }
0x11b7   :  { %17112 = vmatprep.subr.bf16.mxu1 %v17111_v5 }
0x11ba   :  { %17114 = vmatpush3.bf16.msra.mxu1 %v17111_v5  ;;  %v7429_v5 = vand.u32 4294901760, %v7428_v1 }
0x11bb   :  { %17116 = vmatprep.subr.bf16.mxu1 %v18789_v8 }
0x11bd   :  { %15934 = vmatmul.mubr.f32.vlgmr.msra.gmra.mrb[12].mxu1 %v6767_v25 }
0x11be   :  { %17118 = vmatpush3.bf16.msra.mxu1 %v18789_v8  ;;  %15952 = vmatprep.mubr.f32.mxu1 %v6758_v28 }
0x11bf   :  { %17120 = vmatprep.subr.bf16.mxu1 %v18799_v32 }
0x11c2   :  { %17122 = vmatpush3.bf16.msra.mxu1 %v18799_v32 }
0x11c3   :  { %17124 = vmatprep.subr.bf16.mxu1 %v18809_v17 }
0x11c6   :  { %17126 = vmatpush3.bf16.msra.mxu1 %v18809_v17 }
0x11c7   :  { %17128 = vmatprep.subr.bf16.mxu1 %v18819_v31 }
0x11ca   :  { %17130 = vmatpush3.bf16.msra.mxu1 %v18819_v31 }
0x11cb   :  { %17132 = vmatprep.subr.bf16.mxu1 %v17131_v6 }
0x11cd   :  { %15953 = vmatmul.mubr.f32.vlgmr.msra.gmra.mrb[12].mxu1 %v6768_v27 }
0x11ce   :  { %17134 = vmatpush3.bf16.msra.mxu1 %v17131_v6  ;;  %15971 = vmatprep.mubr.f32.mxu1 %v6756_v21  ;;  %v7434_v6 = vand.u32 4294901760, %v7433_v3 }
0x11cf   :  { %17136 = vmatprep.subr.bf16.mxu1 %v17135_v10 }
0x11d2   :  { %17138 = vmatpush3.bf16.msra.mxu1 %v17135_v10  ;;  %v7441_v10 = vand.u32 4294901760, %v7440_v4 }
0x11d3   :  { %17140 = vmatprep.subr.bf16.mxu1 %v17139_v11 }
0x11d4   :  { %v7442_v9 = vsub.f32 %v7440_v4, %v7441_v10  ;;  %v17199_v16 = vpack.c.bf16 %v7441_v10, %v7434_v6 }
0x11d6   :  { %17142 = vmatpush3.bf16.msra.mxu1 %v17139_v11  ;;  %v7443_v13 = vand.u32 4294901760, %v7442_v9 }
0x11d7   :  { %17144 = vmatprep.subr.bf16.mxu1 %v17143_v7 }
0x11da   :  { %17146 = vmatpush3.bf16.msra.mxu1 %v17143_v7  ;;  %v7435_v7 = vsub.f32 %v7433_v3, %v7434_v6 }
0x11db   :  { %17148 = vmatprep.subr.bf16.mxu1 %v18789_v8 }
0x11dc   :  { %v7436_v12 = vand.u32 4294901760, %v7435_v7 }
0x11dd   :  { %15972 = vmatmul.mubr.f32.vlgmr.msra.gmra.mrb[12].mxu1 %v6766_v18 }
0x11de   :  { %17150 = vmatpush3.bf16.msra.mxu1 %v18789_v8  ;;  %15990 = vmatprep.mubr.f32.mxu1 %v6756_v21  ;;  %v17175_v14 = vpack.c.bf16 %v7443_v13, %v7436_v12 }
0x11df   :  { %17152 = vmatprep.subr.bf16.mxu1 %v18799_v32 }
0x11e2   :  { %17154 = vmatpush3.bf16.msra.mxu1 %v18799_v32 }
0x11e3   :  { %17156 = vmatprep.subr.bf16.mxu1 %v18809_v17 }
0x11e6   :  { %17158 = vmatpush3.bf16.msra.mxu1 %v18809_v17 }
0x11e7   :  { %17160 = vmatprep.subr.bf16.mxu1 %v18819_v31 }
0x11ea   :  { %17162 = vmatpush3.bf16.msra.mxu1 %v18819_v31 }
0x11ed   :  { %15991 = vmatmul.mubr.f32.vlgmr.msra.gmra.mrb[12].mxu1 %v6766_v18 }
0x12c0   :  { %v15992_v36 = vpop.f32.mrb[12].mxu1 }
0x12c1   :  { %v17655_v8 = vadd.f32 %v15992_v36, %v14484_v35  ;;  %v7253_v37 = vpop.f32.mrb[13].mxu1 }
0x12c2   :  { %v17656_v38 = vadd.f32 %v14484_v35, %v7253_v37  ;;  %v14486_v35 = vld [vmem:[%s19281_s17] ss:$0 sm:$0xff] }
0x12c3   :  { %v7264_v39 = vadd.f32 %v17655_v8, %v18771_v61 }
0x12c4   :  { %v7263_v32 = vadd.f32 %v17656_v38, %v18767_v56  ;;  %v14487_v56 = vld [vmem:[%s19270_s6 + $0x20] sm:$0xff] }
0x12c5   :  { %v7270_v40 = vsel %vm725_vm1, %v7264_v39, 0.0  ;;  %v7329_v50 = vand.u32 4294901760, %v14487_v56 }
0x12c6   :  { %7271 = vadd.xlane.f32.xlu0 %v7270_v40  ;;  %v7267_v17 = vsel %vm725_vm1, %v7263_v32, 0.0 }
0x12c7   :  { %7268 = vadd.xlane.f32.xlu1 %v7267_v17  ;;  %v18865_v59 = vpack.c.bf16 %v7332_v51, %v7329_v50  ;;  %v7419_v62 = vsub.f32 %v14487_v56, %v7329_v50 }
0x12c9   :  { %17164 = vmatprep.subr.bf16.mxu0 %v18865_v59  ;;  %v7420_v49 = vand.u32 4294901760, %v7419_v62  ;;  %v17179_v23 = vpack.c.bf16 %v7426_v60, %v7419_v62 }
0x12ca   :  { %17166 = vmatpush3.bf16.msra.mxu0 %v18865_v59 }
0x12cb   :  { %17168 = vmatprep.subr.bf16.mxu0 %v18867_v57  ;;  %v7421_v0 = vsub.f32 %v7419_v62, %v7420_v49  ;;  %v17195_v15 = vpack.c.bf16 %v7427_v63, %v7420_v49 }
0x12cd   :  { %v7422_v2 = vand.u32 4294901760, %v7421_v0 }
0x12ce   :  { %17170 = vmatpush3.bf16.msra.mxu0 %v18867_v57 }
0x12cf   :  { %v17171_v11 = vpack.c.bf16 %v7429_v5, %v7422_v2 }
0x12d1   :  { %17172 = vmatprep.subr.bf16.mxu0 %v17171_v11 }
0x1353   :  { %v7272_v31 = vpop.xlane.xlu0 %7271 }
0x1354   :  { %v7274_v41 = vmul.f32 0.03125, %v7272_v31  ;;  %v7269_v42 = vpop.xlane.xlu1 %7268 }
0x1355   :  { %v7273_v43 = vmul.f32 0.03125, %v7269_v42 }
0x1356   :  { %v7276_v44 = vsub.f32 %v7264_v39, %v7274_v41 }
0x1357   :  { %v7275_v53 = vsub.f32 %v7263_v32, %v7273_v43 }
0x1358   :  { %v7278_v45 = vmul.f32 %v7276_v44, %v7276_v44 }
0x1359   :  { %v7277_v46 = vmul.f32 %v7275_v53, %v7275_v53 }
0x135a   :  { %v7282_v55 = vsel %vm725_vm1, %v7278_v45, 0.0 }
0x135b   :  { %7283 = vadd.xlane.f32.xlu0 %v7282_v55  ;;  %v7279_v61 = vsel %vm725_vm1, %v7277_v46, 0.0  ;;  %v14492_v55 = vld [vmem:[%s19271_s7 + $0x1] ss:$0 sm:$0xff]  ;;  %s19317_s7 = smov 104  }
0x135c   :  { %7280 = vadd.xlane.f32.xlu1 %v7279_v61 }
0x13e8   :  { %v7284_v18 = vpop.xlane.xlu0 %7283 }
0x13e9   :  { %v7286_v19 = vmul.f32 0.03125, %v7284_v18  ;;  %v7281_v21 = vpop.xlane.xlu1 %7280 }
0x13ea   :  { %v7285_v25 = vmul.f32 0.03125, %v7281_v21 }
0x13eb   :  { %v7288_v26 = vadd.f32 1e-05, %v7286_v19 }
0x13ec   :  { %v7287_v27 = vadd.f32 1e-05, %v7285_v25 }
0x13ed   :  { %17985 = vrsqrt.f32 %v7288_v26 }
0x13ee   :  { %17987 = vrsqrt.f32 %v7287_v27 }
0x13f7   :  { %v17986_v28 = vpop.eup %17985 }
0x13f8   :  { %v17988_v33 = vpop.eup %17987  ;;  %v7292_v30 = vmul.f32 %v17986_v28, %v7276_v44 }
0x13f9   :  { %v7291_v34 = vmul.f32 %v17988_v33, %v7275_v53 }
0x13fa   :  { %v7300_v36 = vmul.f32 %v14485_v29, %v7292_v30 }
0x13fb   :  { %v7299_v8 = vmul.f32 %v14485_v29, %v7291_v34 }
0x13fc   :  { %v18879_v37 = vadd.f32 %v14486_v35, %v7300_v36 }
0x13fd   :  { %v18881_v38 = vadd.f32 %v14486_v35, %v7299_v8 }
0x13fe   :  { %v7326_v39 = vsel %vm725_vm1, %v18879_v37, 0 }
0x13ff   :  { %v7323_v32 = vsel %vm725_vm1, %v18881_v38, 0  ;;  %v7407_v40 = vand.u32 4294901760, %v7326_v39 }
0x1400   :  { %v7397_v17 = vand.u32 4294901760, %v7323_v32 }
0x1401   :  { %v7408_v31 = vsub.f32 %v7326_v39, %v7407_v40 }
0x1402   :  { %v7398_v41 = vsub.f32 %v7323_v32, %v7397_v17 }
0x1403   :  { %v7409_v42 = vand.u32 4294901760, %v7408_v31 }
0x1404   :  { %v7399_v43 = vand.u32 4294901760, %v7398_v41 }
0x1405   :  { %v7410_v44 = vsub.f32 %v7408_v31, %v7409_v42 }
0x1406   :  { %v7400_v53 = vsub.f32 %v7398_v41, %v7399_v43 }
0x1407   :  { %v7411_v46 = vand.u32 4294901760, %v7410_v44 }
0x1408   :  { %v7401_v45 = vand.u32 4294901760, %v7400_v53 }
0x140a   :  { %16001 = vmatprep.mubr.f32.mxu0 %v7401_v45 }
0x140b   :  { %16002 = vmatmul.mubr.f32.vlgmr.msra.gmra.mrb[16].mxu0 %v7411_v46 }
0x140c   :  { %17174 = vmatpush3.bf16.msra.mxu0 %v17171_v11  ;;  %16012 = vmatprep.mubr.f32.mxu0 %v7397_v17 }
0x140d   :  { %17176 = vmatprep.subr.bf16.mxu0 %v17175_v14 }
0x1410   :  { %17178 = vmatpush3.bf16.msra.mxu0 %v17175_v14 }
0x1411   :  { %17180 = vmatprep.subr.bf16.mxu0 %v17179_v23 }
0x1413   :  { %16013 = vmatmul.mubr.f32.vlgmr.msra.gmra.mrb[16].mxu0 %v7407_v40 }
0x1414   :  { %17182 = vmatpush3.bf16.msra.mxu0 %v17179_v23  ;;  %16023 = vmatprep.mubr.f32.mxu0 %v7398_v41 }
0x1415   :  { %17184 = vmatprep.subr.bf16.mxu0 %v17183_v22 }
0x1418   :  { %17186 = vmatpush3.bf16.msra.mxu0 %v17183_v22 }
0x1419   :  { %17188 = vmatprep.subr.bf16.mxu0 %v18865_v59 }
0x141b   :  { %16024 = vmatmul.mubr.f32.vlgmr.msra.gmra.mrb[16].mxu0 %v7408_v31 }
0x141c   :  { %17190 = vmatpush3.bf16.msra.mxu0 %v18865_v59  ;;  %16034 = vmatprep.mubr.f32.mxu0 %v7399_v43 }
0x141d   :  { %17192 = vmatprep.subr.bf16.mxu0 %v18867_v57 }
0x1420   :  { %17194 = vmatpush3.bf16.msra.mxu0 %v18867_v57 }
0x1421   :  { %17196 = vmatprep.subr.bf16.mxu0 %v17195_v15 }
0x1423   :  { %16035 = vmatmul.mubr.f32.vlgmr.msra.gmra.mrb[16].mxu0 %v7409_v42 }
0x1424   :  { %17198 = vmatpush3.bf16.msra.mxu0 %v17195_v15  ;;  %16045 = vmatprep.mubr.f32.mxu0 %v7397_v17 }
0x1425   :  { %17200 = vmatprep.subr.bf16.mxu0 %v17199_v16 }
0x1428   :  { %17202 = vmatpush3.bf16.msra.mxu0 %v17199_v16 }
0x1429   :  { %17204 = vmatprep.subr.bf16.mxu0 %v18865_v59 }
0x142b   :  { %16046 = vmatmul.mubr.f32.vlgmr.msra.gmra.mrb[16].mxu0 %v7407_v40 }
0x142c   :  { %17206 = vmatpush3.bf16.msra.mxu0 %v18865_v59  ;;  %16056 = vmatprep.mubr.f32.mxu0 %v7397_v17 }
0x142d   :  { %17208 = vmatprep.subr.bf16.mxu0 %v18867_v57 }
0x1430   :  { %17210 = vmatpush3.bf16.msra.mxu0 %v18867_v57 }
0x1433   :  { %16057 = vmatmul.mubr.f32.vlgmr.msra.gmra.mrb[16].mxu0 %v7407_v40 }
0x1506   :  { %v16058_v61 = vpop.f32.mrb[16].mxu0 }
0x1507   :  { %v18898_v56 = vadd.f32 %v16058_v61, %v14492_v55  ;;  %v7846_v47 = vpop.f32.mrb[17].mxu0 }
0x1508   :  { %v18900_v48 = vadd.f32 %v14492_v55, %v7846_v47 }
0x1509   :  { %7860 = vrot.lane.b32.xlu0 %v18898_v56, %s18226_s2  ;;  %v7864_v57 = vsel %vm1266_vm2, %v18898_v56, 0 }
0x150a   :  { %7858 = vrot.lane.b32.xlu1 %v18900_v48, %s18226_s2  ;;  %v7862_v50 = vsel %vm1266_vm2, %v18900_v48, 0  ;;  %v18921_v62 = vand.u32 4294901760, %v7864_v57  ;;  %s19318_s2 = smov 40  }
0x150b   :  { %v18908_v51 = vand.u32 4294901760, %v7862_v50 }
0x150c   :  { %v7948_v0 = vsub.f32 %v7864_v57, %v18921_v62 }
0x150d   :  { %8912 = vrot.lane.b32.xlu0 %v18900_v48, %s18230_s0  ;;  %v7938_v52 = vsub.f32 %v7862_v50, %v18908_v51 }
0x150e   :  { %8918 = vrot.lane.b32.xlu1 %v18898_v56, %s18231_s19  ;;  %v7949_v10 = vand.u32 4294901760, %v7948_v0 }
0x150f   :  { %v7939_v54 = vand.u32 4294901760, %v7938_v52 }
0x1510   :  { %v7950_v13 = vsub.f32 %v7948_v0, %v7949_v10 }
0x1511   :  { %v7940_v58 = vsub.f32 %v7938_v52, %v7939_v54 }
0x1512   :  { %8916 = vrot.lane.b32.xlu1 %v18900_v48, %s18231_s19  ;;  %v7951_v22 = vand.u32 4294901760, %v7950_v13 }
0x1513   :  { %v7941_v59 = vand.u32 4294901760, %v7940_v58 }
0x1515   :  { %16063 = vmatprep.mubr.f32.mxu0 %v7941_v59 }
0x1516   :  { %8914 = vrot.lane.b32.xlu1 %v18898_v56, %s18230_s0 }
0x157b   :  { %v7861_v60 = vpop.permute.xlu0 %7860 }
0x157c   :  { %v7868_v49 = vsel %vm1266_vm2, %v7861_v60, 0  ;;  %v7859_v63 = vpop.permute.xlu1 %7858 }
0x157d   :  { %v7874_v1 = vand.u32 4294901760, %v7868_v49  ;;  %v7866_v3 = vsel %vm1266_vm2, %v7859_v63, 0 }
0x157e   :  { %v7871_v4 = vand.u32 4294901760, %v7866_v3 }
0x157f   :  { %v7966_v2 = vsub.f32 %v7868_v49, %v7874_v1  ;;  %v8913_v25 = vpop.permute.xlu0 %8912 }
0x1580   :  { %v17211_v5 = vpack.c.bf16 %v7874_v1, %v7871_v4  ;;  %v7959_v6 = vsub.f32 %v7866_v3, %v7871_v4  ;;  %v8919_v18 = vpop.permute.xlu1 %8918  ;;  %v8920_v28 = vsel %vm1266_vm2, %v8913_v25, 0 }
0x1581   :  { %v7967_v11 = vand.u32 4294901760, %v7966_v2  ;;  %v8926_v27 = vsel %vm1266_vm2, %v8919_v18, 0  ;;  %v8995_v30 = vand.u32 4294901760, %v8920_v28 }
0x1582   :  { %v7960_v7 = vand.u32 4294901760, %v7959_v6  ;;  %17212 = vmatprep.subr.bf16.mxu0 %v17211_v5  ;;  %v17219_v16 = vpack.c.bf16 %v7966_v2, %v7959_v6  ;;  %v8932_v33 = vand.u32 4294901760, %v8926_v27 }
0x1583   :  { %v7968_v9 = vsub.f32 %v7966_v2, %v7967_v11  ;;  %17214 = vmatpush3.bf16.xpose.msra.mxu0 %v17211_v5  ;;  %v8996_v8 = vsub.f32 %v8920_v28, %v8995_v30 }
0x1584   :  { %v7961_v12 = vsub.f32 %v7959_v6, %v7960_v7  ;;  %v8917_v19 = vpop.permute.xlu1 %8916  ;;  %v17227_v21 = vpack.c.bf16 %v7967_v11, %v7960_v7  ;;  %v9024_v36 = vsub.f32 %v8926_v27, %v8932_v33 }
0x1585   :  { %v7969_v14 = vand.u32 4294901760, %v7968_v9  ;;  %v8924_v26 = vsel %vm1266_vm2, %v8917_v19, 0  ;;  %v8997_v31 = vand.u32 4294901760, %v8996_v8 }
0x1586   :  { %v7962_v23 = vand.u32 4294901760, %v7961_v12  ;;  %v8929_v29 = vand.u32 4294901760, %v8924_v26  ;;  %v9025_v40 = vand.u32 4294901760, %v9024_v36 }
0x1587   :  { %v8998_v53 = vsub.f32 %v8996_v8, %v8997_v31 }
0x1588   :  { %v17215_v15 = vpack.c.bf16 %v7969_v14, %v7962_v23  ;;  %v9017_v34 = vsub.f32 %v8924_v26, %v8929_v29  ;;  %v8915_v35 = vpop.permute.xlu1 %8914  ;;  %v17259_v41 = vpack.c.bf16 %v8932_v33, %v8929_v29  ;;  %v9026_v43 = vsub.f32 %v9024_v36, %v9025_v40 }
0x1589   :  { %v8922_v39 = vsel %vm1266_vm2, %v8915_v35, 0  ;;  %v8999_v61 = vand.u32 4294901760, %v8998_v53 }
0x158a   :  { %16064 = vmatmul.mubr.f32.vlgmr.msra.gmra.mrb[18].mxu0 %v7951_v22  ;;  %17216 = vmatprep.subr.bf16.mxu0 %v17215_v15  ;;  %v9018_v32 = vand.u32 4294901760, %v9017_v34  ;;  %v9005_v17 = vand.u32 4294901760, %v8922_v39  ;;  %v9027_v55 = vand.u32 4294901760, %v9026_v43 }
0x158b   :  { %17218 = vmatpush3.bf16.xpose.msra.mxu0 %v17215_v15  ;;  %16070 = vmatprep.mubr.f32.mxu0 %v18908_v51 }
0x158c   :  { %17220 = vmatprep.subr.bf16.mxu0 %v17219_v16  ;;  %v9019_v42 = vsub.f32 %v9017_v34, %v9018_v32  ;;  %v9006_v44 = vsub.f32 %v8922_v39, %v9005_v17 }
0x158e   :  { %v9020_v45 = vand.u32 4294901760, %v9019_v42  ;;  %v9007_v46 = vand.u32 4294901760, %v9006_v44 }
0x1590   :  { %v17263_v47 = vpack.c.bf16 %v9027_v55, %v9020_v45  ;;  %v9008_v50 = vsub.f32 %v9006_v44, %v9007_v46 }
0x1592   :  { %16071 = vmatmul.mubr.f32.vlgmr.msra.gmra.mrb[18].mxu0 %v18921_v62 }
0x1593   :  { %17222 = vmatpush3.bf16.xpose.msra.mxu0 %v17219_v16  ;;  %16077 = vmatprep.mubr.f32.mxu0 %v7938_v52  ;;  %v9009_v52 = vand.u32 4294901760, %v9008_v50 }
0x1594   :  { %17224 = vmatprep.subr.bf16.mxu0 %v17211_v5 }
0x159a   :  { %16078 = vmatmul.mubr.f32.vlgmr.msra.gmra.mrb[18].mxu0 %v7948_v0 }
0x159b   :  { %17226 = vmatpush3.bf16.xpose.msra.mxu0 %v17211_v5  ;;  %16084 = vmatprep.mubr.f32.mxu0 %v7939_v54  ;;  %v17267_v54 = vpack.c.bf16 %v9024_v36, %v9017_v34 }
0x159c   :  { %17228 = vmatprep.subr.bf16.mxu0 %v17227_v21 }
0x15a2   :  { %16085 = vmatmul.mubr.f32.vlgmr.msra.gmra.mrb[18].mxu0 %v7949_v10 }
0x15a3   :  { %17230 = vmatpush3.bf16.xpose.msra.mxu0 %v17227_v21  ;;  %16091 = vmatprep.mubr.f32.mxu0 %v18908_v51 }
0x15a4   :  { %17232 = vmatprep.subr.bf16.mxu0 %v17211_v5 }
0x15aa   :  { %16092 = vmatmul.mubr.f32.vlgmr.msra.gmra.mrb[18].mxu0 %v18921_v62 }
0x15ab   :  { %17234 = vmatpush3.bf16.xpose.msra.mxu0 %v17211_v5  ;;  %16098 = vmatprep.mubr.f32.mxu0 %v18908_v51  ;;  %v17275_v51 = vpack.c.bf16 %v9025_v40, %v9018_v32 }
0x15ac   :  { %17260 = vmatprep.subr.bf16.mxu0 %v17259_v41 }
0x15b2   :  { %16099 = vmatmul.mubr.f32.vlgmr.msra.gmra.mrb[18].mxu0 %v18921_v62 }
0x15b3   :  { %17262 = vmatpush3.bf16.xpose.msra.mxu0 %v17259_v41  ;;  %16147 = vmatprep.mubr.f32.mxu0 %v8999_v61 }
0x15b4   :  { %17264 = vmatprep.subr.bf16.mxu0 %v17263_v47 }
0x15ba   :  { %16148 = vmatmul.mubr.f32.vlgmr.msra.gmra.mrb[20].mxu0 %v9009_v52 }
0x15bb   :  { %17266 = vmatpush3.bf16.xpose.msra.mxu0 %v17263_v47  ;;  %16154 = vmatprep.mubr.f32.mxu0 %v8995_v30 }
0x15bc   :  { %17268 = vmatprep.subr.bf16.mxu0 %v17267_v54 }
0x15c2   :  { %16155 = vmatmul.mubr.f32.vlgmr.msra.gmra.mrb[20].mxu0 %v9005_v17 }
0x15c3   :  { %17270 = vmatpush3.bf16.xpose.msra.mxu0 %v17267_v54  ;;  %16161 = vmatprep.mubr.f32.mxu0 %v8996_v8 }
0x15c4   :  { %17272 = vmatprep.subr.bf16.mxu0 %v17259_v41 }
0x15ca   :  { %16162 = vmatmul.mubr.f32.vlgmr.msra.gmra.mrb[20].mxu0 %v9006_v44 }
0x15cb   :  { %17274 = vmatpush3.bf16.xpose.msra.mxu0 %v17259_v41  ;;  %16168 = vmatprep.mubr.f32.mxu0 %v8997_v31 }
0x15cc   :  { %17276 = vmatprep.subr.bf16.mxu0 %v17275_v51 }
0x15d2   :  { %16169 = vmatmul.mubr.f32.vlgmr.msra.gmra.mrb[20].mxu0 %v9007_v46 }
0x15d3   :  { %17278 = vmatpush3.bf16.xpose.msra.mxu0 %v17275_v51  ;;  %16175 = vmatprep.mubr.f32.mxu0 %v8995_v30 }
0x15d4   :  { %17280 = vmatprep.subr.bf16.mxu0 %v17259_v41 }
0x15da   :  { %16176 = vmatmul.mubr.f32.vlgmr.msra.gmra.mrb[20].mxu0 %v9005_v17 }
0x15db   :  { %17282 = vmatpush3.bf16.xpose.msra.mxu0 %v17259_v41  ;;  %16182 = vmatprep.mubr.f32.mxu0 %v8995_v30 }
0x15e2   :  { %16183 = vmatmul.mubr.f32.vlgmr.msra.gmra.mrb[20].mxu0 %v9005_v17 }
0x1685   :  { %v16100_v58 = vpop.f32.mrb[18].mxu0 }
0x1686   :  { %v8373_v59 = vmul.f32 0.35355338, %v16100_v58  ;;  %v8362_v57 = vpop.f32.mrb[19].mxu0 }
0x1687   :  { %v8372_v62 = vmul.f32 0.35355338, %v8362_v57 }
0x1688   :  { %v8375_v60 = vadd.f32 %v8373_v59, %v18505_v24 }
0x1689   :  { %v8374_v49 = vadd.f32 %v8372_v62, %v18503_v20 }
0x168a   :  { %v8379_v63 = vsel %vm166_vm0, %v8375_v60, -inf }
0x168b   :  { %8380 = vmax.xlane.f32.xlu1 %v8379_v63  ;;  %v8376_v0 = vsel %vm166_vm0, %v8374_v49, -inf }
0x168c   :  { %8377 = vmax.xlane.f32.xlu0 %v8376_v0 }
0x16b5   :  { %v16184_v1 = vpop.f32.mrb[20].mxu0 }
0x16b6   :  { %v9420_v3 = vpop.f32.mrb[21].mxu0  ;;  %v9431_v4 = vmul.f32 0.35355338, %v16184_v1 }
0x16b7   :  { %v9430_v2 = vmul.f32 0.35355338, %v9420_v3 }
0x16b8   :  { %v9433_v10 = vadd.f32 %v9431_v4, %v18505_v24 }
0x16b9   :  { %v9432_v5 = vadd.f32 %v9430_v2, %v18503_v20 }
0x16ba   :  { %v9437_v11 = vsel %vm166_vm0, %v9433_v10, -inf }
0x16bb   :  { %v9434_v6 = vsel %vm166_vm0, %v9432_v5, -inf }
0x16bc   :  { %9435 = vmax.xlane.f32.xlu0 %v9434_v6 }
0x16c0   :  { %9438 = vmax.xlane.f32.xlu0 %v9437_v11 }
0x1718   :  { %v8381_v7 = vpop.xlane.xlu1 %8380 }
0x1719   :  { %v8383_v9 = vsub.f32 %v8375_v60, %v8381_v7  ;;  %v8378_v12 = vpop.xlane.xlu0 %8377 }
0x171a   :  { %v8382_v13 = vsub.f32 %v8374_v49, %v8378_v12 }
0x171b   :  { %v8386_v14 = vmul.f32 1.442695, %v8383_v9 }
0x171c   :  { %v8384_v23 = vmul.f32 1.442695, %v8382_v13 }
0x171d   :  { %17989 = vpow2.f32 %v8386_v14 }
0x171e   :  { %17991 = vpow2.f32 %v8384_v23 }
0x1727   :  { %v17990_v22 = vpop.eup %17989 }
0x1728   :  { %v17992_v15 = vpop.eup %17991  ;;  %v8391_v16 = vsel %vm166_vm0, %v17990_v22, 0.0 }
0x1729   :  { %8392 = vadd.xlane.f32.xlu0 %v8391_v16  ;;  %v8388_v18 = vsel %vm166_vm0, %v17992_v15, 0.0 }
0x172a   :  { %8389 = vadd.xlane.f32.xlu1 %v8388_v18 }
0x173b   :  { %8398 = vrot.lane.b32.xlu1 %v18900_v48, %s18229_s29 }
0x173f   :  { %8400 = vrot.lane.b32.xlu0 %v18898_v56, %s18229_s29  ;;  %s19319_s29 = smov 16  }
0x1749   :  { %v9436_v19 = vpop.xlane.xlu0 %9435 }
0x174a   :  { %v9440_v21 = vsub.f32 %v9432_v5, %v9436_v19 }
0x174c   :  { %v9442_v25 = vmul.f32 1.442695, %v9440_v21 }
0x174d   :  { %v9439_v26 = vpop.xlane.xlu0 %9438 }
0x174e   :  { %v9441_v27 = vsub.f32 %v9433_v10, %v9439_v26  ;;  %17993 = vpow2.f32 %v9442_v25 }
0x1750   :  { %v9444_v28 = vmul.f32 1.442695, %v9441_v27 }
0x1752   :  { %17995 = vpow2.f32 %v9444_v28 }
0x1758   :  { %v18950_v29 = vpop.eup %17993 }
0x1759   :  { %v9446_v34 = vsel %vm166_vm0, %v18950_v29, 0.0 }
0x175c   :  { %v18952_v33 = vpop.eup %17995 }
0x175d   :  { %v9449_v30 = vsel %vm166_vm0, %v18952_v33, 0.0 }
0x175e   :  { %9450 = vadd.xlane.f32.xlu0 %v9449_v30 }
0x175f   :  { %9447 = vadd.xlane.f32.xlu1 %v9446_v34 }
0x1770   :  { %9456 = vrot.lane.b32.xlu1 %v18900_v48, %s18232_s30 }
0x1774   :  { %9974 = vrot.lane.b32.xlu1 %v18900_v48, %s18234_s9  ;;  %9458 = vrot.lane.b32.xlu0 %v18898_v56, %s18232_s30 }
0x1778   :  { %9976 = vrot.lane.b32.xlu1 %v18898_v56, %s18234_s9  ;;  %9970 = vrot.lane.b32.xlu0 %v18900_v48, %s18233_s1  ;;  %s18240_s9 = smov [#allocation14]  }
0x177c   :  { %9972 = vrot.lane.b32.xlu1 %v18898_v56, %s18233_s1  ;;  %s19321_s1 = sld [smem:[#allocation25_spill]] }
0x17b6   :  { %v8393_v35 = vpop.xlane.xlu0 %8392 }
0x17b7   :  { %17997 = vrcp.f32 %v8393_v35  ;;  %v8390_v36 = vpop.xlane.xlu1 %8389 }
0x17b8   :  { %17999 = vrcp.f32 %v8390_v36 }
0x17ba   :  { %v8401_v8 = vpop.permute.xlu0 %8400 }
0x17bb   :  { %v8414_v39 = vand.u32 4294901760, %v8401_v8  ;;  %v8399_v32 = vpop.permute.xlu1 %8398 }
0x17bc   :  { %v8411_v40 = vand.u32 4294901760, %v8399_v32 }
0x17bd   :  { %v8506_v17 = vsub.f32 %v8401_v8, %v8414_v39 }
0x17be   :  { %v17235_v31 = vpack.c.bf16 %v8414_v39, %v8411_v40  ;;  %v8499_v41 = vsub.f32 %v8399_v32, %v8411_v40 }
0x17bf   :  { %v8507_v42 = vand.u32 4294901760, %v8506_v17 }
0x17c0   :  { %v8500_v43 = vand.u32 4294901760, %v8499_v41  ;;  %17236 = vmatprep.subr.bf16.mxu1 %v17235_v31  ;;  %v17243_v4 = vpack.c.bf16 %v8506_v17, %v8499_v41 }
0x17c1   :  { %v17998_v44 = vpop.eup %17997  ;;  %v8508_v53 = vsub.f32 %v8506_v17, %v8507_v42  ;;  %17238 = vmatpush3.bf16.msra.mxu1 %v17235_v31 }
0x17c2   :  { %v18000_v45 = vpop.eup %17999  ;;  %v8397_v46 = vmul.f32 %v17998_v44, %v17990_v22  ;;  %v8501_v55 = vsub.f32 %v8499_v41, %v8500_v43  ;;  %v17251_v2 = vpack.c.bf16 %v8507_v42, %v8500_v43 }
0x17c3   :  { %v8395_v61 = vmul.f32 %v18000_v45, %v17992_v15  ;;  %v8509_v47 = vand.u32 4294901760, %v8508_v53 }
0x17c4   :  { %v8502_v50 = vand.u32 4294901760, %v8501_v55  ;;  %v8408_v52 = vsel %vm166_vm0, %v8397_v46, 0 }
0x17c5   :  { %v8405_v54 = vsel %vm166_vm0, %v8395_v61, 0  ;;  %v8487_v51 = vand.u32 4294901760, %v8408_v52 }
0x17c6   :  { %v17239_v58 = vpack.c.bf16 %v8509_v47, %v8502_v50  ;;  %v8477_v59 = vand.u32 4294901760, %v8405_v54 }
0x17c7   :  { %v8488_v57 = vsub.f32 %v8408_v52, %v8487_v51 }
0x17c8   :  { %17240 = vmatprep.subr.bf16.mxu1 %v17239_v58  ;;  %v8478_v62 = vsub.f32 %v8405_v54, %v8477_v59 }
0x17c9   :  { %v8489_v60 = vand.u32 4294901760, %v8488_v57 }
0x17ca   :  { %v8479_v49 = vand.u32 4294901760, %v8478_v62 }
0x17cb   :  { %v8490_v63 = vsub.f32 %v8488_v57, %v8489_v60 }
0x17cc   :  { %v8480_v0 = vsub.f32 %v8478_v62, %v8479_v49 }
0x17cd   :  { %v8491_v3 = vand.u32 4294901760, %v8490_v63 }
0x17ce   :  { %v8481_v1 = vand.u32 4294901760, %v8480_v0 }
0x17d0   :  { %16105 = vmatprep.mubr.f32.mxu1 %v8481_v1 }
0x17d1   :  { %16106 = vmatmul.mubr.f32.vlgmr.msra.gmra.mrb[14].mxu1 %v8491_v3 }
0x17d2   :  { %17242 = vmatpush3.bf16.msra.mxu1 %v17239_v58  ;;  %16112 = vmatprep.mubr.f32.mxu1 %v8477_v59 }
0x17d3   :  { %17244 = vmatprep.subr.bf16.mxu1 %v17243_v4 }
0x17d9   :  { %16113 = vmatmul.mubr.f32.vlgmr.msra.gmra.mrb[14].mxu1 %v8487_v51 }
0x17da   :  { %17246 = vmatpush3.bf16.msra.mxu1 %v17243_v4  ;;  %16119 = vmatprep.mubr.f32.mxu1 %v8478_v62 }
0x17db   :  { %17248 = vmatprep.subr.bf16.mxu1 %v17235_v31 }
0x17e1   :  { %16120 = vmatmul.mubr.f32.vlgmr.msra.gmra.mrb[14].mxu1 %v8488_v57 }
0x17e2   :  { %17250 = vmatpush3.bf16.msra.mxu1 %v17235_v31  ;;  %16126 = vmatprep.mubr.f32.mxu1 %v8479_v49 }
0x17e3   :  { %17252 = vmatprep.subr.bf16.mxu1 %v17251_v2 }
0x17e9   :  { %16127 = vmatmul.mubr.f32.vlgmr.msra.gmra.mrb[14].mxu1 %v8489_v60 }
0x17ea   :  { %17254 = vmatpush3.bf16.msra.mxu1 %v17251_v2  ;;  %16133 = vmatprep.mubr.f32.mxu1 %v8477_v59 }
0x17eb   :  { %17256 = vmatprep.subr.bf16.mxu1 %v17235_v31  ;;  %v9451_v5 = vpop.xlane.xlu0 %9450 }
0x17ec   :  { %18001 = vrcp.f32 %v9451_v5  ;;  %v9448_v6 = vpop.xlane.xlu1 %9447 }
0x17ed   :  { %18003 = vrcp.f32 %v9448_v6 }
0x17ef   :  { %v9459_v10 = vpop.permute.xlu0 %9458 }
0x17f0   :  { %v9472_v11 = vand.u32 4294901760, %v9459_v10  ;;  %v9457_v7 = vpop.permute.xlu1 %9456 }
0x17f1   :  { %v9469_v9 = vand.u32 4294901760, %v9457_v7  ;;  %16134 = vmatmul.mubr.f32.vlgmr.msra.gmra.mrb[14].mxu1 %v8487_v51 }
0x17f2   :  { %v9564_v12 = vsub.f32 %v9459_v10, %v9472_v11  ;;  %17258 = vmatpush3.bf16.msra.mxu1 %v17235_v31  ;;  %16140 = vmatprep.mubr.f32.mxu1 %v8477_v59 }
0x17f3   :  { %v18972_v13 = vpack.c.bf16 %v9472_v11, %v9469_v9  ;;  %v9557_v14 = vsub.f32 %v9457_v7, %v9469_v9  ;;  %v9971_v53 = vpop.permute.xlu0 %9970 }
0x17f4   :  { %v9565_v23 = vand.u32 4294901760, %v9564_v12  ;;  %v9975_v42 = vpop.permute.xlu1 %9974  ;;  %v9978_v46 = vsel %vm1266_vm2, %v9971_v53, 0 }
0x17f5   :  { %v9558_v22 = vand.u32 4294901760, %v9557_v14  ;;  %17284 = vmatprep.subr.bf16.mxu1 %v18972_v13  ;;  %v17291_v41 = vpack.c.bf16 %v9564_v12, %v9557_v14  ;;  %v9982_v55 = vsel %vm1266_vm2, %v9975_v42, 0  ;;  %v10053_v47 = vand.u32 4294901760, %v9978_v46 }
0x17f6   :  { %v18002_v15 = vpop.eup %18001  ;;  %v9566_v16 = vsub.f32 %v9564_v12, %v9565_v23  ;;  %v9987_v50 = vand.u32 4294901760, %v9982_v55 }
0x17f7   :  { %v18004_v18 = vpop.eup %18003  ;;  %v9455_v19 = vmul.f32 %v18002_v15, %v18952_v33  ;;  %v9559_v21 = vsub.f32 %v9557_v14, %v9558_v22  ;;  %v17299_v44 = vpack.c.bf16 %v9565_v23, %v9558_v22 }
0x17f8   :  { %v9453_v25 = vmul.f32 %v18004_v18, %v18950_v29  ;;  %v9567_v26 = vand.u32 4294901760, %v9566_v16  ;;  %v9977_v43 = vpop.permute.xlu1 %9976  ;;  %v10075_v58 = vsub.f32 %v9982_v55, %v9987_v50 }
0x17f9   :  { %16141 = vmatmul.mubr.f32.vlgmr.msra.gmra.mrb[14].mxu1 %v8487_v51  ;;  %v9560_v27 = vand.u32 4294901760, %v9559_v21  ;;  %v9466_v28 = vsel %vm166_vm0, %v9455_v19, 0  ;;  %v9984_v45 = vsel %vm1266_vm2, %v9977_v43, 0  ;;  %v10054_v51 = vsub.f32 %v9978_v46, %v10053_v47 }
0x17fa   :  { %17286 = vmatpush3.bf16.msra.mxu1 %v18972_v13  ;;  %v9463_v30 = vsel %vm166_vm0, %v9453_v25, 0  ;;  %v9545_v34 = vand.u32 4294901760, %v9466_v28  ;;  %v9990_v61 = vand.u32 4294901760, %v9984_v45  ;;  %v10076_v60 = vand.u32 4294901760, %v10075_v58 }
0x17fb   :  { %v17287_v35 = vpack.c.bf16 %v9567_v26, %v9560_v27  ;;  %v9535_v36 = vand.u32 4294901760, %v9463_v30  ;;  %v10055_v62 = vand.u32 4294901760, %v10054_v51 }
0x17fc   :  { %v9546_v8 = vsub.f32 %v9466_v28, %v9545_v34  ;;  %v10082_v52 = vsub.f32 %v9984_v45, %v9990_v61  ;;  %v9973_v54 = vpop.permute.xlu1 %9972  ;;  %v17307_v63 = vpack.c.bf16 %v9990_v61, %v9987_v50  ;;  %v10077_v1 = vsub.f32 %v10075_v58, %v10076_v60 }
0x17fd   :  { %17288 = vmatprep.subr.bf16.mxu1 %v17287_v35  ;;  %v9536_v39 = vsub.f32 %v9463_v30, %v9535_v36  ;;  %v9980_v59 = vsel %vm1266_vm2, %v9973_v54, 0  ;;  %v10056_v4 = vsub.f32 %v10054_v51, %v10055_v62 }
0x17fe   :  { %v9547_v32 = vand.u32 4294901760, %v9546_v8  ;;  %v10083_v57 = vand.u32 4294901760, %v10082_v52  ;;  %v10063_v49 = vand.u32 4294901760, %v9980_v59  ;;  %v10078_v10 = vand.u32 4294901760, %v10077_v1 }
0x17ff   :  { %v9537_v33 = vand.u32 4294901760, %v9536_v39  ;;  %v10057_v6 = vand.u32 4294901760, %v10056_v4  ;;  %v17315_v12 = vpack.c.bf16 %v10082_v52, %v10075_v58 }
0x1800   :  { %v9548_v40 = vsub.f32 %v9546_v8, %v9547_v32  ;;  %v10084_v0 = vsub.f32 %v10082_v52, %v10083_v57  ;;  %v10064_v3 = vsub.f32 %v9980_v59, %v10063_v49 }
0x1801   :  { %v9538_v17 = vsub.f32 %v9536_v39, %v9537_v33 }
0x1802   :  { %v9549_v31 = vand.u32 4294901760, %v9548_v40  ;;  %v10085_v2 = vand.u32 4294901760, %v10084_v0  ;;  %v10065_v5 = vand.u32 4294901760, %v10064_v3 }
0x1803   :  { %v9539_v29 = vand.u32 4294901760, %v9538_v17 }
0x1804   :  { %v17311_v11 = vpack.c.bf16 %v10085_v2, %v10078_v10  ;;  %v10066_v7 = vsub.f32 %v10064_v3, %v10065_v5 }
0x1805   :  { %16189 = vmatprep.mubr.f32.mxu1 %v9539_v29 }
0x1806   :  { %16190 = vmatmul.mubr.f32.vlgmr.msra.gmra.mrb[16].mxu1 %v9549_v31  ;;  %v10067_v9 = vand.u32 4294901760, %v10066_v7 }
0x1807   :  { %17290 = vmatpush3.bf16.msra.mxu1 %v17287_v35  ;;  %16196 = vmatprep.mubr.f32.mxu1 %v9535_v36 }
0x1808   :  { %17292 = vmatprep.subr.bf16.mxu1 %v17291_v41 }
0x180e   :  { %16197 = vmatmul.mubr.f32.vlgmr.msra.gmra.mrb[16].mxu1 %v9545_v34 }
0x180f   :  { %17294 = vmatpush3.bf16.msra.mxu1 %v17291_v41  ;;  %16203 = vmatprep.mubr.f32.mxu1 %v9536_v39 }
0x1810   :  { %17296 = vmatprep.subr.bf16.mxu1 %v18972_v13 }
0x1816   :  { %16204 = vmatmul.mubr.f32.vlgmr.msra.gmra.mrb[16].mxu1 %v9546_v8 }
0x1817   :  { %17298 = vmatpush3.bf16.msra.mxu1 %v18972_v13  ;;  %16210 = vmatprep.mubr.f32.mxu1 %v9537_v33 }
0x1818   :  { %17300 = vmatprep.subr.bf16.mxu1 %v17299_v44 }
0x181e   :  { %16211 = vmatmul.mubr.f32.vlgmr.msra.gmra.mrb[16].mxu1 %v9547_v32 }
0x181f   :  { %17302 = vmatpush3.bf16.msra.mxu1 %v17299_v44  ;;  %16217 = vmatprep.mubr.f32.mxu1 %v9535_v36 }
0x1820   :  { %17304 = vmatprep.subr.bf16.mxu1 %v18972_v13 }
0x1826   :  { %16218 = vmatmul.mubr.f32.vlgmr.msra.gmra.mrb[16].mxu1 %v9545_v34 }
0x1827   :  { %17306 = vmatpush3.bf16.msra.mxu1 %v18972_v13  ;;  %16224 = vmatprep.mubr.f32.mxu1 %v9535_v36  ;;  %v17323_v13 = vpack.c.bf16 %v10083_v57, %v10076_v60 }
0x1828   :  { %17308 = vmatprep.subr.bf16.mxu1 %v17307_v63 }
0x182e   :  { %16225 = vmatmul.mubr.f32.vlgmr.msra.gmra.mrb[16].mxu1 %v9545_v34 }
0x182f   :  { %16231 = vmatprep.mubr.f32.mxu1 %v10057_v6 }
0x1830   :  { %17310 = vmatpush3.bf16.xpose.msra.mxu1 %v17307_v63 }
0x1831   :  { %17312 = vmatprep.subr.bf16.mxu1 %v17311_v11 }
0x1837   :  { %16232 = vmatmul.mubr.f32.vlgmr.msra.gmra.mrb[18].mxu1 %v10067_v9 }
0x1838   :  { %17314 = vmatpush3.bf16.xpose.msra.mxu1 %v17311_v11  ;;  %16238 = vmatprep.mubr.f32.mxu1 %v10053_v47 }
0x1839   :  { %17316 = vmatprep.subr.bf16.mxu1 %v17315_v12 }
0x183f   :  { %16239 = vmatmul.mubr.f32.vlgmr.msra.gmra.mrb[18].mxu1 %v10063_v49 }
0x1840   :  { %17318 = vmatpush3.bf16.xpose.msra.mxu1 %v17315_v12  ;;  %16245 = vmatprep.mubr.f32.mxu1 %v10054_v51 }
0x1841   :  { %17320 = vmatprep.subr.bf16.mxu1 %v17307_v63 }
0x1847   :  { %16246 = vmatmul.mubr.f32.vlgmr.msra.gmra.mrb[18].mxu1 %v10064_v3 }
0x1848   :  { %17322 = vmatpush3.bf16.xpose.msra.mxu1 %v17307_v63  ;;  %16252 = vmatprep.mubr.f32.mxu1 %v10055_v62 }
0x1849   :  { %17324 = vmatprep.subr.bf16.mxu1 %v17323_v13 }
0x184f   :  { %16253 = vmatmul.mubr.f32.vlgmr.msra.gmra.mrb[18].mxu1 %v10065_v5 }
0x1850   :  { %17326 = vmatpush3.bf16.xpose.msra.mxu1 %v17323_v13  ;;  %16259 = vmatprep.mubr.f32.mxu1 %v10053_v47 }
0x1851   :  { %17328 = vmatprep.subr.bf16.mxu1 %v17307_v63 }
0x1857   :  { %16260 = vmatmul.mubr.f32.vlgmr.msra.gmra.mrb[18].mxu1 %v10063_v49 }
0x1858   :  { %17330 = vmatpush3.bf16.xpose.msra.mxu1 %v17307_v63  ;;  %16266 = vmatprep.mubr.f32.mxu1 %v10053_v47 }
0x185f   :  { %16267 = vmatmul.mubr.f32.vlgmr.msra.gmra.mrb[18].mxu1 %v10063_v49 }
0x18cc   :  { %v18988_v14 = vpop.f32.mrb[14].mxu1 }
0x18cd   :  { %v18990_v23 = vpop.f32.mrb[15].mxu1 }
0x1901   :  { %v18992_v22 = vpop.f32.mrb[16].mxu1 }
0x1902   :  { %v18994_v15 = vpop.f32.mrb[17].mxu1 }
0x1932   :  { %v16268_v16 = vpop.f32.mrb[18].mxu1 }
0x1933   :  { %v10489_v18 = vmul.f32 0.35355338, %v16268_v16  ;;  %v10478_v19 = vpop.f32.mrb[19].mxu1 }
0x1934   :  { %v10488_v21 = vmul.f32 0.35355338, %v10478_v19 }
0x1935   :  { %v10491_v25 = vadd.f32 %v10489_v18, %v18505_v24 }
0x1936   :  { %v10490_v26 = vadd.f32 %v10488_v21, %v18503_v20 }
0x1937   :  { %v10495_v27 = vsel %vm166_vm0, %v10491_v25, -inf }
0x1938   :  { %10496 = vmax.xlane.f32.xlu1 %v10495_v27  ;;  %v10492_v28 = vsel %vm166_vm0, %v10490_v26, -inf }
0x1939   :  { %10493 = vmax.xlane.f32.xlu0 %v10492_v28 }
0x1949   :  { %10514 = vrot.lane.b32.xlu1 %v18900_v48, %s18235_s23 }
0x194d   :  { %11032 = vrot.lane.b32.xlu1 %v18900_v48, %s18236_s21 }
0x1951   :  { %11034 = vrot.lane.b32.xlu1 %v18898_v56, %s18236_s21 }
0x1955   :  { %11030 = vrot.lane.b32.xlu1 %v18898_v56, %s19317_s7 }
0x19c5   :  { %v10497_v30 = vpop.xlane.xlu1 %10496 }
0x19c6   :  { %v10499_v34 = vsub.f32 %v10491_v25, %v10497_v30  ;;  %v10494_v35 = vpop.xlane.xlu0 %10493 }
0x19c7   :  { %v10498_v36 = vsub.f32 %v10490_v26, %v10494_v35 }
0x19c8   :  { %v10502_v8 = vmul.f32 1.442695, %v10499_v34 }
0x19c9   :  { %v10500_v39 = vmul.f32 1.442695, %v10498_v36  ;;  %v10515_v29 = vpop.permute.xlu1 %10514 }
0x19ca   :  { %18005 = vpow2.f32 %v10502_v8  ;;  %v10527_v41 = vand.u32 4294901760, %v10515_v29 }
0x19cb   :  { %18007 = vpow2.f32 %v10500_v39 }
0x19cc   :  { %v10615_v43 = vsub.f32 %v10515_v29, %v10527_v41 }
0x19cd   :  { %v11033_v9 = vpop.permute.xlu1 %11032 }
0x19ce   :  { %v10616_v53 = vand.u32 4294901760, %v10615_v43  ;;  %v11040_v19 = vsel %vm1266_vm2, %v11033_v9, 0 }
0x19cf   :  { %v11045_v26 = vand.u32 4294901760, %v11040_v19 }
0x19d0   :  { %v10617_v50 = vsub.f32 %v10615_v43, %v10616_v53 }
0x19d1   :  { %v11035_v12 = vpop.permute.xlu1 %11034  ;;  %v11133_v34 = vsub.f32 %v11040_v19, %v11045_v26 }
0x19d2   :  { %v10618_v62 = vand.u32 4294901760, %v10617_v50  ;;  %v11042_v18 = vsel %vm1266_vm2, %v11035_v12, 0 }
0x19d3   :  { %v11048_v25 = vand.u32 4294901760, %v11042_v18  ;;  %v11134_v39 = vand.u32 4294901760, %v11133_v34 }
0x19d4   :  { %v18006_v32 = vpop.eup %18005 }
0x19d5   :  { %v10507_v33 = vsel %vm166_vm0, %v18006_v32, 0.0  ;;  %v18008_v40 = vpop.eup %18007  ;;  %v11140_v28 = vsub.f32 %v11042_v18, %v11048_v25  ;;  %v11031_v30 = vpop.permute.xlu1 %11030  ;;  %v11135_v29 = vsub.f32 %v11133_v34, %v11134_v39 }
0x19d6   :  { %10508 = vadd.xlane.f32.xlu0 %v10507_v33  ;;  %v10504_v17 = vsel %vm166_vm0, %v18008_v40, 0.0  ;;  %v11038_v36 = vsel %vm1266_vm2, %v11031_v30, 0 }
0x19d7   :  { %v11141_v8 = vand.u32 4294901760, %v11140_v28 }
0x19da   :  { %10505 = vadd.xlane.f32.xlu0 %v10504_v17  ;;  %v11142_v17 = vsub.f32 %v11140_v28, %v11141_v8 }
0x19f0   :  { %10516 = vrot.lane.b32.xlu0 %v18898_v56, %s18235_s23  ;;  %s14463_s23 = sshll.u32 %s18240_s9, 4  ;;  %s14464_s23 = int_to_ptr.vmem [resolvable:$true] %s14463_s23 }
0x19f1   :  { %s18183_s21 = scalar_lea.vmem %s14464_s23, 256  ;;  %p18188_p1 = scmp.lt.s32.totalorder %s14464_s23, %s14464_s23 }
0x19f2   :  { %p18184_p0 = scmp.ne.s32.totalorder %s14464_s23, %s18183_s21  ;;  %p18189_p2 = scmp.lt.s32.totalorder %s18183_s21, %s18183_s21 }
0x19f4   :  { %11028 = vrot.lane.b32.xlu0 %v18900_v48, %s19317_s7  ;;  %p18190_p3 = por %p18189_p2, %p18188_p1 }
0x19f6   :  { %p18191_p4 = pnand %p18190_p3, %p18184_p0 }
0x1a63   :  { %v10509_v31 = vpop.xlane.xlu0 %10508 }
0x1a64   :  { %18009 = vrcp.f32 %v10509_v31 }
0x1a67   :  { %v10506_v42 = vpop.xlane.xlu0 %10505 }
0x1a68   :  { %18011 = vrcp.f32 %v10506_v42  ;;  %v11143_v42 = vand.u32 4294901760, %v11142_v17 }
0x1a6b   :  { %v10517_v44 = vpop.permute.xlu0 %10516 }
0x1a6c   :  { %v10530_v45 = vand.u32 4294901760, %v10517_v44 }
0x1a6e   :  { %v18010_v46 = vpop.eup %18009  ;;  %v19014_v55 = vpack.c.bf16 %v10530_v45, %v10527_v41  ;;  %v10622_v61 = vsub.f32 %v10517_v44, %v10530_v45 }
0x1a6f   :  { %v10513_v47 = vmul.f32 %v18010_v46, %v18006_v32  ;;  %v11029_v16 = vpop.permute.xlu0 %11028  ;;  %v11121_v32 = vand.u32 4294901760, %v11038_v36 }
0x1a70   :  { %v10623_v52 = vand.u32 4294901760, %v10622_v61  ;;  %17332 = vmatprep.subr.bf16.mxu0 %v19014_v55  ;;  %v17339_v7 = vpack.c.bf16 %v10622_v61, %v10615_v43  ;;  %v11036_v21 = vsel %vm1266_vm2, %v11029_v16, 0 }
0x1a71   :  { %17334 = vmatpush3.bf16.msra.mxu0 %v19014_v55  ;;  %v10524_v54 = vsel %vm166_vm0, %v10513_v47, 0  ;;  %v11111_v27 = vand.u32 4294901760, %v11036_v21  ;;  %v11122_v31 = vsub.f32 %v11038_v36, %v11121_v32  ;;  %v17363_v47 = vpack.c.bf16 %v11140_v28, %v11133_v34 }
0x1a72   :  { %v18012_v51 = vpop.eup %18011  ;;  %v10624_v58 = vsub.f32 %v10622_v61, %v10623_v52  ;;  %v19019_v59 = vand.u32 4294901760, %v10524_v54  ;;  %v17347_v13 = vpack.c.bf16 %v10623_v52, %v10616_v53  ;;  %v11136_v53 = vand.u32 4294901760, %v11135_v29 }
0x1a73   :  { %v10511_v57 = vmul.f32 %v18012_v51, %v18008_v40  ;;  %v11112_v35 = vsub.f32 %v11036_v21, %v11111_v27  ;;  %v17355_v40 = vpack.c.bf16 %v11048_v25, %v11045_v26  ;;  %v11123_v43 = vand.u32 4294901760, %v11122_v31 }
0x1a74   :  { %v10625_v60 = vand.u32 4294901760, %v10624_v58  ;;  %v10604_v49 = vsub.f32 %v10524_v54, %v19019_v59  ;;  %v17359_v45 = vpack.c.bf16 %v11143_v42, %v11136_v53  ;;  %v14493_v53 = vld [vmem:[%s19272_s8 + $0x20] sm:$0xff] }
0x1a75   :  { %v10521_v63 = vsel %vm166_vm0, %v10511_v57, 0  ;;  %v11113_v33 = vand.u32 4294901760, %v11112_v35  ;;  %v11124_v46 = vsub.f32 %v11122_v31, %v11123_v43 }
0x1a76   :  { %v17335_v0 = vpack.c.bf16 %v10625_v60, %v10618_v62  ;;  %v10593_v1 = vand.u32 4294901760, %v10521_v63  ;;  %v10605_v3 = vand.u32 4294901760, %v10604_v49 }
0x1a77   :  { %v11114_v41 = vsub.f32 %v11112_v35, %v11113_v33  ;;  %v11125_v61 = vand.u32 4294901760, %v11124_v46  ;;  %v12136_v46 = vand.u32 4294901760, %v14493_v53 }
0x1a78   :  { %17336 = vmatprep.subr.bf16.mxu0 %v17335_v0  ;;  %v10594_v4 = vsub.f32 %v10521_v63, %v10593_v1  ;;  %v10606_v5 = vsub.f32 %v10604_v49, %v10605_v3 }
0x1a79   :  { %v11115_v44 = vand.u32 4294901760, %v11114_v41 }
0x1a7a   :  { %v10595_v2 = vand.u32 4294901760, %v10594_v4  ;;  %v10607_v11 = vand.u32 4294901760, %v10606_v5 }
0x1a7c   :  { %v10596_v6 = vsub.f32 %v10594_v4, %v10595_v2 }
0x1a7e   :  { %v10597_v10 = vand.u32 4294901760, %v10596_v6 }
0x1a80   :  { %16273 = vmatprep.mubr.f32.mxu0 %v10597_v10 }
0x1a81   :  { %16274 = vmatmul.mubr.f32.vlgmr.msra.gmra.mrb[22].mxu0 %v10607_v11 }
0x1a82   :  { %17338 = vmatpush3.bf16.msra.mxu0 %v17335_v0  ;;  %16280 = vmatprep.mubr.f32.mxu0 %v10593_v1 }
0x1a83   :  { %17340 = vmatprep.subr.bf16.mxu0 %v17339_v7 }
0x1a89   :  { %16281 = vmatmul.mubr.f32.vlgmr.msra.gmra.mrb[22].mxu0 %v19019_v59 }
0x1a8a   :  { %17342 = vmatpush3.bf16.msra.mxu0 %v17339_v7  ;;  %16287 = vmatprep.mubr.f32.mxu0 %v10594_v4 }
0x1a8b   :  { %17344 = vmatprep.subr.bf16.mxu0 %v19014_v55 }
0x1a91   :  { %16288 = vmatmul.mubr.f32.vlgmr.msra.gmra.mrb[22].mxu0 %v10604_v49 }
0x1a92   :  { %17346 = vmatpush3.bf16.msra.mxu0 %v19014_v55  ;;  %16294 = vmatprep.mubr.f32.mxu0 %v10595_v2 }
0x1a93   :  { %17348 = vmatprep.subr.bf16.mxu0 %v17347_v13 }
0x1a99   :  { %16295 = vmatmul.mubr.f32.vlgmr.msra.gmra.mrb[22].mxu0 %v10605_v3 }
0x1a9a   :  { %17350 = vmatpush3.bf16.msra.mxu0 %v17347_v13  ;;  %16301 = vmatprep.mubr.f32.mxu0 %v10593_v1 }
0x1a9b   :  { %17352 = vmatprep.subr.bf16.mxu0 %v19014_v55 }
0x1aa1   :  { %16302 = vmatmul.mubr.f32.vlgmr.msra.gmra.mrb[22].mxu0 %v19019_v59 }
0x1aa2   :  { %17354 = vmatpush3.bf16.msra.mxu0 %v19014_v55  ;;  %16308 = vmatprep.mubr.f32.mxu0 %v10593_v1  ;;  %v17371_v55 = vpack.c.bf16 %v11141_v8, %v11134_v39 }
0x1aa3   :  { %17356 = vmatprep.subr.bf16.mxu0 %v17355_v40 }
0x1aa9   :  { %16309 = vmatmul.mubr.f32.vlgmr.msra.gmra.mrb[22].mxu0 %v19019_v59 }
0x1aaa   :  { %16315 = vmatprep.mubr.f32.mxu0 %v11115_v44 }
0x1aab   :  { %17358 = vmatpush3.bf16.xpose.msra.mxu0 %v17355_v40 }
0x1aac   :  { %17360 = vmatprep.subr.bf16.mxu0 %v17359_v45 }
0x1ab2   :  { %16316 = vmatmul.mubr.f32.vlgmr.msra.gmra.mrb[24].mxu0 %v11125_v61 }
0x1ab3   :  { %17362 = vmatpush3.bf16.xpose.msra.mxu0 %v17359_v45  ;;  %16322 = vmatprep.mubr.f32.mxu0 %v11111_v27  ;;  %v14494_v45 = vld [vmem:[%s19272_s8 + $0x28] sm:$0xff] }
0x1ab4   :  { %17364 = vmatprep.subr.bf16.mxu0 %v17363_v47  ;;  %v12139_v61 = vand.u32 4294901760, %v14494_v45 }
0x1aba   :  { %16323 = vmatmul.mubr.f32.vlgmr.msra.gmra.mrb[24].mxu0 %v11121_v32 }
0x1abb   :  { %17366 = vmatpush3.bf16.xpose.msra.mxu0 %v17363_v47  ;;  %16329 = vmatprep.mubr.f32.mxu0 %v11112_v35  ;;  %v19058_v47 = vpack.c.bf16 %v12139_v61, %v12136_v46 }
0x1abc   :  { %17368 = vmatprep.subr.bf16.mxu0 %v17355_v40 }
0x1ac2   :  { %16330 = vmatmul.mubr.f32.vlgmr.msra.gmra.mrb[24].mxu0 %v11122_v31 }
0x1ac3   :  { %17370 = vmatpush3.bf16.xpose.msra.mxu0 %v17355_v40  ;;  %16336 = vmatprep.mubr.f32.mxu0 %v11113_v33 }
0x1ac4   :  { %17372 = vmatprep.subr.bf16.mxu0 %v17371_v55 }
0x1aca   :  { %16337 = vmatmul.mubr.f32.vlgmr.msra.gmra.mrb[24].mxu0 %v11123_v43 }
0x1acb   :  { %17374 = vmatpush3.bf16.xpose.msra.mxu0 %v17371_v55  ;;  %16343 = vmatprep.mubr.f32.mxu0 %v11111_v27  ;;  %v12226_v55 = vsub.f32 %v14493_v53, %v12136_v46 }
0x1acc   :  { %17376 = vmatprep.subr.bf16.mxu0 %v17355_v40 }
0x1ad2   :  { %16344 = vmatmul.mubr.f32.vlgmr.msra.gmra.mrb[24].mxu0 %v11121_v32 }
0x1ad3   :  { %17378 = vmatpush3.bf16.xpose.msra.mxu0 %v17355_v40  ;;  %16350 = vmatprep.mubr.f32.mxu0 %v11111_v27 }
0x1ada   :  { %16351 = vmatmul.mubr.f32.vlgmr.msra.gmra.mrb[24].mxu0 %v11121_v32 }
0x1b7c   :  { %v16310_v50 = vpop.f32.mrb[22].mxu0 }
0x1b7d   :  { %v11018_v52 = vpop.f32.mrb[23].mxu0 }
0x1bad   :  { %v16352_v54 = vpop.f32.mrb[24].mxu0 }
0x1bae   :  { %v11547_v51 = vmul.f32 0.35355338, %v16352_v54  ;;  %v11536_v58 = vpop.f32.mrb[25].mxu0  ;;  %v14496_v54 = vld [vmem:[%s19272_s8 + $0x38] sm:$0xff] }
0x1baf   :  { %v11546_v59 = vmul.f32 0.35355338, %v11536_v58  ;;  %v12145_v58 = vand.u32 4294901760, %v14496_v54 }
0x1bb0   :  { %v11549_v57 = vadd.f32 %v11547_v51, %v18505_v24 }
0x1bb1   :  { %v11548_v62 = vadd.f32 %v11546_v59, %v18503_v20  ;;  %v12227_v59 = vand.u32 4294901760, %v12226_v55 }
0x1bb2   :  { %v11553_v60 = vsel %vm166_vm0, %v11549_v57, -inf }
0x1bb3   :  { %11554 = vmax.xlane.f32.xlu1 %v11553_v60  ;;  %v11550_v49 = vsel %vm166_vm0, %v11548_v62, -inf  ;;  %v12228_v60 = vsub.f32 %v12226_v55, %v12227_v59 }
0x1bb4   :  { %11551 = vmax.xlane.f32.xlu0 %v11550_v49 }
0x1bc4   :  { %11572 = vrot.lane.b32.xlu1 %v18900_v48, %s19318_s2 }
0x1bc8   :  { %12088 = vrot.lane.b32.xlu1 %v18994_v15, %s19313_s5 }
0x1bcc   :  { %12090 = vrot.lane.b32.xlu1 %v18992_v22, %s19313_s5 }
0x1bd0   :  { %12098 = vrot.lane.b32.xlu1 %v16310_v50, %s19319_s29  ;;  %v12233_v50 = vsub.f32 %v14494_v45, %v12139_v61 }
0x1c40   :  { %v11555_v24 = vpop.xlane.xlu1 %11554 }
0x1c41   :  { %v11557_v63 = vsub.f32 %v11549_v57, %v11555_v24  ;;  %v11552_v20 = vpop.xlane.xlu0 %11551  ;;  %v12234_v57 = vand.u32 4294901760, %v12233_v50 }
0x1c42   :  { %v11556_v0 = vsub.f32 %v11548_v62, %v11552_v20  ;;  %v12229_v20 = vand.u32 4294901760, %v12228_v60  ;;  %v14503_v60 = vld [vmem:[%s19276_s12 + $0x28] sm:$0xff] }
0x1c43   :  { %v11560_v1 = vmul.f32 1.442695, %v11557_v63  ;;  %v12235_v49 = vsub.f32 %v12233_v50, %v12234_v57  ;;  %v12247_v63 = vsub.f32 %v14496_v54, %v12145_v58 }
0x1c44   :  { %v11558_v3 = vmul.f32 1.442695, %v11556_v0  ;;  %v11573_v22 = vpop.permute.xlu1 %11572 }
0x1c45   :  { %18013 = vpow2.f32 %v11560_v1  ;;  %v11585_v6 = vand.u32 4294901760, %v11573_v22  ;;  %v12236_v0 = vand.u32 4294901760, %v12235_v49  ;;  %v14504_v49 = vld [vmem:[%s19276_s12 + $0x30] sm:$0xff] }
0x1c46   :  { %18015 = vpow2.f32 %v11558_v3 }
0x1c47   :  { %v11673_v11 = vsub.f32 %v11573_v22, %v11585_v6 }
0x1c49   :  { %v11674_v9 = vand.u32 4294901760, %v11673_v11 }
0x1c4b   :  { %v11675_v21 = vsub.f32 %v11673_v11, %v11674_v9 }
0x1c4d   :  { %v11676_v34 = vand.u32 4294901760, %v11675_v21 }
0x1c4f   :  { %v18014_v4 = vpop.eup %18013 }
0x1c50   :  { %v11565_v2 = vsel %vm166_vm0, %v18014_v4, 0.0  ;;  %v18016_v48 = vpop.eup %18015 }
0x1c51   :  { %11566 = vadd.xlane.f32.xlu0 %v11565_v2  ;;  %v11562_v15 = vsel %vm166_vm0, %v18016_v48, 0.0 }
0x1c55   :  { %11563 = vadd.xlane.f32.xlu0 %v11562_v15 }
0x1c6b   :  { %11574 = vrot.lane.b32.xlu0 %v18898_v56, %s19318_s2 }
0x1c6f   :  { %12096 = vrot.lane.b32.xlu0 %v11018_v52, %s19319_s29  ;;  %v14495_v52 = vld [vmem:[%s19272_s8 + $0x30] sm:$0xff]  ;;  %s19320_s8 = smov 24  }
0x1c70   :  { %v12142_v51 = vand.u32 4294901760, %v14495_v52 }
0x1c72   :  { %v19068_v62 = vpack.c.bf16 %v12145_v58, %v12142_v51  ;;  %v12240_v24 = vsub.f32 %v14495_v52, %v12142_v51 }
0x1c74   :  { %v12241_v1 = vand.u32 4294901760, %v12240_v24 }
0x1c76   :  { %v12242_v15 = vsub.f32 %v12240_v24, %v12241_v1 }
0x1cde   :  { %v11567_v5 = vpop.xlane.xlu0 %11566 }
0x1cdf   :  { %18017 = vrcp.f32 %v11567_v5  ;;  %v12243_v5 = vand.u32 4294901760, %v12242_v15 }
0x1ce2   :  { %v11564_v10 = vpop.xlane.xlu0 %11563 }
0x1ce3   :  { %18019 = vrcp.f32 %v11564_v10 }
0x1ce6   :  { %v11575_v7 = vpop.permute.xlu0 %11574 }
0x1ce7   :  { %v11588_v12 = vand.u32 4294901760, %v11575_v7 }
0x1ce9   :  { %v18018_v13 = vpop.eup %18017  ;;  %v17379_v16 = vpack.c.bf16 %v11588_v12, %v11585_v6  ;;  %v11680_v18 = vsub.f32 %v11575_v7, %v11588_v12  ;;  %v17423_v7 = vpack.c.bf16 %v12247_v63, %v12240_v24 }
0x1cea   :  { %v11571_v19 = vmul.f32 %v18018_v13, %v18014_v4  ;;  %v12248_v4 = vand.u32 4294901760, %v12247_v63  ;;  %v12089_v13 = vpop.permute.xlu1 %12088 }
0x1ceb   :  { %v11681_v25 = vand.u32 4294901760, %v11680_v18  ;;  %17380 = vmatprep.subr.bf16.mxu1 %v17379_v16  ;;  %v17387_v43 = vpack.c.bf16 %v11680_v18, %v11673_v11  ;;  %v17419_v11 = vpack.c.bf16 %v12233_v50, %v12226_v55 }
0x1cec   :  { %17382 = vmatpush3.bf16.msra.mxu1 %v17379_v16  ;;  %v11582_v56 = vsel %vm166_vm0, %v11571_v19, 0  ;;  %v12249_v22 = vsub.f32 %v12247_v63, %v12248_v4  ;;  %v17439_v12 = vpack.c.bf16 %v12248_v4, %v12241_v1  ;;  %v12097_v19 = vpop.permute.xlu0 %12096  ;;  %v12734_v63 = vand.u32 4294901760, %v14503_v60 }
0x1ced   :  { %v18020_v26 = vpop.eup %18019  ;;  %v11682_v27 = vsub.f32 %v11680_v18, %v11681_v25  ;;  %v11661_v28 = vand.u32 4294901760, %v11582_v56  ;;  %v17395_v44 = vpack.c.bf16 %v11681_v25, %v11674_v9  ;;  %v17435_v9 = vpack.c.bf16 %v12234_v57, %v12227_v59 }
0x1cee   :  { %v11569_v30 = vmul.f32 %v18020_v26, %v18016_v48  ;;  %v17411_v48 = vpack.c.bf16 %v12236_v0, %v12229_v20  ;;  %v12250_v6 = vand.u32 4294901760, %v12249_v22  ;;  %v12110_v25 = vsel %vm1266_vm2, %v18990_v23, %v12089_v13  ;;  %v14505_v20 = vld [vmem:[%s19276_s12 + $0x38] sm:$0xff] }
0x1cef   :  { %v11683_v35 = vand.u32 4294901760, %v11682_v27  ;;  %v11662_v36 = vsub.f32 %v11582_v56, %v11661_v28  ;;  %v12112_v27 = vsel %vm166_vm0, %v12110_v25, %v12097_v19  ;;  %v12737_v0 = vand.u32 4294901760, %v14504_v49 }
0x1cf0   :  { %v11579_v8 = vsel %vm166_vm0, %v11569_v30, 0  ;;  %v17415_v10 = vpack.c.bf16 %v12250_v6, %v12243_v5  ;;  %v12740_v1 = vand.u32 4294901760, %v14505_v20 }
0x1cf1   :  { %v17383_v39 = vpack.c.bf16 %v11683_v35, %v11676_v34  ;;  %v11651_v32 = vand.u32 4294901760, %v11579_v8  ;;  %v11663_v33 = vand.u32 4294901760, %v11662_v36 }
0x1cf2   :  { %v19112_v4 = vpack.c.bf16 %v12740_v1, %v12737_v0 }
0x1cf3   :  { %17384 = vmatprep.subr.bf16.mxu1 %v17383_v39  ;;  %v11652_v40 = vsub.f32 %v11579_v8, %v11651_v32  ;;  %v11664_v29 = vsub.f32 %v11662_v36, %v11663_v33 }
0x1cf5   :  { %v11653_v17 = vand.u32 4294901760, %v11652_v40  ;;  %v11665_v42 = vand.u32 4294901760, %v11664_v29 }
0x1cf7   :  { %v11654_v31 = vsub.f32 %v11652_v40, %v11653_v17 }
0x1cf9   :  { %v11655_v41 = vand.u32 4294901760, %v11654_v31 }
0x1cfb   :  { %16357 = vmatprep.mubr.f32.mxu1 %v11655_v41  ;;  %v14497_v41 = vld [vmem:[#allocation13 + $0x1] ss:$0 sm:$0xff] }
0x1cfc   :  { %16358 = vmatmul.mubr.f32.vlgmr.msra.gmra.mrb[20].mxu1 %v11665_v42 }
0x1cfd   :  { %17386 = vmatpush3.bf16.msra.mxu1 %v17383_v39  ;;  %16364 = vmatprep.mubr.f32.mxu1 %v11651_v32 }
0x1cfe   :  { %17388 = vmatprep.subr.bf16.mxu1 %v17387_v43 }
0x1d04   :  { %16365 = vmatmul.mubr.f32.vlgmr.msra.gmra.mrb[20].mxu1 %v11661_v28 }
0x1d05   :  { %17390 = vmatpush3.bf16.msra.mxu1 %v17387_v43  ;;  %16371 = vmatprep.mubr.f32.mxu1 %v11652_v40 }
0x1d06   :  { %17392 = vmatprep.subr.bf16.mxu1 %v17379_v16 }
0x1d0c   :  { %16372 = vmatmul.mubr.f32.vlgmr.msra.gmra.mrb[20].mxu1 %v11662_v36 }
0x1d0d   :  { %17394 = vmatpush3.bf16.msra.mxu1 %v17379_v16  ;;  %16378 = vmatprep.mubr.f32.mxu1 %v11653_v17 }
0x1d0e   :  { %17396 = vmatprep.subr.bf16.mxu1 %v17395_v44 }
0x1d14   :  { %16379 = vmatmul.mubr.f32.vlgmr.msra.gmra.mrb[20].mxu1 %v11663_v33 }
0x1d15   :  { %17398 = vmatpush3.bf16.msra.mxu1 %v17395_v44  ;;  %16385 = vmatprep.mubr.f32.mxu1 %v11651_v32 }
0x1d16   :  { %17400 = vmatprep.subr.bf16.mxu1 %v17379_v16 }
0x1d1c   :  { %16386 = vmatmul.mubr.f32.vlgmr.msra.gmra.mrb[20].mxu1 %v11661_v28 }
0x1d1d   :  { %17402 = vmatpush3.bf16.msra.mxu1 %v17379_v16  ;;  %16392 = vmatprep.mubr.f32.mxu1 %v11651_v32  ;;  %v12091_v16 = vpop.permute.xlu1 %12090 }
0x1d1e   :  { %17404 = vmatprep.subr.bf16.mxu1 %v19058_v47  ;;  %v12111_v21 = vsel %vm1266_vm2, %v18988_v14, %v12091_v16 }
0x1d21   :  { %v12099_v18 = vpop.permute.xlu1 %12098 }
0x1d22   :  { %v12113_v56 = vsel %vm166_vm0, %v12111_v21, %v12099_v18 }
0x1d24   :  { %16393 = vmatmul.mubr.f32.vlgmr.msra.gmra.mrb[20].mxu1 %v11661_v28 }
0x1d25   :  { %17406 = vmatpush3.bf16.msra.mxu1 %v19058_v47 }
0x1d26   :  { %17408 = vmatprep.subr.bf16.mxu1 %v19068_v62 }
0x1d29   :  { %17410 = vmatpush3.bf16.msra.mxu1 %v19068_v62 }
0x1d2a   :  { %17412 = vmatprep.subr.bf16.mxu1 %v17411_v48 }
0x1df7   :  { %v16394_v3 = vpop.f32.mrb[20].mxu1 }
0x1df8   :  { %12106 = vrot.lane.b32.xlu1 %v16394_v3, %s19320_s8  ;;  %v12076_v2 = vpop.f32.mrb[21].mxu1 }
0x1df9   :  { %12104 = vrot.lane.b32.xlu0 %v12076_v2, %s19320_s8 }
0x1e6a   :  { %v12107_v26 = vpop.permute.xlu1 %12106 }
0x1e6b   :  { %v12115_v28 = vsel %vm5519_vm10, %v12113_v56, %v12107_v26  ;;  %v12105_v30 = vpop.permute.xlu0 %12104 }
0x1e6c   :  { %v12133_v34 = vsel %vm725_vm1, %v12115_v28, 0  ;;  %v12114_v35 = vsel %vm5519_vm10, %v12112_v27, %v12105_v30 }
0x1e6d   :  { %v12214_v36 = vand.u32 4294901760, %v12133_v34  ;;  %v12130_v8 = vsel %vm725_vm1, %v12114_v35, 0 }
0x1e6e   :  { %v12204_v39 = vand.u32 4294901760, %v12130_v8 }
0x1e6f   :  { %v12215_v14 = vsub.f32 %v12133_v34, %v12214_v36 }
0x1e70   :  { %v12205_v32 = vsub.f32 %v12130_v8, %v12204_v39 }
0x1e71   :  { %v12216_v33 = vand.u32 4294901760, %v12215_v14 }
0x1e72   :  { %v12206_v23 = vand.u32 4294901760, %v12205_v32 }
0x1e73   :  { %v12217_v40 = vsub.f32 %v12215_v14, %v12216_v33 }
0x1e74   :  { %v12207_v17 = vsub.f32 %v12205_v32, %v12206_v23 }
0x1e75   :  { %v12218_v31 = vand.u32 4294901760, %v12217_v40  ;;  %v14501_v40 = vld [vmem:[%s19275_s11 + $0x1] ss:$0 sm:$0xff] }
0x1e76   :  { %v12208_v29 = vand.u32 4294901760, %v12207_v17 }
0x1e78   :  { %16403 = vmatprep.mubr.f32.mxu1 %v12208_v29 }
0x1e79   :  { %16404 = vmatmul.mubr.f32.vlgmr.msra.gmra.mrb[22].mxu1 %v12218_v31 }
0x1e7a   :  { %17414 = vmatpush3.bf16.msra.mxu1 %v17411_v48  ;;  %16414 = vmatprep.mubr.f32.mxu1 %v12204_v39  ;;  %v12828_v48 = vsub.f32 %v14503_v60, %v12734_v63  ;;  %v14510_v60 = vld [vmem:[%s19278_s14 + $0x50] sm:$0xff] }
0x1e7b   :  { %17416 = vmatprep.subr.bf16.mxu1 %v17415_v10 }
0x1e7c   :  { %v12829_v22 = vand.u32 4294901760, %v12828_v48 }
0x1e7e   :  { %17418 = vmatpush3.bf16.msra.mxu1 %v17415_v10  ;;  %v12830_v6 = vsub.f32 %v12828_v48, %v12829_v22  ;;  %v12835_v10 = vsub.f32 %v14504_v49, %v12737_v0  ;;  %v14511_v49 = vld [vmem:[%s19278_s14 + $0x58] sm:$0xff]  ;;  %v14512_v0 = vld [vmem:[%s19278_s14 + $0x60] sm:$0xff] }
0x1e7f   :  { %17420 = vmatprep.subr.bf16.mxu1 %v17419_v11 }
0x1e81   :  { %16415 = vmatmul.mubr.f32.vlgmr.msra.gmra.mrb[22].mxu1 %v12214_v36 }
0x1e82   :  { %17422 = vmatpush3.bf16.msra.mxu1 %v17419_v11  ;;  %16425 = vmatprep.mubr.f32.mxu1 %v12205_v32  ;;  %v12842_v11 = vsub.f32 %v14505_v20, %v12740_v1  ;;  %v14513_v1 = vld [vmem:[%s19278_s14 + $0x68] sm:$0xff] }
0x1e83   :  { %17424 = vmatprep.subr.bf16.mxu1 %v17423_v7 }
0x1e84   :  { %v12843_v13 = vand.u32 4294901760, %v12842_v11  ;;  %v17471_v27 = vpack.c.bf16 %v12842_v11, %v12835_v10 }
0x1e86   :  { %17426 = vmatpush3.bf16.msra.mxu1 %v17423_v7  ;;  %v12844_v19 = vsub.f32 %v12842_v11, %v12843_v13 }
0x1e87   :  { %17428 = vmatprep.subr.bf16.mxu1 %v19058_v47 }
0x1e88   :  { %v12845_v25 = vand.u32 4294901760, %v12844_v19 }
0x1e89   :  { %16426 = vmatmul.mubr.f32.vlgmr.msra.gmra.mrb[22].mxu1 %v12215_v14 }
0x1e8a   :  { %17430 = vmatpush3.bf16.msra.mxu1 %v19058_v47  ;;  %16436 = vmatprep.mubr.f32.mxu1 %v12206_v23 }
0x1e8b   :  { %17432 = vmatprep.subr.bf16.mxu1 %v19068_v62 }
0x1e8e   :  { %17434 = vmatpush3.bf16.msra.mxu1 %v19068_v62 }
0x1e8f   :  { %17436 = vmatprep.subr.bf16.mxu1 %v17435_v9 }
0x1e91   :  { %16437 = vmatmul.mubr.f32.vlgmr.msra.gmra.mrb[22].mxu1 %v12216_v33  ;;  %v14500_v33 = vld [vmem:[%s19274_s10 + $0x1] ss:$0 sm:$0xff] }
0x1e92   :  { %17438 = vmatpush3.bf16.msra.mxu1 %v17435_v9  ;;  %16447 = vmatprep.mubr.f32.mxu1 %v12204_v39  ;;  %v12831_v9 = vand.u32 4294901760, %v12830_v6 }
0x1e93   :  { %17440 = vmatprep.subr.bf16.mxu1 %v17439_v12 }
0x1e96   :  { %17442 = vmatpush3.bf16.msra.mxu1 %v17439_v12  ;;  %v12836_v12 = vand.u32 4294901760, %v12835_v10 }
0x1e97   :  { %17444 = vmatprep.subr.bf16.mxu1 %v19058_v47 }
0x1e98   :  { %v12837_v18 = vsub.f32 %v12835_v10, %v12836_v12  ;;  %v17487_v30 = vpack.c.bf16 %v12843_v13, %v12836_v12 }
0x1e99   :  { %16448 = vmatmul.mubr.f32.vlgmr.msra.gmra.mrb[22].mxu1 %v12214_v36 }
0x1e9a   :  { %17446 = vmatpush3.bf16.msra.mxu1 %v19058_v47  ;;  %16458 = vmatprep.mubr.f32.mxu1 %v12204_v39  ;;  %v12838_v21 = vand.u32 4294901760, %v12837_v18 }
0x1e9b   :  { %17448 = vmatprep.subr.bf16.mxu1 %v19068_v62 }
0x1e9c   :  { %v17463_v56 = vpack.c.bf16 %v12845_v25, %v12838_v21 }
0x1e9e   :  { %17450 = vmatpush3.bf16.msra.mxu1 %v19068_v62 }
0x1ea1   :  { %16459 = vmatmul.mubr.f32.vlgmr.msra.gmra.mrb[22].mxu1 %v12214_v36 }
0x1f74   :  { %v16460_v42 = vpop.f32.mrb[22].mxu1 }
0x1f75   :  { %v17659_v43 = vadd.f32 %v16460_v42, %v14497_v41  ;;  %v12653_v44 = vpop.f32.mrb[23].mxu1 }
0x1f76   :  { %v17660_v53 = vadd.f32 %v14497_v41, %v12653_v44 }
0x1f77   :  { %v12664_v45 = vadd.f32 %v17659_v43, %v18879_v37 }
0x1f78   :  { %v12663_v46 = vadd.f32 %v17660_v53, %v18881_v38  ;;  %v14502_v38 = vld [vmem:[%s19276_s12 + $0x20] sm:$0xff] }
0x1f79   :  { %v12672_v61 = vsel %vm725_vm1, %v12664_v45, 0.0  ;;  %v12731_v24 = vand.u32 4294901760, %v14502_v38 }
0x1f7a   :  { %12673 = vadd.xlane.f32.xlu1 %v12672_v61  ;;  %v12669_v47 = vsel %vm725_vm1, %v12663_v46, 0.0 }
0x1f7b   :  { %12670 = vadd.xlane.f32.xlu0 %v12669_v47  ;;  %v19110_v3 = vpack.c.bf16 %v12734_v63, %v12731_v24  ;;  %v12821_v2 = vsub.f32 %v14502_v38, %v12731_v24  ;;  %v13290_v24 = vand.u32 4294901760, %v14510_v60  ;;  %v13293_v63 = vand.u32 4294901760, %v14511_v49 }
0x1f7d   :  { %17452 = vmatprep.subr.bf16.mxu0 %v19110_v3  ;;  %v12822_v15 = vand.u32 4294901760, %v12821_v2  ;;  %v17467_v26 = vpack.c.bf16 %v12828_v48, %v12821_v2  ;;  %v19156_v20 = vpack.c.bf16 %v13293_v63, %v13290_v24  ;;  %v13399_v18 = vsub.f32 %v14511_v49, %v13293_v63 }
0x1f7e   :  { %17454 = vmatpush3.bf16.msra.mxu0 %v19110_v3 }
0x1f7f   :  { %17456 = vmatprep.subr.bf16.mxu0 %v19112_v4  ;;  %v12823_v5 = vsub.f32 %v12821_v2, %v12822_v15  ;;  %v17483_v28 = vpack.c.bf16 %v12829_v22, %v12822_v15  ;;  %v14514_v22 = vld [vmem:[%s19278_s14 + $0x70] sm:$0xff] }
0x1f80   :  { %v13302_v6 = vand.u32 4294901760, %v14514_v22 }
0x1f81   :  { %v12824_v7 = vand.u32 4294901760, %v12823_v5  ;;  %v14515_v5 = vld [vmem:[%s19278_s14 + $0x78] sm:$0xff] }
0x1f82   :  { %17458 = vmatpush3.bf16.msra.mxu0 %v19112_v4  ;;  %v13305_v10 = vand.u32 4294901760, %v14515_v5 }
0x1f83   :  { %v17459_v16 = vpack.c.bf16 %v12831_v9, %v12824_v7 }
0x1f84   :  { %v19176_v9 = vpack.c.bf16 %v13305_v10, %v13302_v6 }
0x1f85   :  { %17460 = vmatprep.subr.bf16.mxu0 %v17459_v16 }
0x2007   :  { %v12674_v55 = vpop.xlane.xlu1 %12673 }
0x2008   :  { %v12676_v50 = vmul.f32 0.03125, %v12674_v55  ;;  %v12671_v52 = vpop.xlane.xlu0 %12670 }
0x2009   :  { %v12675_v54 = vmul.f32 0.03125, %v12671_v52 }
0x200a   :  { %v12678_v51 = vsub.f32 %v12664_v45, %v12676_v50 }
0x200b   :  { %v12677_v58 = vsub.f32 %v12663_v46, %v12675_v54 }
0x200c   :  { %v12680_v62 = vmul.f32 %v12678_v51, %v12678_v51 }
0x200d   :  { %v12679_v59 = vmul.f32 %v12677_v58, %v12677_v58 }
0x200e   :  { %v12684_v37 = vsel %vm725_vm1, %v12680_v62, 0.0 }
0x200f   :  { %v12681_v57 = vsel %vm725_vm1, %v12679_v59, 0.0  ;;  %v14508_v59 = vld [vmem:[%s19278_s14 + $0x40] sm:$0xff] }
0x2010   :  { %12682 = vadd.xlane.f32.xlu0 %v12681_v57  ;;  %v14509_v57 = vld [vmem:[%s19278_s14 + $0x48] sm:$0xff]  ;;  %v13284_v62 = vand.u32 4294901760, %v14508_v59 }
0x2012   :  { %v13378_v48 = vsub.f32 %v14508_v59, %v13284_v62 }
0x2014   :  { %12685 = vadd.xlane.f32.xlu0 %v12684_v37  ;;  %v13287_v37 = vand.u32 4294901760, %v14509_v57  ;;  %v13379_v11 = vand.u32 4294901760, %v13378_v48 }
0x2016   :  { %v19146_v38 = vpack.c.bf16 %v13287_v37, %v13284_v62  ;;  %v13385_v15 = vsub.f32 %v14509_v57, %v13287_v37  ;;  %v13380_v12 = vsub.f32 %v13378_v48, %v13379_v11  ;;  %v14507_v62 = vld [vmem:[%s19277_s13 + $0x1] ss:$0 sm:$0xff] }
0x2018   :  { %17500 = vmatprep.subr.bf16.mxu1 %v19146_v38  ;;  %v13386_v7 = vand.u32 4294901760, %v13385_v15  ;;  %v13381_v19 = vand.u32 4294901760, %v13380_v12 }
0x2019   :  { %17502 = vmatpush3.bf16.msra.mxu1 %v19146_v38 }
0x201a   :  { %17504 = vmatprep.subr.bf16.mxu1 %v19156_v20  ;;  %v13387_v13 = vsub.f32 %v13385_v15, %v13386_v7 }
0x201c   :  { %v13388_v21 = vand.u32 4294901760, %v13387_v13  ;;  %v14517_v13 = vld [vmem:[%s19279_s15 + $0x1] ss:$0 sm:$0xff] }
0x201d   :  { %17506 = vmatpush3.bf16.msra.mxu1 %v19156_v20 }
0x209d   :  { %v12683_v34 = vpop.xlane.xlu0 %12682 }
0x209e   :  { %v12687_v35 = vmul.f32 0.03125, %v12683_v34 }
0x20a0   :  { %v12689_v36 = vadd.f32 1e-05, %v12687_v35 }
0x20a1   :  { %v12686_v8 = vpop.xlane.xlu0 %12685 }
0x20a2   :  { %18021 = vrsqrt.f32 %v12689_v36  ;;  %v12688_v39 = vmul.f32 0.03125, %v12686_v8 }
0x20a4   :  { %v12690_v14 = vadd.f32 1e-05, %v12688_v39 }
0x20a6   :  { %18023 = vrsqrt.f32 %v12690_v14 }
0x20ac   :  { %v18022_v32 = vpop.eup %18021 }
0x20ad   :  { %v12693_v23 = vmul.f32 %v18022_v32, %v12677_v58 }
0x20af   :  { %v12701_v17 = vmul.f32 %v14500_v33, %v12693_v23  ;;  %v13427_v23 = vsub.f32 %v14515_v5, %v13305_v10 }
0x20b0   :  { %v18024_v29 = vpop.eup %18023 }
0x20b1   :  { %v12694_v31 = vmul.f32 %v18024_v29, %v12678_v51  ;;  %v19124_v41 = vadd.f32 %v14501_v40, %v12701_v17 }
0x20b3   :  { %v12702_v42 = vmul.f32 %v14500_v33, %v12694_v31  ;;  %v12725_v43 = vsel %vm725_vm1, %v19124_v41, 0  ;;  %v13420_v33 = vsub.f32 %v14514_v22, %v13302_v6 }
0x20b4   :  { %v12799_v44 = vand.u32 4294901760, %v12725_v43 }
0x20b5   :  { %v19128_v53 = vadd.f32 %v14501_v40, %v12702_v42  ;;  %v13421_v31 = vand.u32 4294901760, %v13420_v33  ;;  %v13428_v42 = vand.u32 4294901760, %v13427_v23 }
0x20b6   :  { %v12800_v45 = vsub.f32 %v12725_v43, %v12799_v44 }
0x20b7   :  { %v12728_v46 = vsel %vm725_vm1, %v19128_v53, 0  ;;  %v17575_v57 = vpack.c.bf16 %v13428_v42, %v13421_v31 }
0x20b8   :  { %v12801_v61 = vand.u32 4294901760, %v12800_v45  ;;  %v12809_v47 = vand.u32 4294901760, %v12728_v46 }
0x20ba   :  { %v12802_v55 = vsub.f32 %v12800_v45, %v12801_v61  ;;  %v12810_v50 = vsub.f32 %v12728_v46, %v12809_v47 }
0x20bc   :  { %v12803_v52 = vand.u32 4294901760, %v12802_v55  ;;  %v12811_v54 = vand.u32 4294901760, %v12810_v50  ;;  %v17531_v55 = vpack.c.bf16 %v13385_v15, %v13378_v48 }
0x20be   :  { %16469 = vmatprep.mubr.f32.mxu0 %v12803_v52  ;;  %v12812_v51 = vsub.f32 %v12810_v50, %v12811_v54 }
0x20c0   :  { %v12813_v58 = vand.u32 4294901760, %v12812_v51  ;;  %v17563_v51 = vpack.c.bf16 %v13386_v7, %v13379_v11 }
0x20c2   :  { %16470 = vmatmul.mubr.f32.vlgmr.msra.gmra.mrb[26].mxu0 %v12813_v58 }
0x20c3   :  { %17462 = vmatpush3.bf16.msra.mxu0 %v17459_v16  ;;  %16480 = vmatprep.mubr.f32.mxu0 %v12799_v44  ;;  %v13392_v16 = vsub.f32 %v14510_v60, %v13290_v24 }
0x20c4   :  { %17464 = vmatprep.subr.bf16.mxu0 %v17463_v56 }
0x20c5   :  { %v13393_v25 = vand.u32 4294901760, %v13392_v16 }
0x20c7   :  { %17466 = vmatpush3.bf16.msra.mxu0 %v17463_v56  ;;  %v13400_v56 = vand.u32 4294901760, %v13399_v18 }
0x20c8   :  { %17468 = vmatprep.subr.bf16.mxu0 %v17467_v26 }
0x20c9   :  { %v13401_v34 = vsub.f32 %v13399_v18, %v13400_v56  ;;  %v17567_v58 = vpack.c.bf16 %v13400_v56, %v13393_v25 }
0x20ca   :  { %16481 = vmatmul.mubr.f32.vlgmr.msra.gmra.mrb[26].mxu0 %v12809_v47 }
0x20cb   :  { %17470 = vmatpush3.bf16.msra.mxu0 %v17467_v26  ;;  %16491 = vmatprep.mubr.f32.mxu0 %v12800_v45  ;;  %v17515_v26 = vpack.c.bf16 %v13388_v21, %v13381_v19  ;;  %v13402_v39 = vand.u32 4294901760, %v13401_v34  ;;  %v13429_v45 = vsub.f32 %v13427_v23, %v13428_v42 }
0x20cc   :  { %17472 = vmatprep.subr.bf16.mxu0 %v17471_v27 }
0x20cf   :  { %17474 = vmatpush3.bf16.msra.mxu0 %v17471_v27  ;;  %v13394_v27 = vsub.f32 %v13392_v16, %v13393_v25 }
0x20d0   :  { %17476 = vmatprep.subr.bf16.mxu0 %v19110_v3 }
0x20d1   :  { %v13395_v35 = vand.u32 4294901760, %v13394_v27 }
0x20d2   :  { %16492 = vmatmul.mubr.f32.vlgmr.msra.gmra.mrb[26].mxu0 %v12810_v50  ;;  %v17535_v50 = vpack.c.bf16 %v13399_v18, %v13392_v16 }
0x20d3   :  { %17478 = vmatpush3.bf16.msra.mxu0 %v19110_v3  ;;  %16502 = vmatprep.mubr.f32.mxu0 %v12801_v61  ;;  %v17519_v40 = vpack.c.bf16 %v13402_v39, %v13395_v35  ;;  %v13430_v61 = vand.u32 4294901760, %v13429_v45  ;;  %v13913_v39 = vld [vmem:[%s19282_s18 + $0x10] sm:$0xff] }
0x20d4   :  { %17480 = vmatprep.subr.bf16.mxu0 %v19112_v4 }
0x20d7   :  { %17482 = vmatpush3.bf16.msra.mxu0 %v19112_v4 }
0x20d8   :  { %17484 = vmatprep.subr.bf16.mxu0 %v17483_v28 }
0x20da   :  { %16503 = vmatmul.mubr.f32.vlgmr.msra.gmra.mrb[26].mxu0 %v12811_v54  ;;  %v17543_v54 = vpack.c.bf16 %v13427_v23, %v13420_v33  ;;  %v13935_v23 = vand.u32 4294901760, %v13913_v39 }
0x20db   :  { %17486 = vmatpush3.bf16.msra.mxu0 %v17483_v28  ;;  %16513 = vmatprep.mubr.f32.mxu0 %v12799_v44 }
0x20dc   :  { %17488 = vmatprep.subr.bf16.mxu0 %v17487_v30 }
0x20df   :  { %17490 = vmatpush3.bf16.msra.mxu0 %v17487_v30 }
0x20e0   :  { %17492 = vmatprep.subr.bf16.mxu0 %v19110_v3 }
0x20e2   :  { %16514 = vmatmul.mubr.f32.vlgmr.msra.gmra.mrb[26].mxu0 %v12809_v47 }
0x20e3   :  { %17494 = vmatpush3.bf16.msra.mxu0 %v19110_v3  ;;  %16524 = vmatprep.mubr.f32.mxu0 %v12799_v44  ;;  %v13296_v3 = vand.u32 4294901760, %v14512_v0  ;;  %v13422_v44 = vsub.f32 %v13420_v33, %v13421_v31  ;;  %v13914_v33 = vld [vmem:[%s19282_s18 + $0x18] sm:$0xff] }
0x20e4   :  { %17496 = vmatprep.subr.bf16.mxu0 %v19112_v4 }
0x20e5   :  { %v13406_v28 = vsub.f32 %v14512_v0, %v13296_v3  ;;  %v13423_v46 = vand.u32 4294901760, %v13422_v44 }
0x20e7   :  { %17498 = vmatpush3.bf16.msra.mxu0 %v19112_v4  ;;  %v13299_v4 = vand.u32 4294901760, %v14513_v1  ;;  %v13407_v36 = vand.u32 4294901760, %v13406_v28 }
0x20e9   :  { %v19166_v2 = vpack.c.bf16 %v13299_v4, %v13296_v3  ;;  %v13413_v30 = vsub.f32 %v14513_v1, %v13299_v4  ;;  %v13408_v14 = vsub.f32 %v13406_v28, %v13407_v36 }
0x20ea   :  { %16525 = vmatmul.mubr.f32.vlgmr.msra.gmra.mrb[26].mxu0 %v12809_v47  ;;  %v17527_v47 = vpack.c.bf16 %v13430_v61, %v13423_v46  ;;  %v14033_v61 = vsub.f32 %v13913_v39, %v13935_v23 }
0x20eb   :  { %17508 = vmatprep.subr.bf16.mxu1 %v19166_v2  ;;  %v13414_v8 = vand.u32 4294901760, %v13413_v30  ;;  %v13409_v17 = vand.u32 4294901760, %v13408_v14  ;;  %v17539_v52 = vpack.c.bf16 %v13413_v30, %v13406_v28 }
0x20ec   :  { %17510 = vmatpush3.bf16.msra.mxu1 %v19166_v2 }
0x20ed   :  { %17512 = vmatprep.subr.bf16.mxu1 %v19176_v9  ;;  %v13415_v32 = vsub.f32 %v13413_v30, %v13414_v8  ;;  %v17571_v59 = vpack.c.bf16 %v13414_v8, %v13407_v36  ;;  %v13912_v8 = vld [vmem:[%s19282_s18 + $0x8] sm:$0xff] }
0x20ef   :  { %v13416_v29 = vand.u32 4294901760, %v13415_v32  ;;  %v13932_v32 = vand.u32 4294901760, %v13912_v8 }
0x20f0   :  { %17514 = vmatpush3.bf16.msra.mxu1 %v19176_v9 }
0x20f1   :  { %17516 = vmatprep.subr.bf16.mxu1 %v17515_v26  ;;  %v17523_v43 = vpack.c.bf16 %v13416_v29, %v13409_v17  ;;  %v14026_v42 = vsub.f32 %v13912_v8, %v13932_v32 }
0x20f3   :  { %v14027_v44 = vand.u32 4294901760, %v14026_v42 }
0x20f5   :  { %v14028_v46 = vsub.f32 %v14026_v42, %v14027_v44 }
0x21bd   :  { %v16526_v37 = vpop.f32.mrb[26].mxu0 }
0x21be   :  { %v17661_v60 = vadd.f32 %v16526_v37, %v14507_v62  ;;  %v13248_v49 = vpop.f32.mrb[27].mxu0 }
0x21bf   :  { %v17662_v24 = vadd.f32 %v14507_v62, %v13248_v49 }
0x21c0   :  { %v13259_v63 = vmax.f32 %v17661_v60, 0.0 }
0x21c1   :  { %v13258_v0 = vmax.f32 %v17662_v24, 0.0 }
0x21c2   :  { %v13281_v1 = vsel %vm6676_vm11, %v13259_v63, 0 }
0x21c3   :  { %v13366_v3 = vand.u32 4294901760, %v13281_v1  ;;  %v13278_v4 = vsel %vm6676_vm11, %v13258_v0, 0 }
0x21c4   :  { %v13356_v48 = vand.u32 4294901760, %v13278_v4 }
0x21c5   :  { %v13367_v15 = vsub.f32 %v13281_v1, %v13366_v3 }
0x21c6   :  { %v13357_v22 = vsub.f32 %v13278_v4, %v13356_v48 }
0x21c7   :  { %v13368_v5 = vand.u32 4294901760, %v13367_v15 }
0x21c8   :  { %v13358_v6 = vand.u32 4294901760, %v13357_v22 }
0x21c9   :  { %v13369_v10 = vsub.f32 %v13367_v15, %v13368_v5 }
0x21ca   :  { %v13359_v11 = vsub.f32 %v13357_v22, %v13358_v6 }
0x21cb   :  { %v13370_v12 = vand.u32 4294901760, %v13369_v10 }
0x21cc   :  { %v13360_v7 = vand.u32 4294901760, %v13359_v11 }
0x21ce   :  { %16543 = vmatprep.mubr.f32.mxu1 %v13360_v7  ;;  %v14521_v7 = vld [vmem:[%s19281_s17 + $0x1] ss:$0 sm:$0xff] }
0x21cf   :  { %16544 = vmatmul.mubr.f32.vlgmr.msra.gmra.mrb[24].mxu1 %v13370_v12 }
0x21d0   :  { %17518 = vmatpush3.bf16.msra.mxu1 %v17515_v26  ;;  %16562 = vmatprep.mubr.f32.mxu1 %v13356_v48 }
0x21d1   :  { %17520 = vmatprep.subr.bf16.mxu1 %v17519_v40 }
0x21d4   :  { %17522 = vmatpush3.bf16.msra.mxu1 %v17519_v40  ;;  %v13938_v40 = vand.u32 4294901760, %v13914_v33 }
0x21d5   :  { %17524 = vmatprep.subr.bf16.mxu1 %v17523_v43 }
0x21d6   :  { %v19224_v29 = vpack.c.bf16 %v13938_v40, %v13935_v23 }
0x21d8   :  { %17526 = vmatpush3.bf16.msra.mxu1 %v17523_v43 }
0x21d9   :  { %17528 = vmatprep.subr.bf16.mxu1 %v17527_v47 }
0x21dc   :  { %17530 = vmatpush3.bf16.msra.mxu1 %v17527_v47  ;;  %v14040_v47 = vsub.f32 %v13914_v33, %v13938_v40 }
0x21dd   :  { %17532 = vmatprep.subr.bf16.mxu1 %v17531_v55 }
0x21de   :  { %v17615_v49 = vpack.c.bf16 %v14040_v47, %v14033_v61 }
0x21df   :  { %16563 = vmatmul.mubr.f32.vlgmr.msra.gmra.mrb[24].mxu1 %v13366_v3 }
0x21e0   :  { %17534 = vmatpush3.bf16.msra.mxu1 %v17531_v55  ;;  %16581 = vmatprep.mubr.f32.mxu1 %v13357_v22 }
0x21e1   :  { %17536 = vmatprep.subr.bf16.mxu1 %v17535_v50 }
0x21e4   :  { %17538 = vmatpush3.bf16.msra.mxu1 %v17535_v50  ;;  %v14029_v50 = vand.u32 4294901760, %v14028_v46 }
0x21e5   :  { %17540 = vmatprep.subr.bf16.mxu1 %v17539_v52 }
0x21e8   :  { %17542 = vmatpush3.bf16.msra.mxu1 %v17539_v52  ;;  %v14034_v52 = vand.u32 4294901760, %v14033_v61 }
0x21e9   :  { %17544 = vmatprep.subr.bf16.mxu1 %v17543_v54 }
0x21ec   :  { %17546 = vmatpush3.bf16.msra.mxu1 %v17543_v54  ;;  %v14041_v54 = vand.u32 4294901760, %v14040_v47 }
0x21ed   :  { %17548 = vmatprep.subr.bf16.mxu1 %v19146_v38 }
0x21ee   :  { %v17631_v63 = vpack.c.bf16 %v14041_v54, %v14034_v52 }
0x21ef   :  { %16582 = vmatmul.mubr.f32.vlgmr.msra.gmra.mrb[24].mxu1 %v13367_v15 }
0x21f0   :  { %17550 = vmatpush3.bf16.msra.mxu1 %v19146_v38  ;;  %16600 = vmatprep.mubr.f32.mxu1 %v13358_v6 }
0x21f1   :  { %17552 = vmatprep.subr.bf16.mxu1 %v19156_v20 }
0x21f4   :  { %17554 = vmatpush3.bf16.msra.mxu1 %v19156_v20 }
0x21f5   :  { %17556 = vmatprep.subr.bf16.mxu1 %v19166_v2 }
0x21f8   :  { %17558 = vmatpush3.bf16.msra.mxu1 %v19166_v2 }
0x21f9   :  { %17560 = vmatprep.subr.bf16.mxu1 %v19176_v9 }
0x21fc   :  { %17562 = vmatpush3.bf16.msra.mxu1 %v19176_v9 }
0x21fd   :  { %17564 = vmatprep.subr.bf16.mxu1 %v17563_v51 }
0x21ff   :  { %16601 = vmatmul.mubr.f32.vlgmr.msra.gmra.mrb[24].mxu1 %v13368_v5  ;;  %v14520_v5 = vld [vmem:[%s19280_s16 + $0x1] ss:$0 sm:$0xff] }
0x2200   :  { %17566 = vmatpush3.bf16.msra.mxu1 %v17563_v51  ;;  %16619 = vmatprep.mubr.f32.mxu1 %v13356_v48 }
0x2201   :  { %17568 = vmatprep.subr.bf16.mxu1 %v17567_v58 }
0x2204   :  { %17570 = vmatpush3.bf16.msra.mxu1 %v17567_v58  ;;  %v14035_v58 = vsub.f32 %v14033_v61, %v14034_v52 }
0x2205   :  { %17572 = vmatprep.subr.bf16.mxu1 %v17571_v59 }
0x2208   :  { %17574 = vmatpush3.bf16.msra.mxu1 %v17571_v59  ;;  %v14042_v59 = vsub.f32 %v14040_v47, %v14041_v54 }
0x2209   :  { %17576 = vmatprep.subr.bf16.mxu1 %v17575_v57 }
0x220a   :  { %v14043_v62 = vand.u32 4294901760, %v14042_v59 }
0x220c   :  { %17578 = vmatpush3.bf16.msra.mxu1 %v17575_v57  ;;  %v14036_v57 = vand.u32 4294901760, %v14035_v58 }
0x220d   :  { %17580 = vmatprep.subr.bf16.mxu1 %v19146_v38 }
0x220e   :  { %v17607_v37 = vpack.c.bf16 %v14043_v62, %v14036_v57 }
0x220f   :  { %16620 = vmatmul.mubr.f32.vlgmr.msra.gmra.mrb[24].mxu1 %v13366_v3 }
0x2210   :  { %17582 = vmatpush3.bf16.msra.mxu1 %v19146_v38  ;;  %16638 = vmatprep.mubr.f32.mxu1 %v13356_v48 }
0x2211   :  { %17584 = vmatprep.subr.bf16.mxu1 %v19156_v20 }
0x2214   :  { %17586 = vmatpush3.bf16.msra.mxu1 %v19156_v20 }
0x2215   :  { %17588 = vmatprep.subr.bf16.mxu1 %v19166_v2 }
0x2218   :  { %17590 = vmatpush3.bf16.msra.mxu1 %v19166_v2 }
0x2219   :  { %17592 = vmatprep.subr.bf16.mxu1 %v19176_v9 }
0x221c   :  { %17594 = vmatpush3.bf16.msra.mxu1 %v19176_v9 }
0x221f   :  { %16639 = vmatmul.mubr.f32.vlgmr.msra.gmra.mrb[24].mxu1 %v13366_v3 }
0x22f2   :  { %v16640_v16 = vpop.f32.mrb[24].mxu1 }
0x22f3   :  { %v17663_v38 = vadd.f32 %v16640_v16, %v14517_v13  ;;  %v13853_v18 = vpop.f32.mrb[25].mxu1 }
0x22f4   :  { %v17664_v19 = vadd.f32 %v14517_v13, %v13853_v18 }
0x22f5   :  { %v13864_v21 = vadd.f32 %v17663_v38, %v19128_v53 }
0x22f6   :  { %v13863_v20 = vadd.f32 %v17664_v19, %v19124_v41  ;;  %v13911_v41 = vld [vmem:[%s19282_s18] sm:$0xff] }
0x22f7   :  { %v13872_v25 = vsel %vm725_vm1, %v13864_v21, 0.0  ;;  %v13929_v14 = vand.u32 4294901760, %v13911_v41 }
0x22f8   :  { %13873 = vadd.xlane.f32.xlu0 %v13872_v25  ;;  %v13869_v2 = vsel %vm725_vm1, %v13863_v20, 0.0 }
0x22f9   :  { %13870 = vadd.xlane.f32.xlu1 %v13869_v2  ;;  %v19222_v17 = vpack.c.bf16 %v13932_v32, %v13929_v14  ;;  %v14019_v31 = vsub.f32 %v13911_v41, %v13929_v14 }
0x22fb   :  { %17596 = vmatprep.subr.bf16.mxu0 %v19222_v17  ;;  %v14020_v43 = vand.u32 4294901760, %v14019_v31  ;;  %v17611_v60 = vpack.c.bf16 %v14026_v42, %v14019_v31 }
0x22fc   :  { %17598 = vmatpush3.bf16.msra.mxu0 %v19222_v17 }
0x22fd   :  { %17600 = vmatprep.subr.bf16.mxu0 %v19224_v29  ;;  %v14021_v45 = vsub.f32 %v14019_v31, %v14020_v43  ;;  %v17627_v24 = vpack.c.bf16 %v14027_v44, %v14020_v43 }
0x22ff   :  { %v14022_v55 = vand.u32 4294901760, %v14021_v45 }
0x2300   :  { %17602 = vmatpush3.bf16.msra.mxu0 %v19224_v29 }
0x2301   :  { %v17603_v51 = vpack.c.bf16 %v14029_v50, %v14022_v55 }
0x2303   :  { %17604 = vmatprep.subr.bf16.mxu0 %v17603_v51 }
0x2385   :  { %v13874_v9 = vpop.xlane.xlu0 %13873 }
0x2386   :  { %v13876_v56 = vmul.f32 0.03125, %v13874_v9  ;;  %v13871_v26 = vpop.xlane.xlu1 %13870 }
0x2387   :  { %v13875_v27 = vmul.f32 0.03125, %v13871_v26 }
0x2388   :  { %v13878_v28 = vsub.f32 %v13864_v21, %v13876_v56 }
0x2389   :  { %v13877_v30 = vsub.f32 %v13863_v20, %v13875_v27 }
0x238a   :  { %v13880_v34 = vmul.f32 %v13878_v28, %v13878_v28 }
0x238b   :  { %v13879_v35 = vmul.f32 %v13877_v30, %v13877_v30 }
0x238c   :  { %v13884_v36 = vsel %vm725_vm1, %v13880_v34, 0.0  ;;  %v14522_v34 = vld [vmem:[%s19321_s1] ss:$0 sm:$0xff] }
0x238d   :  { %13885 = vadd.xlane.f32.xlu0 %v13884_v36  ;;  %v13881_v53 = vsel %vm725_vm1, %v13879_v35, 0.0 }
0x238e   :  { %13882 = vadd.xlane.f32.xlu1 %v13881_v53 }
0x241a   :  { %v13886_v0 = vpop.xlane.xlu0 %13885 }
0x241b   :  { %v13888_v1 = vmul.f32 0.03125, %v13886_v0  ;;  %v13883_v3 = vpop.xlane.xlu1 %13882 }
0x241c   :  { %v13887_v4 = vmul.f32 0.03125, %v13883_v3 }
0x241d   :  { %v13890_v48 = vadd.f32 1e-05, %v13888_v1 }
0x241e   :  { %v13889_v15 = vadd.f32 1e-05, %v13887_v4 }
0x241f   :  { %18025 = vrsqrt.f32 %v13890_v48 }
0x2420   :  { %18027 = vrsqrt.f32 %v13889_v15 }
0x2429   :  { %v18026_v22 = vpop.eup %18025 }
0x242a   :  { %v18028_v6 = vpop.eup %18027  ;;  %v13894_v10 = vmul.f32 %v18026_v22, %v13878_v28 }
0x242b   :  { %v13893_v11 = vmul.f32 %v18028_v6, %v13877_v30 }
0x242c   :  { %v13902_v12 = vmul.f32 %v14520_v5, %v13894_v10 }
0x242d   :  { %v13901_v13 = vmul.f32 %v14520_v5, %v13893_v11 }
0x242e   :  { %v13910_v16 = vadd.f32 %v14521_v7, %v13902_v12 }
0x242f   :  { %v13909_v38 = vadd.f32 %v14521_v7, %v13901_v13 }
0x2430   :  { %v13926_v18 = vsel %vm725_vm1, %v13910_v16, 0 }
0x2431   :  { %v13923_v19 = vsel %vm725_vm1, %v13909_v38, 0  ;;  %v14007_v21 = vand.u32 4294901760, %v13926_v18 }
0x2432   :  { %v13997_v20 = vand.u32 4294901760, %v13923_v19 }
0x2433   :  { %v14008_v25 = vsub.f32 %v13926_v18, %v14007_v21 }
0x2434   :  { %v13998_v2 = vsub.f32 %v13923_v19, %v13997_v20 }
0x2435   :  { %v14009_v9 = vand.u32 4294901760, %v14008_v25 }
0x2436   :  { %v13999_v56 = vand.u32 4294901760, %v13998_v2 }
0x2437   :  { %v14010_v26 = vsub.f32 %v14008_v25, %v14009_v9 }
0x2438   :  { %v14000_v27 = vsub.f32 %v13998_v2, %v13999_v56 }
0x2439   :  { %v14011_v30 = vand.u32 4294901760, %v14010_v26 }
0x243a   :  { %v14001_v28 = vand.u32 4294901760, %v14000_v27 }
0x243c   :  { %16649 = vmatprep.mubr.f32.mxu0 %v14001_v28 }
0x243d   :  { %16650 = vmatmul.mubr.f32.vlgmr.msra.gmra.mrb[28].mxu0 %v14011_v30 }
0x243e   :  { %17606 = vmatpush3.bf16.msra.mxu0 %v17603_v51  ;;  %16660 = vmatprep.mubr.f32.mxu0 %v13997_v20 }
0x243f   :  { %17608 = vmatprep.subr.bf16.mxu0 %v17607_v37 }
0x2442   :  { %17610 = vmatpush3.bf16.msra.mxu0 %v17607_v37 }
0x2443   :  { %17612 = vmatprep.subr.bf16.mxu0 %v17611_v60 }
0x2445   :  { %16661 = vmatmul.mubr.f32.vlgmr.msra.gmra.mrb[28].mxu0 %v14007_v21 }
0x2446   :  { %17614 = vmatpush3.bf16.msra.mxu0 %v17611_v60  ;;  %16671 = vmatprep.mubr.f32.mxu0 %v13998_v2 }
0x2447   :  { %17616 = vmatprep.subr.bf16.mxu0 %v17615_v49 }
0x244a   :  { %17618 = vmatpush3.bf16.msra.mxu0 %v17615_v49 }
0x244b   :  { %17620 = vmatprep.subr.bf16.mxu0 %v19222_v17 }
0x244d   :  { %16672 = vmatmul.mubr.f32.vlgmr.msra.gmra.mrb[28].mxu0 %v14008_v25 }
0x244e   :  { %17622 = vmatpush3.bf16.msra.mxu0 %v19222_v17  ;;  %16682 = vmatprep.mubr.f32.mxu0 %v13999_v56 }
0x244f   :  { %17624 = vmatprep.subr.bf16.mxu0 %v19224_v29 }
0x2452   :  { %17626 = vmatpush3.bf16.msra.mxu0 %v19224_v29 }
0x2453   :  { %17628 = vmatprep.subr.bf16.mxu0 %v17627_v24 }
0x2455   :  { %16683 = vmatmul.mubr.f32.vlgmr.msra.gmra.mrb[28].mxu0 %v14009_v9 }
0x2456   :  { %17630 = vmatpush3.bf16.msra.mxu0 %v17627_v24  ;;  %16693 = vmatprep.mubr.f32.mxu0 %v13997_v20 }
0x2457   :  { %17632 = vmatprep.subr.bf16.mxu0 %v17631_v63 }
0x245a   :  { %17634 = vmatpush3.bf16.msra.mxu0 %v17631_v63 }
0x245b   :  { %17636 = vmatprep.subr.bf16.mxu0 %v19222_v17 }
0x245d   :  { %16694 = vmatmul.mubr.f32.vlgmr.msra.gmra.mrb[28].mxu0 %v14007_v21 }
0x245e   :  { %17638 = vmatpush3.bf16.msra.mxu0 %v19222_v17  ;;  %16704 = vmatprep.mubr.f32.mxu0 %v13997_v20 }
0x245f   :  { %17640 = vmatprep.subr.bf16.mxu0 %v19224_v29 }
0x2462   :  { %17642 = vmatpush3.bf16.msra.mxu0 %v19224_v29 }
0x2465   :  { %16705 = vmatmul.mubr.f32.vlgmr.msra.gmra.mrb[28].mxu0 %v14007_v21 }
0x2538   :  { %v16706_v35 = vpop.f32.mrb[28].mxu0 }
0x2539   :  { %v17665_v36 = vadd.f32 %v16706_v35, %v14522_v34  ;;  %v14446_v53 = vpop.f32.mrb[29].mxu0 }
0x253a   :  { %v17666_v41 = vadd.f32 %v14522_v34, %v14446_v53 }
0x253b   :  { %14457 = vst [vmem:[#allocation14 + $0x8] sm:$0xff] %v17665_v36 }
0x253c   :  { %14456 = vst [vmem:[#allocation14] sm:$0xff] %v17666_v41 }
0x253d   :  { %18194 = shalt.err (!%p18191_p4)
}
0x253e   :  { %s19322_s3 = sld [smem:[#allocation26_spill]] }
0x2544   :  { %s18195_s20 = scalar_lea.hbm %s19322_s3, 256 }
0x2545   :  { %p18196_p5 = scmp.ne.s32.totalorder %s19322_s3, %s18195_s20  ;;  %p18199_p6 = scmp.lt.u32.totalorder %s18195_s20, %s19322_s3 }
0x2547   :  { %p18201_p7 = pnand %p18199_p6, %p18196_p5 }
0x2549   :  { %18204 = shalt.err (!%p18201_p7)
}
0x254a   :  { %14469 = dma.vmem_to_hbm [thread:$0]  %s14464_s23, 256, %s19322_s3, [#allocation4], %s19314_s25, %s19314_s25, %s19313_s5  }
0x254b   :  { %18213 = dma.done.wait [#allocation4], 256  }
0x254c   :  { %18214 = vsyncadd [#allocation4], 4294967040 }
0x254d   :  { %14473 = vsyncpa [#allocation3], 1 }
0x254e   :  { %14474 = vsyncpa [#allocation6], 1 }
0x254f   :  { %14475 = vsyncpa [#allocation9], 1 }
0x2550   :  { %14476 = vsyncpa [#allocation12], 1 }
0x2551   :  { %14477 = vsyncpa [#allocation4], 1 }

</bundles_post_ra>
